<compile_context>
chip_gen: v6e
topology: v6e:2x2x1
jax: 0.10.0
libtpu: 0.0.40
codegen_flags: <defaults>
</compile_context>

<pallas_src>
import functools
import math

import numpy as np
import jax
import jax.numpy as jnp
from jax import lax
from jax.experimental import pallas as pl
from jax.experimental.pallas import tpu as pltpu

BN_EPS = 1e-5


# ---------------------------------------------------------------------------
# Fused kernel: conv1+BN1+ReLU -> maxpool2x2 -> conv2+BN2 -> relu5_3 ->
#               Gram/out_size -> signed-sqrt -> L2 normalize ->
#               (BN1d + Linear folded into one matmul)
# ---------------------------------------------------------------------------
def _fused_bcnn_kernel(x_ref, sel_ref, w1_ref, b1_ref, w2_ref, b2_ref,
                       wc_ref, bc_ref, o_ref,
                       pad1_ref, patch1_ref, pad2_ref, patch2_ref, zflat_ref,
                       *, H, W, Cin, C1, C2):
    H2, W2 = H // 2, W // 2
    S = H2 * W2                      # spatial size after the maxpool (=out_size)

    # Zero only the first time: interiors are fully rewritten every grid step,
    # so the zero border ring persists in scratch for every batch element.
    @pl.when(pl.program_id(0) == 0)
    def _():
        pad1_ref[...] = jnp.zeros(pad1_ref.shape, pad1_ref.dtype)
        pad2_ref[...] = jnp.zeros(pad2_ref.shape, pad2_ref.dtype)

    # ----------------- conv1 (3x3, pad 1) + folded BN1 + ReLU ---------------
    pad1_ref[1:H + 1, 1:W + 1, :] = x_ref[0]
    xp1 = pad1_ref[...]                                       # (H+2, W+2, Cin)
    for t in range(9):                                        # im2col, static
        ky, kx = t // 3, t % 3
        piece = xp1[ky:ky + H, kx:kx + W, :].reshape(H * W, Cin)
        patch1_ref[:, t * Cin:(t + 1) * Cin] = piece
    y1 = jnp.dot(patch1_ref[...], w1_ref[...],
                 preferred_element_type=jnp.float32) + b1_ref[...]
    y1 = jnp.maximum(y1, 0.0)                                 # (H*W, C1)

    # ----------------- fused 2x2 / stride-2 maxpool -------------------------
    # One MXU matmul against the host-precomputed stacked phase selector,
    # then a max over the 4 phase blocks (static, sublane-aligned slices).
    psel = jnp.dot(sel_ref[...], y1,
                   preferred_element_type=jnp.float32)        # (4*S, C1)
    pooled = jnp.maximum(
        jnp.maximum(psel[0 * S:1 * S], psel[1 * S:2 * S]),
        jnp.maximum(psel[2 * S:3 * S], psel[3 * S:4 * S]))    # (S, C1)

    # ----------------- conv2 (3x3, pad 1) + folded BN2 ----------------------
    pad2_ref[1:H2 + 1, 1:W2 + 1, :] = pooled.reshape(H2, W2, C1)
    xp2 = pad2_ref[...]                                       # (H2+2, W2+2, C1)
    for t in range(9):
        ky, kx = t // 3, t % 3
        piece = xp2[ky:ky + H2, kx:kx + W2, :].reshape(S, C1)
        patch2_ref[:, t * C1:(t + 1) * C1] = piece
    f = jnp.dot(patch2_ref[...], w2_ref[...],
                preferred_element_type=jnp.float32) + b2_ref[...]   # (S, C2)

    # ----------------- bilinear head ----------------------------------------
    f = jnp.maximum(f, 0.0)                                   # relu5_3
    g = lax.dot_general(f, f, (((0,), (0,)), ((), ())),       # X @ X^T on MXU
                        preferred_element_type=jnp.float32)   # (C2, C2)
    g = g * (1.0 / S)
    sgn = jnp.where(g > 0, 1.0, jnp.where(g < 0, -1.0, 0.0))
    z = sgn * jnp.sqrt(jnp.abs(g) + 1e-8)                     # signed sqrt
    ss = jnp.sum(jnp.sum(z * z, axis=1, keepdims=True), axis=0, keepdims=True)
    inv_nrm = lax.rsqrt(jnp.maximum(ss, 1e-24))               # (1,1), EUP

    # flatten (C2, C2) row-major into a lane-dense (1, C2*C2) VMEM buffer
    for a in range(C2):
        zflat_ref[:, a * C2:(a + 1) * C2] = z[a:a + 1, :]

    # BatchNorm1d + Linear folded host-side into wc / bc: one MXU matmul.
    logits = jnp.dot(zflat_ref[...], wc_ref[...],
                     preferred_element_type=jnp.float32)      # (1, K)
    o_ref[0] = logits * inv_nrm + bc_ref[...]


# ---------------------------------------------------------------------------
# Host-side constant: stacked 2x2/stride-2 maxpool phase-selection matrix
# ---------------------------------------------------------------------------
def _pool_select_matrix(H, W):
    H2, W2 = H // 2, W // 2
    S = H2 * W2
    sel = np.zeros((4 * S, H * W), np.float32)
    p = 0
    for ph in range(2):
        for pw in range(2):
            for i in range(H2):
                for j in range(W2):
                    s = i * W2 + j
                    src = (2 * i + ph) * W + (2 * j + pw)
                    sel[p * S + s, src] = 1.0
            p += 1
    return jnp.asarray(sel)


# ---------------------------------------------------------------------------
# Wrapper: BN folding + a single pallas_call over the batch
# ---------------------------------------------------------------------------
def bcnn_bn1d_forward(x_nchw, p):
    N, Cin, H, W = x_nchw.shape
    C1 = p["conv1_w"].shape[-1]
    C2 = p["conv2_w"].shape[-1]
    K = p["fc_b"].shape[0]
    H2, W2 = H // 2, W // 2
    S = H2 * W2

    x = jnp.transpose(x_nchw, (0, 2, 3, 1))           # NCHW -> NHWC (tiny, once)
    sel = _pool_select_matrix(H, W)                   # (4*S, H*W), constant

    # Fold BatchNorm2d (inference) into the conv weights / biases.
    s1 = p["bn1_g"] / jnp.sqrt(p["bn1_v"] + BN_EPS)
    w1 = (p["conv1_w"] * s1).reshape(9 * Cin, C1)
    b1 = ((p["conv1_b"] - p["bn1_m"]) * s1 + p["bn1_b"]).reshape(1, C1)
    s2 = p["bn2_g"] / jnp.sqrt(p["bn2_v"] + BN_EPS)
    w2 = (p["conv2_w"] * s2).reshape(9 * C1, C2)
    b2 = ((p["conv2_b"] - p["bn2_m"]) * s2 + p["bn2_b"]).reshape(1, C2)

    # Fold BatchNorm1d (inference) into the classifier.
    g1d = p["bn1d_g"] / jnp.sqrt(p["bn1d_v"] + BN_EPS)        # (C2*C2,)
    sh1d = p["bn1d_b"] - p["bn1d_m"] * g1d
    wc = jnp.transpose(p["fc_w"] * g1d[None, :])              # (C2*C2, K)
    bc = (p["fc_b"] + p["fc_w"] @ sh1d).reshape(1, K)

    kern = functools.partial(_fused_bcnn_kernel,
                             H=H, W=W, Cin=Cin, C1=C1, C2=C2)
    out = pl.pallas_call(
        kern,
        out_shape=jax.ShapeDtypeStruct((N, 1, K), jnp.float32),
        grid=(N,),
        in_specs=[
            pl.BlockSpec((1, H, W, Cin), lambda n: (n, 0, 0, 0)),
            pl.BlockSpec((4 * S, H * W), lambda n: (0, 0)),
            pl.BlockSpec((9 * Cin, C1), lambda n: (0, 0)),
            pl.BlockSpec((1, C1), lambda n: (0, 0)),
            pl.BlockSpec((9 * C1, C2), lambda n: (0, 0)),
            pl.BlockSpec((1, C2), lambda n: (0, 0)),
            pl.BlockSpec((C2 * C2, K), lambda n: (0, 0)),
            pl.BlockSpec((1, K), lambda n: (0, 0)),
        ],
        out_specs=pl.BlockSpec((1, 1, K), lambda n: (n, 0, 0)),
        scratch_shapes=[
            pltpu.VMEM((H + 2, W + 2, Cin), jnp.float32),     # padded input
            pltpu.VMEM((H * W, 9 * Cin), jnp.float32),        # im2col conv1
            pltpu.VMEM((H2 + 2, W2 + 2, C1), jnp.float32),    # padded pooled map
            pltpu.VMEM((S, 9 * C1), jnp.float32),             # im2col conv2
            pltpu.VMEM((1, C2 * C2), jnp.float32),            # flattened Gram
        ],
        compiler_params=pltpu.CompilerParams(
            dimension_semantics=("parallel",)),
    )(x, sel, w1, b1, w2, b2, wc, bc)
    return out[:, 0, :]


# ---------------------------------------------------------------------------
# Deterministic synthetic parameters (shapes follow the module's __init__)
# ---------------------------------------------------------------------------
def init_params(key, cin=3, c1=16, c2=32, num_classes=10):
    ks = jax.random.split(key, 16)
    p = {}
    p["conv1_w"] = (math.sqrt(2.0 / (9 * c1))
                    * jax.random.normal(ks[0], (3, 3, cin, c1), jnp.float32))
    p["conv1_b"] = jnp.zeros((c1,), jnp.float32)
    p["bn1_g"] = 1.0 + 0.1 * jax.random.normal(ks[1], (c1,), jnp.float32)
    p["bn1_b"] = 0.1 * jax.random.normal(ks[2], (c1,), jnp.float32)
    p["bn1_m"] = 0.05 * jax.random.normal(ks[3], (c1,), jnp.float32)
    p["bn1_v"] = 0.5 + jax.random.uniform(ks[4], (c1,), jnp.float32)
    p["conv2_w"] = (math.sqrt(2.0 / (9 * c2))
                    * jax.random.normal(ks[5], (3, 3, c1, c2), jnp.float32))
    p["conv2_b"] = jnp.zeros((c2,), jnp.float32)
    p["bn2_g"] = 1.0 + 0.1 * jax.random.normal(ks[6], (c2,), jnp.float32)
    p["bn2_b"] = 0.1 * jax.random.normal(ks[7], (c2,), jnp.float32)
    p["bn2_m"] = 0.05 * jax.random.normal(ks[8], (c2,), jnp.float32)
    p["bn2_v"] = 0.5 + jax.random.uniform(ks[9], (c2,), jnp.float32)
    d = c2 * c2                                   # out_channel ** 2
    p["bn1d_g"] = 1.0 + 0.1 * jax.random.normal(ks[10], (d,), jnp.float32)
    p["bn1d_b"] = 0.1 * jax.random.normal(ks[11], (d,), jnp.float32)
    p["bn1d_m"] = 0.01 * jax.random.normal(ks[12], (d,), jnp.float32)
    p["bn1d_v"] = 0.5 + jax.random.uniform(ks[13], (d,), jnp.float32)
    bound = 1.0 / math.sqrt(d)
    p["fc_w"] = jax.random.uniform(ks[14], (num_classes, d), jnp.float32,
                                   minval=-bound, maxval=bound)
    p["fc_b"] = 0.1 * jax.random.normal(ks[15], (num_classes,), jnp.float32)
    return p


# ---------------------------------------------------------------------------
# Pure-JAX reference (for correctness check)
# ---------------------------------------------------------------------------
def reference_forward(x_nchw, p):
    def conv_bn(x, w, b, g, be, m, v, relu):
        y = lax.conv_general_dilated(
            x, w, window_strides=(1, 1), padding="SAME",
            dimension_numbers=("NHWC", "HWIO", "NHWC")) + b
        y = (y - m) / jnp.sqrt(v + BN_EPS) * g + be
        return jnp.maximum(y, 0.0) if relu else y

    x = jnp.transpose(x_nchw, (0, 2, 3, 1))
    y = conv_bn(x, p["conv1_w"], p["conv1_b"], p["bn1_g"], p["bn1_b"],
                p["bn1_m"], p["bn1_v"], True)
    y = lax.reduce_window(y, -jnp.inf, lax.max, (1, 2, 2, 1), (1, 2, 2, 1),
                          "VALID")
    y = conv_bn(y, p["conv2_w"], p["conv2_b"], p["bn2_g"], p["bn2_b"],
                p["bn2_m"], p["bn2_v"], False)
    N, H, W, C = y.shape
    S = H * W
    f = jnp.maximum(jnp.transpose(y, (0, 3, 1, 2)).reshape(N, C, S), 0.0)
    g = jnp.einsum("ncs,nds->ncd", f, f) / S
    z = jnp.sign(g) * jnp.sqrt(jnp.abs(g) + 1e-8)
    zf = z.reshape(N, C * C)
    zf = zf / jnp.maximum(jnp.sqrt(jnp.sum(zf * zf, axis=1, keepdims=True)),
                          1e-12)
    zf = (zf - p["bn1d_m"]) / jnp.sqrt(p["bn1d_v"] + BN_EPS) * p["bn1d_g"] \
        + p["bn1d_b"]
    return zf @ p["fc_w"].T + p["fc_b"]


if __name__ == "__main__":
    key = jax.random.PRNGKey(0)
    kx, kp = jax.random.split(key)
    x = jax.random.normal(kx, (2, 3, 16, 16), jnp.float32)   # N=2, Cin=3, 16x16
    params = init_params(kp)

    fwd = jax.jit(bcnn_bn1d_forward)
    out = jax.block_until_ready(fwd(x, params))
    assert out.shape == (2, 10), out.shape

    ref = reference_forward(x, params)
    err = float(jnp.max(jnp.abs(out - ref)))
    if not bool(jnp.all(jnp.isfinite(out))) or err > 2e-3:
        raise RuntimeError(f"Pallas kernel mismatch vs reference: max abs err={err}")
    print("KERNEL_OK")
</pallas_src>

<mosaic_0001>
module attributes {stable_mosaic.version = 11 : i64} {
  func.func @_fused_bcnn_kernel(%arg0: i32, %arg1: memref<1x16x16x3xf32, #tpu.memory_space<vmem>>, %arg2: memref<256x256xf32, #tpu.memory_space<vmem>>, %arg3: memref<27x16xf32, #tpu.memory_space<vmem>>, %arg4: memref<1x16xf32, #tpu.memory_space<vmem>>, %arg5: memref<144x32xf32, #tpu.memory_space<vmem>>, %arg6: memref<1x32xf32, #tpu.memory_space<vmem>>, %arg7: memref<1024x10xf32, #tpu.memory_space<vmem>>, %arg8: memref<1x10xf32, #tpu.memory_space<vmem>>, %arg9: memref<1x1x10xf32, #tpu.memory_space<vmem>>, %arg10: memref<18x18x3xf32, #tpu.memory_space<vmem>>, %arg11: memref<256x27xf32, #tpu.memory_space<vmem>>, %arg12: memref<10x10x16xf32, #tpu.memory_space<vmem>>, %arg13: memref<64x144xf32, #tpu.memory_space<vmem>>, %arg14: memref<1x1024xf32, #tpu.memory_space<vmem>>) attributes {dimension_semantics = [#tpu.dimension_semantics<parallel>], iteration_bounds = array<i64: 2>, scalar_prefetch = 0 : i64, scratch_operands = 5 : i64, tpu.core_type = #tpu.core_type<tc>, window_params = [{transform_indices = @transform_0, window_bounds = array<i64: 1, 16, 16, 3>}, {pipeline_mode = #tpu.pipeline_mode<synchronous>, transform_indices = @transform_1, window_bounds = array<i64: 256, 256>}, {pipeline_mode = #tpu.pipeline_mode<synchronous>, transform_indices = @transform_2, window_bounds = array<i64: 27, 16>}, {pipeline_mode = #tpu.pipeline_mode<synchronous>, transform_indices = @transform_3, window_bounds = array<i64: 1, 16>}, {pipeline_mode = #tpu.pipeline_mode<synchronous>, transform_indices = @transform_4, window_bounds = array<i64: 144, 32>}, {pipeline_mode = #tpu.pipeline_mode<synchronous>, transform_indices = @transform_5, window_bounds = array<i64: 1, 32>}, {pipeline_mode = #tpu.pipeline_mode<synchronous>, transform_indices = @transform_6, window_bounds = array<i64: 1024, 10>}, {pipeline_mode = #tpu.pipeline_mode<synchronous>, transform_indices = @transform_7, window_bounds = array<i64: 1, 10>}, {transform_indices = @transform_8, window_bounds = array<i64: 1, 1, 10>}]} {
    %c0_i32 = arith.constant 0 : i32
    %0 = arith.cmpi eq, %arg0, %c0_i32 : i32
    %1 = arith.extui %0 : i1 to i32
    %c0_i32_0 = arith.constant 0 : i32
    %2 = arith.cmpi ne, %1, %c0_i32_0 : i32
    scf.if %2 {
      %cst_111 = arith.constant 0.000000e+00 : f32
      %188 = vector.broadcast %cst_111 : f32 to vector<18x18x3xf32>
      %c0_112 = arith.constant 0 : index
      %c0_113 = arith.constant 0 : index
      %c0_114 = arith.constant 0 : index
      %189 = vector.load %arg10[%c0_112, %c0_113, %c0_114] : memref<18x18x3xf32, #tpu.memory_space<vmem>>, vector<18x18x3xf32>
      tpu.vector_store %arg10[%c0_112, %c0_113, %c0_114], %188 {strides = array<i32>} : memref<18x18x3xf32, #tpu.memory_space<vmem>>, vector<18x18x3xf32>,
      %cst_115 = arith.constant 0.000000e+00 : f32
      %190 = vector.broadcast %cst_115 : f32 to vector<10x10x16xf32>
      %c0_116 = arith.constant 0 : index
      %c0_117 = arith.constant 0 : index
      %c0_118 = arith.constant 0 : index
      %191 = vector.load %arg12[%c0_116, %c0_117, %c0_118] : memref<10x10x16xf32, #tpu.memory_space<vmem>>, vector<10x10x16xf32>
      tpu.vector_store %arg12[%c0_116, %c0_117, %c0_118], %190 {strides = array<i32>} : memref<10x10x16xf32, #tpu.memory_space<vmem>>, vector<10x10x16xf32>,
    } else {
    }
    %c0 = arith.constant 0 : index
    %c0_1 = arith.constant 0 : index
    %c0_2 = arith.constant 0 : index
    %c0_3 = arith.constant 0 : index
    %3 = vector.load %arg1[%c0, %c0_1, %c0_2, %c0_3] : memref<1x16x16x3xf32, #tpu.memory_space<vmem>>, vector<1x16x16x3xf32>
    %4 = vector.shape_cast %3 : vector<1x16x16x3xf32> to vector<16x16x3xf32>
    %c1 = arith.constant 1 : index
    %c1_4 = arith.constant 1 : index
    %c0_5 = arith.constant 0 : index
    %5 = vector.load %arg10[%c1, %c1_4, %c0_5] : memref<18x18x3xf32, #tpu.memory_space<vmem>>, vector<16x16x3xf32>
    tpu.vector_store %arg10[%c1, %c1_4, %c0_5], %4 {strides = array<i32>} : memref<18x18x3xf32, #tpu.memory_space<vmem>>, vector<16x16x3xf32>,
    %c0_6 = arith.constant 0 : index
    %c0_7 = arith.constant 0 : index
    %c0_8 = arith.constant 0 : index
    %6 = vector.load %arg10[%c0_6, %c0_7, %c0_8] : memref<18x18x3xf32, #tpu.memory_space<vmem>>, vector<18x18x3xf32>
    %7 = vector.extract_strided_slice %6 {offsets = [0, 0, 0], sizes = [16, 16, 3], strides = [1, 1, 1]} : vector<18x18x3xf32> to vector<16x16x3xf32>
    %8 = vector.shape_cast %7 : vector<16x16x3xf32> to vector<256x3xf32>
    %c0_9 = arith.constant 0 : index
    %c0_10 = arith.constant 0 : index
    %9 = vector.load %arg11[%c0_9, %c0_10] : memref<256x27xf32, #tpu.memory_space<vmem>>, vector<256x3xf32>
    tpu.vector_store %arg11[%c0_9, %c0_10], %8 {strides = array<i32>} : memref<256x27xf32, #tpu.memory_space<vmem>>, vector<256x3xf32>,
    %10 = vector.extract_strided_slice %6 {offsets = [0, 1, 0], sizes = [16, 16, 3], strides = [1, 1, 1]} : vector<18x18x3xf32> to vector<16x16x3xf32>
    %11 = vector.shape_cast %10 : vector<16x16x3xf32> to vector<256x3xf32>
    %c0_11 = arith.constant 0 : index
    %c3 = arith.constant 3 : index
    %12 = vector.load %arg11[%c0_11, %c3] : memref<256x27xf32, #tpu.memory_space<vmem>>, vector<256x3xf32>
    tpu.vector_store %arg11[%c0_11, %c3], %11 {strides = array<i32>} : memref<256x27xf32, #tpu.memory_space<vmem>>, vector<256x3xf32>,
    %13 = vector.extract_strided_slice %6 {offsets = [0, 2, 0], sizes = [16, 16, 3], strides = [1, 1, 1]} : vector<18x18x3xf32> to vector<16x16x3xf32>
    %14 = vector.shape_cast %13 : vector<16x16x3xf32> to vector<256x3xf32>
    %c0_12 = arith.constant 0 : index
    %c6 = arith.constant 6 : index
    %15 = vector.load %arg11[%c0_12, %c6] : memref<256x27xf32, #tpu.memory_space<vmem>>, vector<256x3xf32>
    tpu.vector_store %arg11[%c0_12, %c6], %14 {strides = array<i32>} : memref<256x27xf32, #tpu.memory_space<vmem>>, vector<256x3xf32>,
    %16 = vector.extract_strided_slice %6 {offsets = [1, 0, 0], sizes = [16, 16, 3], strides = [1, 1, 1]} : vector<18x18x3xf32> to vector<16x16x3xf32>
    %17 = vector.shape_cast %16 : vector<16x16x3xf32> to vector<256x3xf32>
    %c0_13 = arith.constant 0 : index
    %c9 = arith.constant 9 : index
    %18 = vector.load %arg11[%c0_13, %c9] : memref<256x27xf32, #tpu.memory_space<vmem>>, vector<256x3xf32>
    tpu.vector_store %arg11[%c0_13, %c9], %17 {strides = array<i32>} : memref<256x27xf32, #tpu.memory_space<vmem>>, vector<256x3xf32>,
    %19 = vector.extract_strided_slice %6 {offsets = [1, 1, 0], sizes = [16, 16, 3], strides = [1, 1, 1]} : vector<18x18x3xf32> to vector<16x16x3xf32>
    %20 = vector.shape_cast %19 : vector<16x16x3xf32> to vector<256x3xf32>
    %c0_14 = arith.constant 0 : index
    %c12 = arith.constant 12 : index
    %21 = vector.load %arg11[%c0_14, %c12] : memref<256x27xf32, #tpu.memory_space<vmem>>, vector<256x3xf32>
    tpu.vector_store %arg11[%c0_14, %c12], %20 {strides = array<i32>} : memref<256x27xf32, #tpu.memory_space<vmem>>, vector<256x3xf32>,
    %22 = vector.extract_strided_slice %6 {offsets = [1, 2, 0], sizes = [16, 16, 3], strides = [1, 1, 1]} : vector<18x18x3xf32> to vector<16x16x3xf32>
    %23 = vector.shape_cast %22 : vector<16x16x3xf32> to vector<256x3xf32>
    %c0_15 = arith.constant 0 : index
    %c15 = arith.constant 15 : index
    %24 = vector.load %arg11[%c0_15, %c15] : memref<256x27xf32, #tpu.memory_space<vmem>>, vector<256x3xf32>
    tpu.vector_store %arg11[%c0_15, %c15], %23 {strides = array<i32>} : memref<256x27xf32, #tpu.memory_space<vmem>>, vector<256x3xf32>,
    %25 = vector.extract_strided_slice %6 {offsets = [2, 0, 0], sizes = [16, 16, 3], strides = [1, 1, 1]} : vector<18x18x3xf32> to vector<16x16x3xf32>
    %26 = vector.shape_cast %25 : vector<16x16x3xf32> to vector<256x3xf32>
    %c0_16 = arith.constant 0 : index
    %c18 = arith.constant 18 : index
    %27 = vector.load %arg11[%c0_16, %c18] : memref<256x27xf32, #tpu.memory_space<vmem>>, vector<256x3xf32>
    tpu.vector_store %arg11[%c0_16, %c18], %26 {strides = array<i32>} : memref<256x27xf32, #tpu.memory_space<vmem>>, vector<256x3xf32>,
    %28 = vector.extract_strided_slice %6 {offsets = [2, 1, 0], sizes = [16, 16, 3], strides = [1, 1, 1]} : vector<18x18x3xf32> to vector<16x16x3xf32>
    %29 = vector.shape_cast %28 : vector<16x16x3xf32> to vector<256x3xf32>
    %c0_17 = arith.constant 0 : index
    %c21 = arith.constant 21 : index
    %30 = vector.load %arg11[%c0_17, %c21] : memref<256x27xf32, #tpu.memory_space<vmem>>, vector<256x3xf32>
    tpu.vector_store %arg11[%c0_17, %c21], %29 {strides = array<i32>} : memref<256x27xf32, #tpu.memory_space<vmem>>, vector<256x3xf32>,
    %31 = vector.extract_strided_slice %6 {offsets = [2, 2, 0], sizes = [16, 16, 3], strides = [1, 1, 1]} : vector<18x18x3xf32> to vector<16x16x3xf32>
    %32 = vector.shape_cast %31 : vector<16x16x3xf32> to vector<256x3xf32>
    %c0_18 = arith.constant 0 : index
    %c24 = arith.constant 24 : index
    %33 = vector.load %arg11[%c0_18, %c24] : memref<256x27xf32, #tpu.memory_space<vmem>>, vector<256x3xf32>
    tpu.vector_store %arg11[%c0_18, %c24], %32 {strides = array<i32>} : memref<256x27xf32, #tpu.memory_space<vmem>>, vector<256x3xf32>,
    %c0_19 = arith.constant 0 : index
    %c0_20 = arith.constant 0 : index
    %34 = vector.load %arg11[%c0_19, %c0_20] : memref<256x27xf32, #tpu.memory_space<vmem>>, vector<256x27xf32>
    %c0_21 = arith.constant 0 : index
    %c0_22 = arith.constant 0 : index
    %35 = vector.load %arg3[%c0_21, %c0_22] : memref<27x16xf32, #tpu.memory_space<vmem>>, vector<27x16xf32>
    %cst = arith.constant dense<0.000000e+00> : vector<256x16xf32>
    %36 = tpu.matmul %34, %35, %cst {dimension_numbers = #tpu.dot_dimension_numbers<[1], [0], [0], [1], [0, 0, 1, 1], [], []>} : vector<256x27xf32>, vector<27x16xf32>, vector<256x16xf32> -> vector<256x16xf32>
    %c0_23 = arith.constant 0 : index
    %c0_24 = arith.constant 0 : index
    %37 = vector.load %arg4[%c0_23, %c0_24] : memref<1x16xf32, #tpu.memory_space<vmem>>, vector<1x16xf32>
    %38 = vector.broadcast %37 : vector<1x16xf32> to vector<256x16xf32>
    %39 = arith.addf %36, %38 : vector<256x16xf32>
    %cst_25 = arith.constant 0.000000e+00 : f32
    %40 = vector.broadcast %cst_25 : f32 to vector<256x16xf32>
    %41 = arith.maximumf %39, %40 : vector<256x16xf32>
    %c0_26 = arith.constant 0 : index
    %c0_27 = arith.constant 0 : index
    %42 = vector.load %arg2[%c0_26, %c0_27] : memref<256x256xf32, #tpu.memory_space<vmem>>, vector<256x256xf32>
    %cst_28 = arith.constant dense<0.000000e+00> : vector<256x16xf32>
    %43 = tpu.matmul %42, %41, %cst_28 {dimension_numbers = #tpu.dot_dimension_numbers<[1], [0], [0], [1], [0, 0, 1, 1], [], []>} : vector<256x256xf32>, vector<256x16xf32>, vector<256x16xf32> -> vector<256x16xf32>
    %44 = vector.extract_strided_slice %43 {offsets = [0, 0], sizes = [64, 16], strides = [1, 1]} : vector<256x16xf32> to vector<64x16xf32>
    %45 = vector.extract_strided_slice %43 {offsets = [64, 0], sizes = [64, 16], strides = [1, 1]} : vector<256x16xf32> to vector<64x16xf32>
    %46 = arith.maximumf %44, %45 : vector<64x16xf32>
    %47 = vector.extract_strided_slice %43 {offsets = [128, 0], sizes = [64, 16], strides = [1, 1]} : vector<256x16xf32> to vector<64x16xf32>
    %48 = vector.extract_strided_slice %43 {offsets = [192, 0], sizes = [64, 16], strides = [1, 1]} : vector<256x16xf32> to vector<64x16xf32>
    %49 = arith.maximumf %47, %48 : vector<64x16xf32>
    %50 = arith.maximumf %46, %49 : vector<64x16xf32>
    %51 = vector.shape_cast %50 : vector<64x16xf32> to vector<8x8x16xf32>
    %c1_29 = arith.constant 1 : index
    %c1_30 = arith.constant 1 : index
    %c0_31 = arith.constant 0 : index
    %52 = vector.load %arg12[%c1_29, %c1_30, %c0_31] : memref<10x10x16xf32, #tpu.memory_space<vmem>>, vector<8x8x16xf32>
    tpu.vector_store %arg12[%c1_29, %c1_30, %c0_31], %51 {strides = array<i32>} : memref<10x10x16xf32, #tpu.memory_space<vmem>>, vector<8x8x16xf32>,
    %c0_32 = arith.constant 0 : index
    %c0_33 = arith.constant 0 : index
    %c0_34 = arith.constant 0 : index
    %53 = vector.load %arg12[%c0_32, %c0_33, %c0_34] : memref<10x10x16xf32, #tpu.memory_space<vmem>>, vector<10x10x16xf32>
    %54 = vector.extract_strided_slice %53 {offsets = [0, 0, 0], sizes = [8, 8, 16], strides = [1, 1, 1]} : vector<10x10x16xf32> to vector<8x8x16xf32>
    %55 = vector.shape_cast %54 : vector<8x8x16xf32> to vector<64x16xf32>
    %c0_35 = arith.constant 0 : index
    %c0_36 = arith.constant 0 : index
    %56 = vector.load %arg13[%c0_35, %c0_36] : memref<64x144xf32, #tpu.memory_space<vmem>>, vector<64x16xf32>
    tpu.vector_store %arg13[%c0_35, %c0_36], %55 {strides = array<i32>} : memref<64x144xf32, #tpu.memory_space<vmem>>, vector<64x16xf32>,
    %57 = vector.extract_strided_slice %53 {offsets = [0, 1, 0], sizes = [8, 8, 16], strides = [1, 1, 1]} : vector<10x10x16xf32> to vector<8x8x16xf32>
    %58 = vector.shape_cast %57 : vector<8x8x16xf32> to vector<64x16xf32>
    %c0_37 = arith.constant 0 : index
    %c16 = arith.constant 16 : index
    %59 = vector.load %arg13[%c0_37, %c16] : memref<64x144xf32, #tpu.memory_space<vmem>>, vector<64x16xf32>
    tpu.vector_store %arg13[%c0_37, %c16], %58 {strides = array<i32>} : memref<64x144xf32, #tpu.memory_space<vmem>>, vector<64x16xf32>,
    %60 = vector.extract_strided_slice %53 {offsets = [0, 2, 0], sizes = [8, 8, 16], strides = [1, 1, 1]} : vector<10x10x16xf32> to vector<8x8x16xf32>
    %61 = vector.shape_cast %60 : vector<8x8x16xf32> to vector<64x16xf32>
    %c0_38 = arith.constant 0 : index
    %c32 = arith.constant 32 : index
    %62 = vector.load %arg13[%c0_38, %c32] : memref<64x144xf32, #tpu.memory_space<vmem>>, vector<64x16xf32>
    tpu.vector_store %arg13[%c0_38, %c32], %61 {strides = array<i32>} : memref<64x144xf32, #tpu.memory_space<vmem>>, vector<64x16xf32>,
    %63 = vector.extract_strided_slice %53 {offsets = [1, 0, 0], sizes = [8, 8, 16], strides = [1, 1, 1]} : vector<10x10x16xf32> to vector<8x8x16xf32>
    %64 = vector.shape_cast %63 : vector<8x8x16xf32> to vector<64x16xf32>
    %c0_39 = arith.constant 0 : index
    %c48 = arith.constant 48 : index
    %65 = vector.load %arg13[%c0_39, %c48] : memref<64x144xf32, #tpu.memory_space<vmem>>, vector<64x16xf32>
    tpu.vector_store %arg13[%c0_39, %c48], %64 {strides = array<i32>} : memref<64x144xf32, #tpu.memory_space<vmem>>, vector<64x16xf32>,
    %66 = vector.extract_strided_slice %53 {offsets = [1, 1, 0], sizes = [8, 8, 16], strides = [1, 1, 1]} : vector<10x10x16xf32> to vector<8x8x16xf32>
    %67 = vector.shape_cast %66 : vector<8x8x16xf32> to vector<64x16xf32>
    %c0_40 = arith.constant 0 : index
    %c64 = arith.constant 64 : index
    %68 = vector.load %arg13[%c0_40, %c64] : memref<64x144xf32, #tpu.memory_space<vmem>>, vector<64x16xf32>
    tpu.vector_store %arg13[%c0_40, %c64], %67 {strides = array<i32>} : memref<64x144xf32, #tpu.memory_space<vmem>>, vector<64x16xf32>,
    %69 = vector.extract_strided_slice %53 {offsets = [1, 2, 0], sizes = [8, 8, 16], strides = [1, 1, 1]} : vector<10x10x16xf32> to vector<8x8x16xf32>
    %70 = vector.shape_cast %69 : vector<8x8x16xf32> to vector<64x16xf32>
    %c0_41 = arith.constant 0 : index
    %c80 = arith.constant 80 : index
    %71 = vector.load %arg13[%c0_41, %c80] : memref<64x144xf32, #tpu.memory_space<vmem>>, vector<64x16xf32>
    tpu.vector_store %arg13[%c0_41, %c80], %70 {strides = array<i32>} : memref<64x144xf32, #tpu.memory_space<vmem>>, vector<64x16xf32>,
    %72 = vector.extract_strided_slice %53 {offsets = [2, 0, 0], sizes = [8, 8, 16], strides = [1, 1, 1]} : vector<10x10x16xf32> to vector<8x8x16xf32>
    %73 = vector.shape_cast %72 : vector<8x8x16xf32> to vector<64x16xf32>
    %c0_42 = arith.constant 0 : index
    %c96 = arith.constant 96 : index
    %74 = vector.load %arg13[%c0_42, %c96] : memref<64x144xf32, #tpu.memory_space<vmem>>, vector<64x16xf32>
    tpu.vector_store %arg13[%c0_42, %c96], %73 {strides = array<i32>} : memref<64x144xf32, #tpu.memory_space<vmem>>, vector<64x16xf32>,
    %75 = vector.extract_strided_slice %53 {offsets = [2, 1, 0], sizes = [8, 8, 16], strides = [1, 1, 1]} : vector<10x10x16xf32> to vector<8x8x16xf32>
    %76 = vector.shape_cast %75 : vector<8x8x16xf32> to vector<64x16xf32>
    %c0_43 = arith.constant 0 : index
    %c112 = arith.constant 112 : index
    %77 = vector.load %arg13[%c0_43, %c112] : memref<64x144xf32, #tpu.memory_space<vmem>>, vector<64x16xf32>
    tpu.vector_store %arg13[%c0_43, %c112], %76 {strides = array<i32>} : memref<64x144xf32, #tpu.memory_space<vmem>>, vector<64x16xf32>,
    %78 = vector.extract_strided_slice %53 {offsets = [2, 2, 0], sizes = [8, 8, 16], strides = [1, 1, 1]} : vector<10x10x16xf32> to vector<8x8x16xf32>
    %79 = vector.shape_cast %78 : vector<8x8x16xf32> to vector<64x16xf32>
    %c0_44 = arith.constant 0 : index
    %c128 = arith.constant 128 : index
    %80 = vector.load %arg13[%c0_44, %c128] : memref<64x144xf32, #tpu.memory_space<vmem>>, vector<64x16xf32>
    tpu.vector_store %arg13[%c0_44, %c128], %79 {strides = array<i32>} : memref<64x144xf32, #tpu.memory_space<vmem>>, vector<64x16xf32>,
    %c0_45 = arith.constant 0 : index
    %c0_46 = arith.constant 0 : index
    %81 = vector.load %arg13[%c0_45, %c0_46] : memref<64x144xf32, #tpu.memory_space<vmem>>, vector<64x144xf32>
    %c0_47 = arith.constant 0 : index
    %c0_48 = arith.constant 0 : index
    %82 = vector.load %arg5[%c0_47, %c0_48] : memref<144x32xf32, #tpu.memory_space<vmem>>, vector<144x32xf32>
    %cst_49 = arith.constant dense<0.000000e+00> : vector<64x32xf32>
    %83 = tpu.matmul %81, %82, %cst_49 {dimension_numbers = #tpu.dot_dimension_numbers<[1], [0], [0], [1], [0, 0, 1, 1], [], []>} : vector<64x144xf32>, vector<144x32xf32>, vector<64x32xf32> -> vector<64x32xf32>
    %c0_50 = arith.constant 0 : index
    %c0_51 = arith.constant 0 : index
    %84 = vector.load %arg6[%c0_50, %c0_51] : memref<1x32xf32, #tpu.memory_space<vmem>>, vector<1x32xf32>
    %85 = vector.broadcast %84 : vector<1x32xf32> to vector<64x32xf32>
    %86 = arith.addf %83, %85 : vector<64x32xf32>
    %cst_52 = arith.constant 0.000000e+00 : f32
    %87 = vector.broadcast %cst_52 : f32 to vector<64x32xf32>
    %88 = arith.maximumf %86, %87 : vector<64x32xf32>
    %cst_53 = arith.constant dense<0.000000e+00> : vector<32x32xf32>
    %89 = tpu.matmul %88, %88, %cst_53 {dimension_numbers = #tpu.dot_dimension_numbers<[0], [0], [1], [1], [0, 1, 1, 1], [], []>} : vector<64x32xf32>, vector<64x32xf32>, vector<32x32xf32> -> vector<32x32xf32>
    %cst_54 = arith.constant 1.562500e-02 : f32
    %90 = vector.broadcast %cst_54 : f32 to vector<32x32xf32>
    %91 = arith.mulf %89, %90 : vector<32x32xf32>
    %cst_55 = arith.constant 0.000000e+00 : f32
    %92 = vector.broadcast %cst_55 : f32 to vector<32x32xf32>
    %93 = arith.cmpf ogt, %91, %92 : vector<32x32xf32>
    %cst_56 = arith.constant 0.000000e+00 : f32
    %94 = vector.broadcast %cst_56 : f32 to vector<32x32xf32>
    %95 = arith.cmpf olt, %91, %94 : vector<32x32xf32>
    %cst_57 = arith.constant -1.000000e+00 : f32
    %cst_58 = arith.constant 0.000000e+00 : f32
    %96 = vector.broadcast %cst_57 : f32 to vector<32x32xf32>
    %97 = vector.broadcast %cst_58 : f32 to vector<32x32xf32>
    %98 = arith.select %95, %96, %97 : vector<32x32xi1>, vector<32x32xf32>
    %cst_59 = arith.constant 1.000000e+00 : f32
    %99 = vector.broadcast %cst_59 : f32 to vector<32x32xf32>
    %100 = arith.select %93, %99, %98 : vector<32x32xi1>, vector<32x32xf32>
    %101 = math.absf %91 : vector<32x32xf32>
    %cst_60 = arith.constant 9.99999993E-9 : f32
    %102 = vector.broadcast %cst_60 : f32 to vector<32x32xf32>
    %103 = arith.addf %101, %102 : vector<32x32xf32>
    %104 = math.sqrt %103 : vector<32x32xf32>
    %105 = arith.mulf %100, %104 : vector<32x32xf32>
    %106 = arith.mulf %105, %105 : vector<32x32xf32>
    %cst_61 = arith.constant dense<0.000000e+00> : vector<32xf32>
    %107 = vector.multi_reduction <add>, %106, %cst_61 [1] : vector<32x32xf32> to vector<32xf32>
    %108 = vector.shape_cast %107 : vector<32xf32> to vector<32x1xf32>
    %cst_62 = arith.constant dense<0.000000e+00> : vector<1xf32>
    %109 = vector.multi_reduction <add>, %108, %cst_62 [0] : vector<32x1xf32> to vector<1xf32>
    %110 = vector.shape_cast %109 : vector<1xf32> to vector<1x1xf32>
    %cst_63 = arith.constant 1.000000e-24 : f32
    %111 = vector.broadcast %cst_63 : f32 to vector<1x1xf32>
    %112 = arith.maximumf %110, %111 : vector<1x1xf32>
    %113 = math.rsqrt %112 : vector<1x1xf32>
    %114 = vector.extract_strided_slice %105 {offsets = [0, 0], sizes = [1, 32], strides = [1, 1]} : vector<32x32xf32> to vector<1x32xf32>
    %c0_64 = arith.constant 0 : index
    %c0_65 = arith.constant 0 : index
    %115 = vector.load %arg14[%c0_64, %c0_65] : memref<1x1024xf32, #tpu.memory_space<vmem>>, vector<1x32xf32>
    tpu.vector_store %arg14[%c0_64, %c0_65], %114 {strides = array<i32>} : memref<1x1024xf32, #tpu.memory_space<vmem>>, vector<1x32xf32>,
    %116 = vector.extract_strided_slice %105 {offsets = [1, 0], sizes = [1, 32], strides = [1, 1]} : vector<32x32xf32> to vector<1x32xf32>
    %c0_66 = arith.constant 0 : index
    %c32_67 = arith.constant 32 : index
    %117 = vector.load %arg14[%c0_66, %c32_67] : memref<1x1024xf32, #tpu.memory_space<vmem>>, vector<1x32xf32>
    tpu.vector_store %arg14[%c0_66, %c32_67], %116 {strides = array<i32>} : memref<1x1024xf32, #tpu.memory_space<vmem>>, vector<1x32xf32>,
    %118 = vector.extract_strided_slice %105 {offsets = [2, 0], sizes = [1, 32], strides = [1, 1]} : vector<32x32xf32> to vector<1x32xf32>
    %c0_68 = arith.constant 0 : index
    %c64_69 = arith.constant 64 : index
    %119 = vector.load %arg14[%c0_68, %c64_69] : memref<1x1024xf32, #tpu.memory_space<vmem>>, vector<1x32xf32>
    tpu.vector_store %arg14[%c0_68, %c64_69], %118 {strides = array<i32>} : memref<1x1024xf32, #tpu.memory_space<vmem>>, vector<1x32xf32>,
    %120 = vector.extract_strided_slice %105 {offsets = [3, 0], sizes = [1, 32], strides = [1, 1]} : vector<32x32xf32> to vector<1x32xf32>
    %c0_70 = arith.constant 0 : index
    %c96_71 = arith.constant 96 : index
    %121 = vector.load %arg14[%c0_70, %c96_71] : memref<1x1024xf32, #tpu.memory_space<vmem>>, vector<1x32xf32>
    tpu.vector_store %arg14[%c0_70, %c96_71], %120 {strides = array<i32>} : memref<1x1024xf32, #tpu.memory_space<vmem>>, vector<1x32xf32>,
    %122 = vector.extract_strided_slice %105 {offsets = [4, 0], sizes = [1, 32], strides = [1, 1]} : vector<32x32xf32> to vector<1x32xf32>
    %c0_72 = arith.constant 0 : index
    %c128_73 = arith.constant 128 : index
    %123 = vector.load %arg14[%c0_72, %c128_73] : memref<1x1024xf32, #tpu.memory_space<vmem>>, vector<1x32xf32>
    tpu.vector_store %arg14[%c0_72, %c128_73], %122 {strides = array<i32>} : memref<1x1024xf32, #tpu.memory_space<vmem>>, vector<1x32xf32>,
    %124 = vector.extract_strided_slice %105 {offsets = [5, 0], sizes = [1, 32], strides = [1, 1]} : vector<32x32xf32> to vector<1x32xf32>
    %c0_74 = arith.constant 0 : index
    %c160 = arith.constant 160 : index
    %125 = vector.load %arg14[%c0_74, %c160] : memref<1x1024xf32, #tpu.memory_space<vmem>>, vector<1x32xf32>
    tpu.vector_store %arg14[%c0_74, %c160], %124 {strides = array<i32>} : memref<1x1024xf32, #tpu.memory_space<vmem>>, vector<1x32xf32>,
    %126 = vector.extract_strided_slice %105 {offsets = [6, 0], sizes = [1, 32], strides = [1, 1]} : vector<32x32xf32> to vector<1x32xf32>
    %c0_75 = arith.constant 0 : index
    %c192 = arith.constant 192 : index
    %127 = vector.load %arg14[%c0_75, %c192] : memref<1x1024xf32, #tpu.memory_space<vmem>>, vector<1x32xf32>
    tpu.vector_store %arg14[%c0_75, %c192], %126 {strides = array<i32>} : memref<1x1024xf32, #tpu.memory_space<vmem>>, vector<1x32xf32>,
    %128 = vector.extract_strided_slice %105 {offsets = [7, 0], sizes = [1, 32], strides = [1, 1]} : vector<32x32xf32> to vector<1x32xf32>
    %c0_76 = arith.constant 0 : index
    %c224 = arith.constant 224 : index
    %129 = vector.load %arg14[%c0_76, %c224] : memref<1x1024xf32, #tpu.memory_space<vmem>>, vector<1x32xf32>
    tpu.vector_store %arg14[%c0_76, %c224], %128 {strides = array<i32>} : memref<1x1024xf32, #tpu.memory_space<vmem>>, vector<1x32xf32>,
    %130 = vector.extract_strided_slice %105 {offsets = [8, 0], sizes = [1, 32], strides = [1, 1]} : vector<32x32xf32> to vector<1x32xf32>
    %c0_77 = arith.constant 0 : index
    %c256 = arith.constant 256 : index
    %131 = vector.load %arg14[%c0_77, %c256] : memref<1x1024xf32, #tpu.memory_space<vmem>>, vector<1x32xf32>
    tpu.vector_store %arg14[%c0_77, %c256], %130 {strides = array<i32>} : memref<1x1024xf32, #tpu.memory_space<vmem>>, vector<1x32xf32>,
    %132 = vector.extract_strided_slice %105 {offsets = [9, 0], sizes = [1, 32], strides = [1, 1]} : vector<32x32xf32> to vector<1x32xf32>
    %c0_78 = arith.constant 0 : index
    %c288 = arith.constant 288 : index
    %133 = vector.load %arg14[%c0_78, %c288] : memref<1x1024xf32, #tpu.memory_space<vmem>>, vector<1x32xf32>
    tpu.vector_store %arg14[%c0_78, %c288], %132 {strides = array<i32>} : memref<1x1024xf32, #tpu.memory_space<vmem>>, vector<1x32xf32>,
    %134 = vector.extract_strided_slice %105 {offsets = [10, 0], sizes = [1, 32], strides = [1, 1]} : vector<32x32xf32> to vector<1x32xf32>
    %c0_79 = arith.constant 0 : index
    %c320 = arith.constant 320 : index
    %135 = vector.load %arg14[%c0_79, %c320] : memref<1x1024xf32, #tpu.memory_space<vmem>>, vector<1x32xf32>
    tpu.vector_store %arg14[%c0_79, %c320], %134 {strides = array<i32>} : memref<1x1024xf32, #tpu.memory_space<vmem>>, vector<1x32xf32>,
    %136 = vector.extract_strided_slice %105 {offsets = [11, 0], sizes = [1, 32], strides = [1, 1]} : vector<32x32xf32> to vector<1x32xf32>
    %c0_80 = arith.constant 0 : index
    %c352 = arith.constant 352 : index
    %137 = vector.load %arg14[%c0_80, %c352] : memref<1x1024xf32, #tpu.memory_space<vmem>>, vector<1x32xf32>
    tpu.vector_store %arg14[%c0_80, %c352], %136 {strides = array<i32>} : memref<1x1024xf32, #tpu.memory_space<vmem>>, vector<1x32xf32>,
    %138 = vector.extract_strided_slice %105 {offsets = [12, 0], sizes = [1, 32], strides = [1, 1]} : vector<32x32xf32> to vector<1x32xf32>
    %c0_81 = arith.constant 0 : index
    %c384 = arith.constant 384 : index
    %139 = vector.load %arg14[%c0_81, %c384] : memref<1x1024xf32, #tpu.memory_space<vmem>>, vector<1x32xf32>
    tpu.vector_store %arg14[%c0_81, %c384], %138 {strides = array<i32>} : memref<1x1024xf32, #tpu.memory_space<vmem>>, vector<1x32xf32>,
    %140 = vector.extract_strided_slice %105 {offsets = [13, 0], sizes = [1, 32], strides = [1, 1]} : vector<32x32xf32> to vector<1x32xf32>
    %c0_82 = arith.constant 0 : index
    %c416 = arith.constant 416 : index
    %141 = vector.load %arg14[%c0_82, %c416] : memref<1x1024xf32, #tpu.memory_space<vmem>>, vector<1x32xf32>
    tpu.vector_store %arg14[%c0_82, %c416], %140 {strides = array<i32>} : memref<1x1024xf32, #tpu.memory_space<vmem>>, vector<1x32xf32>,
    %142 = vector.extract_strided_slice %105 {offsets = [14, 0], sizes = [1, 32], strides = [1, 1]} : vector<32x32xf32> to vector<1x32xf32>
    %c0_83 = arith.constant 0 : index
    %c448 = arith.constant 448 : index
    %143 = vector.load %arg14[%c0_83, %c448] : memref<1x1024xf32, #tpu.memory_space<vmem>>, vector<1x32xf32>
    tpu.vector_store %arg14[%c0_83, %c448], %142 {strides = array<i32>} : memref<1x1024xf32, #tpu.memory_space<vmem>>, vector<1x32xf32>,
    %144 = vector.extract_strided_slice %105 {offsets = [15, 0], sizes = [1, 32], strides = [1, 1]} : vector<32x32xf32> to vector<1x32xf32>
    %c0_84 = arith.constant 0 : index
    %c480 = arith.constant 480 : index
    %145 = vector.load %arg14[%c0_84, %c480] : memref<1x1024xf32, #tpu.memory_space<vmem>>, vector<1x32xf32>
    tpu.vector_store %arg14[%c0_84, %c480], %144 {strides = array<i32>} : memref<1x1024xf32, #tpu.memory_space<vmem>>, vector<1x32xf32>,
    %146 = vector.extract_strided_slice %105 {offsets = [16, 0], sizes = [1, 32], strides = [1, 1]} : vector<32x32xf32> to vector<1x32xf32>
    %c0_85 = arith.constant 0 : index
    %c512 = arith.constant 512 : index
    %147 = vector.load %arg14[%c0_85, %c512] : memref<1x1024xf32, #tpu.memory_space<vmem>>, vector<1x32xf32>
    tpu.vector_store %arg14[%c0_85, %c512], %146 {strides = array<i32>} : memref<1x1024xf32, #tpu.memory_space<vmem>>, vector<1x32xf32>,
    %148 = vector.extract_strided_slice %105 {offsets = [17, 0], sizes = [1, 32], strides = [1, 1]} : vector<32x32xf32> to vector<1x32xf32>
    %c0_86 = arith.constant 0 : index
    %c544 = arith.constant 544 : index
    %149 = vector.load %arg14[%c0_86, %c544] : memref<1x1024xf32, #tpu.memory_space<vmem>>, vector<1x32xf32>
    tpu.vector_store %arg14[%c0_86, %c544], %148 {strides = array<i32>} : memref<1x1024xf32, #tpu.memory_space<vmem>>, vector<1x32xf32>,
    %150 = vector.extract_strided_slice %105 {offsets = [18, 0], sizes = [1, 32], strides = [1, 1]} : vector<32x32xf32> to vector<1x32xf32>
    %c0_87 = arith.constant 0 : index
    %c576 = arith.constant 576 : index
    %151 = vector.load %arg14[%c0_87, %c576] : memref<1x1024xf32, #tpu.memory_space<vmem>>, vector<1x32xf32>
    tpu.vector_store %arg14[%c0_87, %c576], %150 {strides = array<i32>} : memref<1x1024xf32, #tpu.memory_space<vmem>>, vector<1x32xf32>,
    %152 = vector.extract_strided_slice %105 {offsets = [19, 0], sizes = [1, 32], strides = [1, 1]} : vector<32x32xf32> to vector<1x32xf32>
    %c0_88 = arith.constant 0 : index
    %c608 = arith.constant 608 : index
    %153 = vector.load %arg14[%c0_88, %c608] : memref<1x1024xf32, #tpu.memory_space<vmem>>, vector<1x32xf32>
    tpu.vector_store %arg14[%c0_88, %c608], %152 {strides = array<i32>} : memref<1x1024xf32, #tpu.memory_space<vmem>>, vector<1x32xf32>,
    %154 = vector.extract_strided_slice %105 {offsets = [20, 0], sizes = [1, 32], strides = [1, 1]} : vector<32x32xf32> to vector<1x32xf32>
    %c0_89 = arith.constant 0 : index
    %c640 = arith.constant 640 : index
    %155 = vector.load %arg14[%c0_89, %c640] : memref<1x1024xf32, #tpu.memory_space<vmem>>, vector<1x32xf32>
    tpu.vector_store %arg14[%c0_89, %c640], %154 {strides = array<i32>} : memref<1x1024xf32, #tpu.memory_space<vmem>>, vector<1x32xf32>,
    %156 = vector.extract_strided_slice %105 {offsets = [21, 0], sizes = [1, 32], strides = [1, 1]} : vector<32x32xf32> to vector<1x32xf32>
    %c0_90 = arith.constant 0 : index
    %c672 = arith.constant 672 : index
    %157 = vector.load %arg14[%c0_90, %c672] : memref<1x1024xf32, #tpu.memory_space<vmem>>, vector<1x32xf32>
    tpu.vector_store %arg14[%c0_90, %c672], %156 {strides = array<i32>} : memref<1x1024xf32, #tpu.memory_space<vmem>>, vector<1x32xf32>,
    %158 = vector.extract_strided_slice %105 {offsets = [22, 0], sizes = [1, 32], strides = [1, 1]} : vector<32x32xf32> to vector<1x32xf32>
    %c0_91 = arith.constant 0 : index
    %c704 = arith.constant 704 : index
    %159 = vector.load %arg14[%c0_91, %c704] : memref<1x1024xf32, #tpu.memory_space<vmem>>, vector<1x32xf32>
    tpu.vector_store %arg14[%c0_91, %c704], %158 {strides = array<i32>} : memref<1x1024xf32, #tpu.memory_space<vmem>>, vector<1x32xf32>,
    %160 = vector.extract_strided_slice %105 {offsets = [23, 0], sizes = [1, 32], strides = [1, 1]} : vector<32x32xf32> to vector<1x32xf32>
    %c0_92 = arith.constant 0 : index
    %c736 = arith.constant 736 : index
    %161 = vector.load %arg14[%c0_92, %c736] : memref<1x1024xf32, #tpu.memory_space<vmem>>, vector<1x32xf32>
    tpu.vector_store %arg14[%c0_92, %c736], %160 {strides = array<i32>} : memref<1x1024xf32, #tpu.memory_space<vmem>>, vector<1x32xf32>,
    %162 = vector.extract_strided_slice %105 {offsets = [24, 0], sizes = [1, 32], strides = [1, 1]} : vector<32x32xf32> to vector<1x32xf32>
    %c0_93 = arith.constant 0 : index
    %c768 = arith.constant 768 : index
    %163 = vector.load %arg14[%c0_93, %c768] : memref<1x1024xf32, #tpu.memory_space<vmem>>, vector<1x32xf32>
    tpu.vector_store %arg14[%c0_93, %c768], %162 {strides = array<i32>} : memref<1x1024xf32, #tpu.memory_space<vmem>>, vector<1x32xf32>,
    %164 = vector.extract_strided_slice %105 {offsets = [25, 0], sizes = [1, 32], strides = [1, 1]} : vector<32x32xf32> to vector<1x32xf32>
    %c0_94 = arith.constant 0 : index
    %c800 = arith.constant 800 : index
    %165 = vector.load %arg14[%c0_94, %c800] : memref<1x1024xf32, #tpu.memory_space<vmem>>, vector<1x32xf32>
    tpu.vector_store %arg14[%c0_94, %c800], %164 {strides = array<i32>} : memref<1x1024xf32, #tpu.memory_space<vmem>>, vector<1x32xf32>,
    %166 = vector.extract_strided_slice %105 {offsets = [26, 0], sizes = [1, 32], strides = [1, 1]} : vector<32x32xf32> to vector<1x32xf32>
    %c0_95 = arith.constant 0 : index
    %c832 = arith.constant 832 : index
    %167 = vector.load %arg14[%c0_95, %c832] : memref<1x1024xf32, #tpu.memory_space<vmem>>, vector<1x32xf32>
    tpu.vector_store %arg14[%c0_95, %c832], %166 {strides = array<i32>} : memref<1x1024xf32, #tpu.memory_space<vmem>>, vector<1x32xf32>,
    %168 = vector.extract_strided_slice %105 {offsets = [27, 0], sizes = [1, 32], strides = [1, 1]} : vector<32x32xf32> to vector<1x32xf32>
    %c0_96 = arith.constant 0 : index
    %c864 = arith.constant 864 : index
    %169 = vector.load %arg14[%c0_96, %c864] : memref<1x1024xf32, #tpu.memory_space<vmem>>, vector<1x32xf32>
    tpu.vector_store %arg14[%c0_96, %c864], %168 {strides = array<i32>} : memref<1x1024xf32, #tpu.memory_space<vmem>>, vector<1x32xf32>,
    %170 = vector.extract_strided_slice %105 {offsets = [28, 0], sizes = [1, 32], strides = [1, 1]} : vector<32x32xf32> to vector<1x32xf32>
    %c0_97 = arith.constant 0 : index
    %c896 = arith.constant 896 : index
    %171 = vector.load %arg14[%c0_97, %c896] : memref<1x1024xf32, #tpu.memory_space<vmem>>, vector<1x32xf32>
    tpu.vector_store %arg14[%c0_97, %c896], %170 {strides = array<i32>} : memref<1x1024xf32, #tpu.memory_space<vmem>>, vector<1x32xf32>,
    %172 = vector.extract_strided_slice %105 {offsets = [29, 0], sizes = [1, 32], strides = [1, 1]} : vector<32x32xf32> to vector<1x32xf32>
    %c0_98 = arith.constant 0 : index
    %c928 = arith.constant 928 : index
    %173 = vector.load %arg14[%c0_98, %c928] : memref<1x1024xf32, #tpu.memory_space<vmem>>, vector<1x32xf32>
    tpu.vector_store %arg14[%c0_98, %c928], %172 {strides = array<i32>} : memref<1x1024xf32, #tpu.memory_space<vmem>>, vector<1x32xf32>,
    %174 = vector.extract_strided_slice %105 {offsets = [30, 0], sizes = [1, 32], strides = [1, 1]} : vector<32x32xf32> to vector<1x32xf32>
    %c0_99 = arith.constant 0 : index
    %c960 = arith.constant 960 : index
    %175 = vector.load %arg14[%c0_99, %c960] : memref<1x1024xf32, #tpu.memory_space<vmem>>, vector<1x32xf32>
    tpu.vector_store %arg14[%c0_99, %c960], %174 {strides = array<i32>} : memref<1x1024xf32, #tpu.memory_space<vmem>>, vector<1x32xf32>,
    %176 = vector.extract_strided_slice %105 {offsets = [31, 0], sizes = [1, 32], strides = [1, 1]} : vector<32x32xf32> to vector<1x32xf32>
    %c0_100 = arith.constant 0 : index
    %c992 = arith.constant 992 : index
    %177 = vector.load %arg14[%c0_100, %c992] : memref<1x1024xf32, #tpu.memory_space<vmem>>, vector<1x32xf32>
    tpu.vector_store %arg14[%c0_100, %c992], %176 {strides = array<i32>} : memref<1x1024xf32, #tpu.memory_space<vmem>>, vector<1x32xf32>,
    %c0_101 = arith.constant 0 : index
    %c0_102 = arith.constant 0 : index
    %178 = vector.load %arg14[%c0_101, %c0_102] : memref<1x1024xf32, #tpu.memory_space<vmem>>, vector<1x1024xf32>
    %c0_103 = arith.constant 0 : index
    %c0_104 = arith.constant 0 : index
    %179 = vector.load %arg7[%c0_103, %c0_104] : memref<1024x10xf32, #tpu.memory_space<vmem>>, vector<1024x10xf32>
    %cst_105 = arith.constant dense<0.000000e+00> : vector<1x10xf32>
    %180 = tpu.matmul %178, %179, %cst_105 {dimension_numbers = #tpu.dot_dimension_numbers<[1], [0], [0], [1], [0, 0, 1, 1], [], []>} : vector<1x1024xf32>, vector<1024x10xf32>, vector<1x10xf32> -> vector<1x10xf32>
    %181 = vector.broadcast %113 : vector<1x1xf32> to vector<1x10xf32>
    %182 = arith.mulf %180, %181 : vector<1x10xf32>
    %c0_106 = arith.constant 0 : index
    %c0_107 = arith.constant 0 : index
    %183 = vector.load %arg8[%c0_106, %c0_107] : memref<1x10xf32, #tpu.memory_space<vmem>>, vector<1x10xf32>
    %184 = arith.addf %182, %183 : vector<1x10xf32>
    %c0_108 = arith.constant 0 : index
    %c0_109 = arith.constant 0 : index
    %c0_110 = arith.constant 0 : index
    %185 = vector.load %arg9[%c0_108, %c0_109, %c0_110] : memref<1x1x10xf32, #tpu.memory_space<vmem>>, vector<1x1x10xf32>
    %186 = vector.shape_cast %185 : vector<1x1x10xf32> to vector<1x10xf32>
    %187 = vector.shape_cast %184 : vector<1x10xf32> to vector<1x1x10xf32>
    tpu.vector_store %arg9[%c0_108, %c0_109, %c0_110], %187 {strides = array<i32>} : memref<1x1x10xf32, #tpu.memory_space<vmem>>, vector<1x1x10xf32>,
    return
  }
  func.func @transform_0(%arg0: i32) -> (i32, i32, i32, i32) {
    %c0_i32 = arith.constant 0 : i32
    %c0_i32_0 = arith.constant 0 : i32
    %c0_i32_1 = arith.constant 0 : i32
    %c0_i32_2 = arith.constant 0 : i32
    return %arg0, %c0_i32, %c0_i32_0, %c0_i32_1 : i32, i32, i32, i32
  }
  func.func @transform_1(%arg0: i32) -> (i32, i32) {
    %c0_i32 = arith.constant 0 : i32
    %c0_i32_0 = arith.constant 0 : i32
    %c0_i32_1 = arith.constant 0 : i32
    return %c0_i32, %c0_i32_0 : i32, i32
  }
  func.func @transform_2(%arg0: i32) -> (i32, i32) {
    %c0_i32 = arith.constant 0 : i32
    %c0_i32_0 = arith.constant 0 : i32
    %c0_i32_1 = arith.constant 0 : i32
    return %c0_i32, %c0_i32_0 : i32, i32
  }
  func.func @transform_3(%arg0: i32) -> (i32, i32) {
    %c0_i32 = arith.constant 0 : i32
    %c0_i32_0 = arith.constant 0 : i32
    %c0_i32_1 = arith.constant 0 : i32
    return %c0_i32, %c0_i32_0 : i32, i32
  }
  func.func @transform_4(%arg0: i32) -> (i32, i32) {
    %c0_i32 = arith.constant 0 : i32
    %c0_i32_0 = arith.constant 0 : i32
    %c0_i32_1 = arith.constant 0 : i32
    return %c0_i32, %c0_i32_0 : i32, i32
  }
  func.func @transform_5(%arg0: i32) -> (i32, i32) {
    %c0_i32 = arith.constant 0 : i32
    %c0_i32_0 = arith.constant 0 : i32
    %c0_i32_1 = arith.constant 0 : i32
    return %c0_i32, %c0_i32_0 : i32, i32
  }
  func.func @transform_6(%arg0: i32) -> (i32, i32) {
    %c0_i32 = arith.constant 0 : i32
    %c0_i32_0 = arith.constant 0 : i32
    %c0_i32_1 = arith.constant 0 : i32
    return %c0_i32, %c0_i32_0 : i32, i32
  }
  func.func @transform_7(%arg0: i32) -> (i32, i32) {
    %c0_i32 = arith.constant 0 : i32
    %c0_i32_0 = arith.constant 0 : i32
    %c0_i32_1 = arith.constant 0 : i32
    return %c0_i32, %c0_i32_0 : i32, i32
  }
  func.func @transform_8(%arg0: i32) -> (i32, i32, i32) {
    %c0_i32 = arith.constant 0 : i32
    %c0_i32_0 = arith.constant 0 : i32
    %c0_i32_1 = arith.constant 0 : i32
    return %arg0, %c0_i32, %c0_i32_0 : i32, i32, i32
  }
}

</mosaic_0001>

<bundles_post_ra>
// kernel: bcnn_bn1d_forward.1
= control target key start
LH: loop header
LB: loop body
LE: loop exit
PB: predicated region body
PF: predicated region fallthrough
CT: control target
= control target key end

     0   :  { %13 = vsyncpa [#allocation8], 0  ;;  %s7109_s0 = inlined_call_operand.vmem [shape: f32[2,16,16,3], index: 0, kind: input, shape index: {}]   ;;  %s7110_s1 = inlined_call_operand.vmem [shape: f32[256,256], index: 1, kind: input, shape index: {}]   ;;  %s7111_s2 = inlined_call_operand.vmem [shape: f32[27,16], index: 2, kind: input, shape index: {}]   ;;  %s7112_s3 = inlined_call_operand.vmem [shape: f32[1,16], index: 3, kind: input, shape index: {}]   ;;  %s7113_s4 = inlined_call_operand.vmem [shape: f32[144,32], index: 4, kind: input, shape index: {}]   ;;  %s7114_s5 = inlined_call_operand.vmem [shape: f32[1,32], index: 5, kind: input, shape index: {}]   ;;  %s7115_s6 = inlined_call_operand.vmem [shape: f32[1024,10], index: 6, kind: input, shape index: {}]   ;;  %s7116_s7 = inlined_call_operand.vmem [shape: f32[1,10], index: 7, kind: input, shape index: {}]   ;;  %s7117_s8 = inlined_call_operand.hbm [shape: f32[2,1,10], index: 8, kind: output, shape index: {}]  }
   0x1   :  { %15 = vsyncpa [#allocation8 + $0x1], 0  ;;  %s4641_s27 = smov 0   ;;  %s4643_s28 = smov 0  }
   0x2   :  { %s4645_s29 = smov 0   ;;  %s4647_s30 = smov 0  }
   0x3 LB: > { %s4662_s9 = sadd.s32 4294967295, %s4575_s30   ;;  %s4124_s10 = sadd.s32 4294967294, %s4575_s30   ;;  %s4575_s30 = sphi %s4647_s30, %s7141_s30   ;;  %s4571_s29 = sphi %s4645_s29, %s7140_s29   ;;  %s4567_s28 = sphi %s4643_s28, %s7139_s28   ;;  %s4563_s27 = sphi %s4641_s27, %s7138_s27  }
   0x4   : > { %s4666_s11 = sadd.s32 1, %s4575_s30   ;;  %s201_s12 = sadd.s32 1, %s4571_s29 }
   0x5   : > { %s198_s13 = ssub.s32 %s4575_s30, %s4666_s11  ;;  %p211_p0 = scmp.ne.s32.totalorder %s4571_s29, %s4567_s28 }
   0x6   : > { %p199_p1 = scmp.eq.s32.totalorder %s198_s13, 0  ;;  %p212_p2 = scmp.eq.s32.totalorder %s4662_s9, 1 }
   0x7   : > { %p217_p3 = scmp.ne.s32.totalorder %s4567_s28, %s4563_s27  ;;  %p218_p4 = scmp.eq.s32.totalorder %s4124_s10, 1 }
   0x8   : > { %s4677_s14 = scalar_select %p199_p1, %s4571_s29, %s201_s12  }
   0x9   : > { %p4679_p5 = por %p212_p2, %p211_p0  ;;  %p4683_p6 = por %p218_p4, %p217_p3 }
   0xa   : > { %p4127_p7 = scmp.ge.s32.totalorder %s4575_s30, 1  ;;  %p265_p8 = scmp.lt.s32.totalorder %s4575_s30, 3 }
   0xc   : > { %p266_p9 = pnand %p4127_p7, %p265_p8 }
   0xd   : > { %s7118_s17 = sand.u32 (!%p266_p9), 1, %s4567_s28   ;;  %p298_p10 = scmp.lt.s32.totalorder (!%p266_p9), %s4662_s9, 1 }
   0xe   : > { %269 = sbr.rel (%p266_p9) target bundleno = 2475 (0x9ab), region = 52  ;;  %s4699_s23 = scalar_lea.vmem (!%p266_p9), [#allocation7], %s7118_s17 }
   0xf   : > { %p4130_p11 = scmp.ne.s32.totalorder (!%p266_p9), %s4662_s9, 0 }
  0x13   : > { %s299_s18 = scalar_select %p298_p10, %s4662_s9, 1 }
  0x14   : > { %306 = sbr.rel (%p4130_p11) target bundleno = 63 (0x3f), region = 56 }
  0x15   : > { %s4181_s19 = sshll.u32 %s299_s18, 8 }
  0x16   : > { %s4695_s22 = scalar_lea.vmem %s7109_s0, %s4181_s19 }
  0x19   : > { %vm307_vm0 = vcmask 23552   ;;  %vm310_vm1 = vcmask 17408   ;;  %vm363_vm2 = vcmask 130048   ;;  %v4577_v0 = vmov 0.0  }
  0x1a   : > { %308 = vst.msk [vmem:[#allocation2] sm:$0xff] %vm307_vm0, %v4577_v0  ;;  %309 = vst.msk [vmem:[#allocation2 + $0x8] sm:$0xff] %vm307_vm0, %v4577_v0  ;;  %vm365_vm3 = vcmask 123904  }
  0x1b   : > { %312 = vst.msk [vmem:[#allocation2 + $0x18] sm:$0xff] %vm307_vm0, %v4577_v0  ;;  %313 = vst.msk [vmem:[#allocation2 + $0x20] sm:$0xff] %vm307_vm0, %v4577_v0 }
  0x1c   : > { %315 = vst.msk [vmem:[#allocation2 + $0x30] sm:$0xff] %vm307_vm0, %v4577_v0  ;;  %316 = vst.msk [vmem:[#allocation2 + $0x38] sm:$0xff] %vm307_vm0, %v4577_v0 }
  0x1d   : > { %318 = vst.msk [vmem:[#allocation2 + $0x48] sm:$0xff] %vm307_vm0, %v4577_v0  ;;  %319 = vst.msk [vmem:[#allocation2 + $0x50] sm:$0xff] %vm307_vm0, %v4577_v0 }
  0x1e   : > { %321 = vst.msk [vmem:[#allocation2 + $0x60] sm:$0xff] %vm307_vm0, %v4577_v0  ;;  %322 = vst.msk [vmem:[#allocation2 + $0x68] sm:$0xff] %vm307_vm0, %v4577_v0 }
  0x1f   : > { %324 = vst.msk [vmem:[#allocation2 + $0x78] sm:$0xff] %vm307_vm0, %v4577_v0  ;;  %325 = vst.msk [vmem:[#allocation2 + $0x80] sm:$0xff] %vm307_vm0, %v4577_v0 }
  0x20   : > { %327 = vst.msk [vmem:[#allocation2 + $0x90] sm:$0xff] %vm307_vm0, %v4577_v0  ;;  %328 = vst.msk [vmem:[#allocation2 + $0x98] sm:$0xff] %vm307_vm0, %v4577_v0 }
  0x21   : > { %330 = vst.msk [vmem:[#allocation2 + $0xa8] sm:$0xff] %vm307_vm0, %v4577_v0  ;;  %331 = vst.msk [vmem:[#allocation2 + $0xb0] sm:$0xff] %vm307_vm0, %v4577_v0 }
  0x22   : > { %333 = vst.msk [vmem:[#allocation2 + $0xc0] sm:$0xff] %vm307_vm0, %v4577_v0  ;;  %334 = vst.msk [vmem:[#allocation2 + $0xc8] sm:$0xff] %vm307_vm0, %v4577_v0 }
  0x23   : > { %336 = vst.msk [vmem:[#allocation2 + $0xd8] sm:$0xff] %vm307_vm0, %v4577_v0  ;;  %337 = vst.msk [vmem:[#allocation2 + $0xe0] sm:$0xff] %vm307_vm0, %v4577_v0 }
  0x24   : > { %339 = vst.msk [vmem:[#allocation2 + $0xf0] sm:$0xff] %vm307_vm0, %v4577_v0  ;;  %340 = vst.msk [vmem:[#allocation2 + $0xf8] sm:$0xff] %vm307_vm0, %v4577_v0 }
  0x25   : > { %342 = vst.msk [vmem:[#allocation2 + $0x108] sm:$0xff] %vm307_vm0, %v4577_v0  ;;  %343 = vst.msk [vmem:[#allocation2 + $0x110] sm:$0xff] %vm307_vm0, %v4577_v0 }
  0x26   : > { %345 = vst.msk [vmem:[#allocation2 + $0x120] sm:$0xff] %vm307_vm0, %v4577_v0  ;;  %346 = vst.msk [vmem:[#allocation2 + $0x128] sm:$0xff] %vm307_vm0, %v4577_v0 }
  0x27   : > { %348 = vst.msk [vmem:[#allocation2 + $0x138] sm:$0xff] %vm307_vm0, %v4577_v0  ;;  %349 = vst.msk [vmem:[#allocation2 + $0x140] sm:$0xff] %vm307_vm0, %v4577_v0 }
  0x28   : > { %351 = vst.msk [vmem:[#allocation2 + $0x150] sm:$0xff] %vm307_vm0, %v4577_v0  ;;  %352 = vst.msk [vmem:[#allocation2 + $0x158] sm:$0xff] %vm307_vm0, %v4577_v0 }
  0x29   : > { %354 = vst.msk [vmem:[#allocation2 + $0x168] sm:$0xff] %vm307_vm0, %v4577_v0  ;;  %355 = vst.msk [vmem:[#allocation2 + $0x170] sm:$0xff] %vm307_vm0, %v4577_v0 }
  0x2a   : > { %357 = vst.msk [vmem:[#allocation2 + $0x180] sm:$0xff] %vm307_vm0, %v4577_v0  ;;  %358 = vst.msk [vmem:[#allocation2 + $0x188] sm:$0xff] %vm307_vm0, %v4577_v0 }
  0x2b   : > { %360 = vst.msk [vmem:[#allocation2 + $0x198] sm:$0xff] %vm307_vm0, %v4577_v0  ;;  %361 = vst.msk [vmem:[#allocation2 + $0x1a0] sm:$0xff] %vm307_vm0, %v4577_v0 }
  0x2c   : > { %311 = vst.msk [vmem:[#allocation2 + $0x10] sm:$0x3] %vm310_vm1, %v4577_v0  ;;  %314 = vst.msk [vmem:[#allocation2 + $0x28] sm:$0x3] %vm310_vm1, %v4577_v0 }
  0x2d   : > { %317 = vst.msk [vmem:[#allocation2 + $0x40] sm:$0x3] %vm310_vm1, %v4577_v0  ;;  %320 = vst.msk [vmem:[#allocation2 + $0x58] sm:$0x3] %vm310_vm1, %v4577_v0 }
  0x2e   : > { %323 = vst.msk [vmem:[#allocation2 + $0x70] sm:$0x3] %vm310_vm1, %v4577_v0  ;;  %326 = vst.msk [vmem:[#allocation2 + $0x88] sm:$0x3] %vm310_vm1, %v4577_v0 }
  0x2f   : > { %329 = vst.msk [vmem:[#allocation2 + $0xa0] sm:$0x3] %vm310_vm1, %v4577_v0  ;;  %332 = vst.msk [vmem:[#allocation2 + $0xb8] sm:$0x3] %vm310_vm1, %v4577_v0 }
  0x30   : > { %335 = vst.msk [vmem:[#allocation2 + $0xd0] sm:$0x3] %vm310_vm1, %v4577_v0  ;;  %338 = vst.msk [vmem:[#allocation2 + $0xe8] sm:$0x3] %vm310_vm1, %v4577_v0 }
  0x31   : > { %341 = vst.msk [vmem:[#allocation2 + $0x100] sm:$0x3] %vm310_vm1, %v4577_v0  ;;  %344 = vst.msk [vmem:[#allocation2 + $0x118] sm:$0x3] %vm310_vm1, %v4577_v0 }
  0x32   : > { %347 = vst.msk [vmem:[#allocation2 + $0x130] sm:$0x3] %vm310_vm1, %v4577_v0  ;;  %350 = vst.msk [vmem:[#allocation2 + $0x148] sm:$0x3] %vm310_vm1, %v4577_v0 }
  0x33   : > { %353 = vst.msk [vmem:[#allocation2 + $0x160] sm:$0x3] %vm310_vm1, %v4577_v0  ;;  %356 = vst.msk [vmem:[#allocation2 + $0x178] sm:$0x3] %vm310_vm1, %v4577_v0 }
  0x34   : > { %359 = vst.msk [vmem:[#allocation2 + $0x190] sm:$0x3] %vm310_vm1, %v4577_v0  ;;  %362 = vst.msk [vmem:[#allocation2 + $0x1a8] sm:$0x3] %vm310_vm1, %v4577_v0 }
  0x35   : > { %364 = vst.msk [vmem:[#allocation4] sm:$0xff] %vm363_vm2, %v4577_v0  ;;  %367 = vst.msk [vmem:[#allocation4 + $0x10] sm:$0xff] %vm363_vm2, %v4577_v0 }
  0x36   : > { %369 = vst.msk [vmem:[#allocation4 + $0x20] sm:$0xff] %vm363_vm2, %v4577_v0  ;;  %371 = vst.msk [vmem:[#allocation4 + $0x30] sm:$0xff] %vm363_vm2, %v4577_v0 }
  0x37   : > { %373 = vst.msk [vmem:[#allocation4 + $0x40] sm:$0xff] %vm363_vm2, %v4577_v0  ;;  %375 = vst.msk [vmem:[#allocation4 + $0x50] sm:$0xff] %vm363_vm2, %v4577_v0 }
  0x38   : > { %377 = vst.msk [vmem:[#allocation4 + $0x60] sm:$0xff] %vm363_vm2, %v4577_v0  ;;  %379 = vst.msk [vmem:[#allocation4 + $0x70] sm:$0xff] %vm363_vm2, %v4577_v0 }
  0x39   : > { %381 = vst.msk [vmem:[#allocation4 + $0x80] sm:$0xff] %vm363_vm2, %v4577_v0  ;;  %383 = vst.msk [vmem:[#allocation4 + $0x90] sm:$0xff] %vm363_vm2, %v4577_v0 }
  0x3a   : > { %366 = vst.msk [vmem:[#allocation4 + $0x8] sm:$0x3] %vm365_vm3, %v4577_v0  ;;  %368 = vst.msk [vmem:[#allocation4 + $0x18] sm:$0x3] %vm365_vm3, %v4577_v0 }
  0x3b   : > { %370 = vst.msk [vmem:[#allocation4 + $0x28] sm:$0x3] %vm365_vm3, %v4577_v0  ;;  %372 = vst.msk [vmem:[#allocation4 + $0x38] sm:$0x3] %vm365_vm3, %v4577_v0 }
  0x3c   : > { %374 = vst.msk [vmem:[#allocation4 + $0x48] sm:$0x3] %vm365_vm3, %v4577_v0  ;;  %376 = vst.msk [vmem:[#allocation4 + $0x58] sm:$0x3] %vm365_vm3, %v4577_v0 }
  0x3d   : > { %378 = vst.msk [vmem:[#allocation4 + $0x68] sm:$0x3] %vm365_vm3, %v4577_v0  ;;  %380 = vst.msk [vmem:[#allocation4 + $0x78] sm:$0x3] %vm365_vm3, %v4577_v0 }
  0x3e   : > { %382 = vst.msk [vmem:[#allocation4 + $0x88] sm:$0x3] %vm365_vm3, %v4577_v0  ;;  %384 = vst.msk [vmem:[#allocation4 + $0x98] sm:$0x3] %vm365_vm3, %v4577_v0 }
  0x3f PF: > { %v451_v1 = vld [vmem:[#allocation2] sm:$0xff]  ;;  %v452_v2 = vld [vmem:[#allocation2 + $0x8] sm:$0xff]  ;;  %vm795_vm4 = vcmask 1045504   ;;  %vm585_vm5 = vcmask 1046528   ;;  %v453_v7 = vld [vmem:[#allocation2 + $0x10] sm:$0x3] }
  0x40   : > { %v796_v3 = vrot.slane %v451_v1, 2  ;;  %v797_v4 = vrot.slane %v452_v2, 2  ;;  %v586_v5 = vrot.slane %v451_v1, 1  ;;  %v587_v6 = vrot.slane %v452_v2, 1  ;;  %v385_v10 = vld [vmem:[%s4695_s22] sm:$0xff]  ;;  %v386_v11 = vld [vmem:[%s4695_s22 + $0x8] sm:$0xff] }
  0x41   : > { %v799_v8 = vrot.slane %v453_v7, 2  ;;  %v589_v9 = vrot.slane %v453_v7, 1  ;;  %vm418_vm6 = vcmask 23552   ;;  %v387_v14 = vld [vmem:[%s4695_s22 + $0x10] sm:$0xff]  ;;  %v388_v15 = vld [vmem:[%s4695_s22 + $0x18] sm:$0xff]  ;;  %v389_v16 = vld [vmem:[%s4695_s22 + $0x20] sm:$0xff] }
  0x42   : > { %v798_v12 = vsel %vm795_vm4, %v796_v3, %v797_v4  ;;  %v588_v13 = vsel %vm585_vm5, %v586_v5, %v587_v6  ;;  %419 = vst.msk [vmem:[#allocation2 + $0x19] sm:$0xff] %vm418_vm6, %v385_v10  ;;  %420 = vst.msk [vmem:[#allocation2 + $0x21] sm:$0xff] %vm418_vm6, %v386_v11  ;;  %s4578_s24 = smov 6   ;;  %s4579_s25 = smov 3   ;;  %v390_v17 = vld [vmem:[%s4695_s22 + $0x28] sm:$0xff]  ;;  %v391_v18 = vld [vmem:[%s4695_s22 + $0x30] sm:$0xff] }
  0x43   : > { %505 = vst.msk [vmem:[#allocation3] sm:$0xff] %vm418_vm6, %v451_v1  ;;  %506 = vst.msk [vmem:[#allocation3 + $0x8] sm:$0xff] %vm418_vm6, %v452_v2  ;;  %876 = vrot.lane.b32.xlu1 %v798_v12, %s4578_s24  ;;  %666 = vrot.lane.b32.xlu0 %v588_v13, %s4579_s25  ;;  %v800_v19 = vsel %vm795_vm4, %v797_v4, %v799_v8  ;;  %v590_v20 = vsel %vm585_vm5, %v587_v6, %v589_v9  ;;  %v392_v21 = vld [vmem:[%s4695_s22 + $0x38] sm:$0xff]  ;;  %v393_v22 = vld [vmem:[%s4695_s22 + $0x40] sm:$0xff]  ;;  %s7121_s26 = smov 9   ;;  %s4581_s10 = smov 12  }
  0x44   : > { %421 = vst.msk [vmem:[#allocation2 + $0x31] sm:$0xff] %vm418_vm6, %v387_v14  ;;  %422 = vst.msk [vmem:[#allocation2 + $0x39] sm:$0xff] %vm418_vm6, %v388_v15  ;;  %v394_v23 = vld [vmem:[%s4695_s22 + $0x48] sm:$0xff]  ;;  %v395_v43 = vld [vmem:[%s4695_s22 + $0x50] sm:$0xff]  ;;  %s4582_s12 = smov 15   ;;  %s7119_s13 = smov 18  }
  0x45   : > { %423 = vst.msk [vmem:[#allocation2 + $0x49] sm:$0xff] %vm418_vm6, %v389_v16  ;;  %424 = vst.msk [vmem:[#allocation2 + $0x51] sm:$0xff] %vm418_vm6, %v390_v17  ;;  %v396_v45 = vld [vmem:[%s4695_s22 + $0x58] sm:$0xff]  ;;  %s4584_s18 = smov 21   ;;  %vm1945_vm7 = vcmask 1042432   ;;  %v1839_v57 = vld [vmem:[%s7111_s2 + $0x10] sm:$0xff] }
  0x46   : > { %425 = vst.msk [vmem:[#allocation2 + $0x61] sm:$0xff] %vm418_vm6, %v391_v18  ;;  %426 = vst.msk [vmem:[#allocation2 + $0x69] sm:$0xff] %vm418_vm6, %v392_v21  ;;  %v1840_v56 = vld [vmem:[%s7111_s2 + $0x18] sm:$0x7]  ;;  %v1838_v60 = vld [vmem:[%s7111_s2 + $0x8] sm:$0xff]  ;;  %s7127_s21 = smov 9  }
  0x47   : > { %427 = vst.msk [vmem:[#allocation2 + $0x79] sm:$0xff] %vm418_vm6, %v393_v22  ;;  %428 = vst.msk [vmem:[#allocation2 + $0x81] sm:$0xff] %vm418_vm6, %v394_v23  ;;  %878 = vrot.lane.b32.xlu1 %v800_v19, %s4578_s24  ;;  %668 = vrot.lane.b32.xlu0 %v590_v20, %s4579_s25  ;;  %v1837_v61 = vld [vmem:[%s7111_s2] sm:$0xff]  ;;  %v398_v1 = vld [vmem:[%s4695_s22 + $0x68] sm:$0xff]  ;;  %vm762_vm8 = vcmask 48152   ;;  %vm972_vm9 = vcmask 72752  }
  0x48   : > { %429 = vst.msk [vmem:[#allocation2 + $0x91] sm:$0xff] %vm418_vm6, %v395_v43  ;;  %430 = vst.msk [vmem:[#allocation2 + $0x99] sm:$0xff] %vm418_vm6, %v396_v45  ;;  %4370 = vmatprep.subr.msk.mxu0 %vm1945_vm7, %v1840_v56  ;;  %v397_v0 = vld [vmem:[%s4695_s22 + $0x60] sm:$0xff]  ;;  %v399_v15 = vld [vmem:[%s4695_s22 + $0x70] sm:$0xff]  ;;  %vm1103_vm10 = vcmask 97352   ;;  %vm1238_vm11 = vcmask 121952  }
  0x49   : > { %v455_v24 = vld [vmem:[#allocation2 + $0x20] sm:$0xff]  ;;  %v454_v25 = vld [vmem:[#allocation2 + $0x18] sm:$0xff]  ;;  %v456_v26 = vld [vmem:[#allocation2 + $0x28] sm:$0x3]  ;;  %4371 = vmatpush3.msk.msra.mxu0 %vm1945_vm7, %v1840_v56  ;;  %431 = vst.msk [vmem:[#allocation2 + $0xa9] sm:$0xff] %vm418_vm6, %v397_v0  ;;  %vm1372_vm12 = vcmask 146552  }
  0x4a   : > { %508 = vst.msk [vmem:[#allocation3 + $0x18] sm:$0xff] %vm418_vm6, %v455_v24  ;;  %507 = vst.msk [vmem:[#allocation3 + $0x10] sm:$0xff] %vm418_vm6, %v454_v25  ;;  %v591_v27 = vrot.slane %v454_v25, 1  ;;  %v592_v28 = vrot.slane %v455_v24, 1  ;;  %v801_v32 = vrot.slane %v454_v25, 2  ;;  %v802_v33 = vrot.slane %v455_v24, 2  ;;  %4372 = vmatprep.subr.mxu0 %v1839_v57 }
  0x4b   : > { %v4872_v29 = vld [vmem:[#allocation2 + $0x30] sm:$0xff]  ;;  %v4874_v30 = vld [vmem:[#allocation2 + $0x38] sm:$0xff]  ;;  %1009 = vrot.lane.b32.xlu1 %v455_v24, %s7121_s26  ;;  %1007 = vrot.lane.b32.xlu0 %v454_v25, %s7121_s26  ;;  %v594_v34 = vrot.slane %v456_v26, 1  ;;  %v804_v44 = vrot.slane %v456_v26, 2  ;;  %v459_v52 = vld [vmem:[#allocation2 + $0x40] sm:$0x3] }
  0x4c   : > { %509 = vst.msk [vmem:[#allocation3 + $0x20] sm:$0xff] %vm418_vm6, %v4872_v29  ;;  %510 = vst.msk [vmem:[#allocation3 + $0x28] sm:$0xff] %vm418_vm6, %v4874_v30  ;;  %v593_v31 = vsel %vm585_vm5, %v591_v27, %v592_v28  ;;  %v4883_v35 = vld [vmem:[#allocation2 + $0x48] sm:$0xff]  ;;  %v4885_v36 = vld [vmem:[#allocation2 + $0x50] sm:$0xff]  ;;  %v803_v41 = vsel %vm795_vm4, %v801_v32, %v802_v33  ;;  %v596_v48 = vrot.slane %v4872_v29, 1  ;;  %v597_v49 = vrot.slane %v4874_v30, 1  ;;  %4373 = vmatpush3.msra.mxu0 %v1839_v57 }
  0x4d   : > { %511 = vst.msk [vmem:[#allocation3 + $0x30] sm:$0xff] %vm418_vm6, %v4883_v35  ;;  %512 = vst.msk [vmem:[#allocation3 + $0x38] sm:$0xff] %vm418_vm6, %v4885_v36  ;;  %v4891_v37 = vld [vmem:[#allocation2 + $0x60] sm:$0xff]  ;;  %v4893_v38 = vld [vmem:[#allocation2 + $0x68] sm:$0xff]  ;;  %v595_v42 = vsel %vm585_vm5, %v592_v28, %v594_v34  ;;  %v805_v46 = vsel %vm795_vm4, %v802_v33, %v804_v44  ;;  %v806_v53 = vrot.slane %v4872_v29, 2  ;;  %v807_v54 = vrot.slane %v4874_v30, 2  ;;  %4374 = vmatprep.subr.mxu0 %v1838_v60 }
  0x4e   : > { %513 = vst.msk [vmem:[#allocation3 + $0x40] sm:$0xff] %vm418_vm6, %v4891_v37  ;;  %514 = vst.msk [vmem:[#allocation3 + $0x48] sm:$0xff] %vm418_vm6, %v4893_v38  ;;  %v4899_v39 = vld [vmem:[#allocation2 + $0x78] sm:$0xff]  ;;  %v4901_v40 = vld [vmem:[#allocation2 + $0x80] sm:$0xff]  ;;  %v598_v51 = vsel %vm585_vm5, %v596_v48, %v597_v49  ;;  %v599_v55 = vrot.slane %v459_v52, 1  ;;  %v809_v62 = vrot.slane %v459_v52, 2  ;;  %4375 = vmatpush3.msra.mxu0 %v1838_v60 }
  0x4f   : > { %670 = vrot.lane.b32.xlu1 %v593_v31, %s4579_s25  ;;  %1142 = vrot.lane.b32.xlu0 %v593_v31, %s4581_s10  ;;  %515 = vst.msk [vmem:[#allocation3 + $0x50] sm:$0xff] %vm418_vm6, %v4899_v39  ;;  %516 = vst.msk [vmem:[#allocation3 + $0x58] sm:$0xff] %vm418_vm6, %v4901_v40  ;;  %v4920_v47 = vld [vmem:[#allocation2 + $0x90] sm:$0xff]  ;;  %v4932_v50 = vld [vmem:[#allocation2 + $0x98] sm:$0xff]  ;;  %v808_v58 = vsel %vm795_vm4, %v806_v53, %v807_v54  ;;  %v601_v3 = vrot.slane %v4883_v35, 1  ;;  %v602_v4 = vrot.slane %v4885_v36, 1 }
  0x50   : > { %517 = vst.msk [vmem:[#allocation3 + $0x60] sm:$0xff] %vm418_vm6, %v4920_v47  ;;  %518 = vst.msk [vmem:[#allocation3 + $0x68] sm:$0xff] %vm418_vm6, %v4932_v50  ;;  %v600_v59 = vsel %vm585_vm5, %v597_v49, %v599_v55  ;;  %4376 = vmatprep.subr.mxu0 %v1837_v61  ;;  %v810_v63 = vsel %vm795_vm4, %v807_v54, %v809_v62  ;;  %v4972_v2 = vld [vmem:[#allocation2 + $0xa8] sm:$0xff]  ;;  %v462_v7 = vld [vmem:[#allocation2 + $0x58] sm:$0x3]  ;;  %v811_v8 = vrot.slane %v4883_v35, 2 }
  0x51   : > { %4377 = vmatpush3.msra.mxu0 %v1837_v61  ;;  %432 = vst.msk [vmem:[#allocation2 + $0xb1] sm:$0xff] %vm418_vm6, %v398_v1  ;;  %519 = vst.msk [vmem:[#allocation3 + $0x70] sm:$0xff] %vm418_vm6, %v4972_v2  ;;  %v603_v6 = vsel %vm585_vm5, %v601_v3, %v602_v4  ;;  %v812_v9 = vrot.slane %v4885_v36, 2  ;;  %v604_v10 = vrot.slane %v462_v7, 1  ;;  %v814_v13 = vrot.slane %v462_v7, 2  ;;  %v400_v16 = vld [vmem:[%s4695_s22 + $0x78] sm:$0xff] }
  0x52   : > { %433 = vst.msk [vmem:[#allocation2 + $0xc1] sm:$0xff] %vm418_vm6, %v399_v15  ;;  %434 = vst.msk [vmem:[#allocation2 + $0xc9] sm:$0xff] %vm418_vm6, %v400_v16  ;;  %v606_v18 = vrot.slane %v4891_v37, 1  ;;  %v607_v19 = vrot.slane %v4893_v38, 1  ;;  %v465_v22 = vld [vmem:[#allocation2 + $0x70] sm:$0x3] }
  0x53   : > { %1276 = vrot.lane.b32.xlu1 %v803_v41, %s4582_s12  ;;  %1144 = vrot.lane.b32.xlu0 %v595_v42, %s4581_s10  ;;  %v813_v11 = vsel %vm795_vm4, %v811_v8, %v812_v9  ;;  %v605_v12 = vsel %vm585_vm5, %v602_v4, %v604_v10  ;;  %v815_v14 = vsel %vm795_vm4, %v812_v9, %v814_v13  ;;  %v816_v23 = vrot.slane %v4891_v37, 2  ;;  %v402_v33 = vld [vmem:[%s4695_s22 + $0x88] sm:$0xff]  ;;  %v404_v3 = vld [vmem:[%s4695_s22 + $0x98] sm:$0xff]  ;;  %v471_v16 = vld [vmem:[#allocation2 + $0xa0] sm:$0x3]  ;;  %s7123_s17 = smov 64  }
  0x54   : > { %v608_v21 = vsel %vm585_vm5, %v606_v18, %v607_v19  ;;  %v817_v24 = vrot.slane %v4893_v38, 2  ;;  %v609_v25 = vrot.slane %v465_v22, 1  ;;  %v819_v28 = vrot.slane %v465_v22, 2  ;;  %436 = vst.msk [vmem:[#allocation2 + $0xe1] sm:$0xff] %vm418_vm6, %v402_v33  ;;  %v468_v48 = vld [vmem:[#allocation2 + $0x88] sm:$0x3] }
  0x55   : > { %v821_v49 = vrot.slane %v4899_v39, 2  ;;  %v614_v52 = vrot.slane %v468_v48, 1  ;;  %vm1503_vm13 = vcmask 171152   ;;  %vm1638_vm14 = vcmask 195752   ;;  %438 = vst.msk [vmem:[#allocation2 + $0xf9] sm:$0xff] %vm418_vm6, %v404_v3  ;;  %s7130_s19 = smov 64  }
  0x56   : > { %v818_v26 = vsel %vm795_vm4, %v816_v23, %v817_v24  ;;  %v610_v27 = vsel %vm585_vm5, %v607_v19, %v609_v25  ;;  %vm1772_vm15 = vcmask 220352   ;;  %v616_v8 = vrot.slane %v4920_v47, 1 }
  0x57   : > { %880 = vrot.lane.b32.xlu1 %v803_v41, %s4578_s24  ;;  %672 = vrot.lane.b32.xlu0 %v595_v42, %s4579_s25  ;;  %v617_v9 = vrot.slane %v4932_v50, 1  ;;  %vm1848_vm0 = vcmask 220160   ;;  %v826_v18 = vrot.slane %v4920_v47, 2  ;;  %v827_v19 = vrot.slane %v4932_v50, 2 }
  0x58   : > { %v4984_v5 = vld [vmem:[#allocation2 + $0xb0] sm:$0xff]  ;;  %vm2520_vm1 = vcmask 130048   ;;  %vm2621_vm2 = vcmask 261248   ;;  %vm2678_vm3 = vcmask 392448   ;;  %vm2785_vm7 = vcmask 786048  }
  0x59   : > { %520 = vst.msk [vmem:[#allocation3 + $0x78] sm:$0xff] %vm418_vm6, %v4984_v5  ;;  %v5012_v17 = vld [vmem:[#allocation2 + $0xc0] sm:$0xff]  ;;  %v5024_v20 = vld [vmem:[#allocation2 + $0xc8] sm:$0xff]  ;;  %v618_v13 = vsel %vm585_vm5, %v616_v8, %v617_v9  ;;  %v828_v25 = vsel %vm795_vm4, %v826_v18, %v827_v19  ;;  %v407_v8 = vld [vmem:[%s4695_s22 + $0xb0] sm:$0xff] }
  0x5a   : > { %521 = vst.msk [vmem:[#allocation3 + $0x80] sm:$0xff] %vm418_vm6, %v5012_v17  ;;  %522 = vst.msk [vmem:[#allocation3 + $0x88] sm:$0xff] %vm418_vm6, %v5024_v20  ;;  %v627_v18 = vrot.slane %v5024_v20, 1 }
  0x5b   : > { %1407 = vrot.lane.b32.xlu1 %v4872_v29, %s7119_s13  ;;  %1278 = vrot.lane.b32.xlu0 %v805_v46, %s4582_s12  ;;  %441 = vst.msk [vmem:[#allocation2 + $0x121] sm:$0xff] %vm418_vm6, %v407_v8 }
  0x5f   : > { %1011 = vrot.lane.b32.xlu1 %v4872_v29, %s7121_s26  ;;  %882 = vrot.lane.b32.xlu0 %v805_v46, %s4578_s24  ;;  %v820_v29 = vsel %vm795_vm4, %v817_v24, %v819_v28  ;;  %v829_v28 = vrot.slane %v471_v16, 2 }
  0x63   : > { %1542 = vrot.lane.b32.xlu1 %v598_v51, %s4584_s18  ;;  %1409 = vrot.lane.b32.xlu0 %v4874_v30, %s7119_s13  ;;  %s4585_s13 = smov 24  }
  0x67   : > { %1146 = vrot.lane.b32.xlu1 %v598_v51, %s4581_s10  ;;  %1013 = vrot.lane.b32.xlu0 %v4874_v30, %s7121_s26  ;;  %s7126_s26 = smov 18   ;;  %v401_v30 = vld [vmem:[%s4695_s22 + $0x80] sm:$0xff] }
  0x68   : > { %435 = vst.msk [vmem:[#allocation2 + $0xd9] sm:$0xff] %vm418_vm6, %v401_v30 }
  0x6b   : > { %1676 = vrot.lane.b32.xlu1 %v808_v58, %s4585_s13  ;;  %1544 = vrot.lane.b32.xlu0 %v600_v59, %s4584_s18 }
  0x6f   : > { %1148 = vrot.lane.b32.xlu1 %v600_v59, %s4581_s10  ;;  %674 = vrot.lane.b32.xlu0 %v598_v51, %s4579_s25  ;;  %v5070_v43 = vld [vmem:[#allocation2 + $0xe0] sm:$0xff]  ;;  %v822_v51 = vrot.slane %v4901_v40, 2 }
  0x70   : > { %524 = vst.msk [vmem:[#allocation3 + $0x98] sm:$0xff] %vm418_vm6, %v5070_v43 }
  0x71   : > { %v823_v55 = vsel %vm795_vm4, %v821_v49, %v822_v51 }
  0x73   : > { %1678 = vrot.lane.b32.xlu1 %v810_v63, %s4585_s13  ;;  %1280 = vrot.lane.b32.xlu0 %v808_v58, %s4582_s12 }
  0x77   : > { %884 = vrot.lane.b32.xlu1 %v808_v58, %s4578_s24  ;;  %676 = vrot.lane.b32.xlu0 %v600_v59, %s4579_s25  ;;  %v824_v58 = vrot.slane %v468_v48, 2 }
  0x7b   : > { %1411 = vrot.lane.b32.xlu1 %v4883_v35, %s7126_s26  ;;  %1282 = vrot.lane.b32.xlu0 %v810_v63, %s4582_s12 }
  0x7f   : > { %1015 = vrot.lane.b32.xlu1 %v4883_v35, %s7127_s21  ;;  %886 = vrot.lane.b32.xlu0 %v810_v63, %s4578_s24  ;;  %v403_v63 = vld [vmem:[%s4695_s22 + $0x90] sm:$0xff] }
  0x80   : > { %437 = vst.msk [vmem:[#allocation2 + $0xf1] sm:$0xff] %vm418_vm6, %v403_v63 }
  0x83   : > { %1546 = vrot.lane.b32.xlu1 %v603_v6, %s4584_s18  ;;  %1413 = vrot.lane.b32.xlu0 %v4885_v36, %s7126_s26 }
  0x87   : > { %1150 = vrot.lane.b32.xlu1 %v603_v6, %s4581_s10  ;;  %1017 = vrot.lane.b32.xlu0 %v4885_v36, %s7127_s21  ;;  %v5055_v36 = vld [vmem:[#allocation2 + $0xd8] sm:$0xff]  ;;  %v5112_v7 = vld [vmem:[#allocation2 + $0xf0] sm:$0xff] }
  0x88   : > { %523 = vst.msk [vmem:[#allocation3 + $0x90] sm:$0xff] %vm418_vm6, %v5055_v36  ;;  %525 = vst.msk [vmem:[#allocation3 + $0xa0] sm:$0xff] %vm418_vm6, %v5112_v7 }
  0x8b   : > { %1680 = vrot.lane.b32.xlu1 %v813_v11, %s4585_s13  ;;  %1548 = vrot.lane.b32.xlu0 %v605_v12, %s4584_s18 }
  0x8f   : > { %1152 = vrot.lane.b32.xlu1 %v605_v12, %s4581_s10  ;;  %678 = vrot.lane.b32.xlu0 %v603_v6, %s4579_s25 }
  0x93   : > { %1682 = vrot.lane.b32.xlu1 %v815_v14, %s4585_s13  ;;  %1284 = vrot.lane.b32.xlu0 %v813_v11, %s4582_s12 }
  0x97   : > { %888 = vrot.lane.b32.xlu1 %v813_v11, %s4578_s24  ;;  %680 = vrot.lane.b32.xlu0 %v605_v12, %s4579_s25  ;;  %v5126_v12 = vld [vmem:[#allocation2 + $0xf8] sm:$0xff] }
  0x98   : > { %526 = vst.msk [vmem:[#allocation3 + $0xa8] sm:$0xff] %vm418_vm6, %v5126_v12 }
  0x9b   : > { %1415 = vrot.lane.b32.xlu1 %v4891_v37, %s7126_s26  ;;  %1286 = vrot.lane.b32.xlu0 %v815_v14, %s4582_s12 }
  0x9f   : > { %1019 = vrot.lane.b32.xlu1 %v4891_v37, %s7127_s21  ;;  %890 = vrot.lane.b32.xlu0 %v815_v14, %s4578_s24  ;;  %v611_v37 = vrot.slane %v4899_v39, 1 }
  0xa3   : > { %1550 = vrot.lane.b32.xlu1 %v608_v21, %s4584_s18  ;;  %1417 = vrot.lane.b32.xlu0 %v4893_v38, %s7126_s26 }
  0xa7   : > { %1154 = vrot.lane.b32.xlu1 %v608_v21, %s4581_s10  ;;  %1021 = vrot.lane.b32.xlu0 %v4893_v38, %s7127_s21  ;;  %v612_v38 = vrot.slane %v4901_v40, 1 }
  0xa9   : > { %v613_v44 = vsel %vm585_vm5, %v611_v37, %v612_v38  ;;  %v615_v56 = vsel %vm585_vm5, %v612_v38, %v614_v52  ;;  %v406_v38 = vld [vmem:[%s4695_s22 + $0xa8] sm:$0xff] }
  0xaa   : > { %440 = vst.msk [vmem:[#allocation2 + $0x111] sm:$0xff] %vm418_vm6, %v406_v38 }
  0xab   : > { %1684 = vrot.lane.b32.xlu1 %v818_v26, %s4585_s13  ;;  %1552 = vrot.lane.b32.xlu0 %v610_v27, %s4584_s18 }
  0xaf   : > { %1156 = vrot.lane.b32.xlu1 %v610_v27, %s4581_s10  ;;  %682 = vrot.lane.b32.xlu0 %v608_v21, %s4579_s25  ;;  %v619_v21 = vrot.slane %v471_v16, 1  ;;  %v626_v16 = vrot.slane %v5012_v17, 1 }
  0xb3   : > { %1686 = vrot.lane.b32.xlu1 %v820_v29, %s4585_s13  ;;  %1288 = vrot.lane.b32.xlu0 %v818_v26, %s4582_s12 }
  0xb5   : > { %v877_v31 = vpop.permute.xlu1 %876  ;;  %v667_v32 = vpop.permute.xlu0 %666 }
  0xb6   : > { %763 = vst.msk [vmem:[#allocation3] sm:$0xff] %vm762_vm8, %v667_v32 }
  0xb7   : > { %892 = vrot.lane.b32.xlu1 %v818_v26, %s4578_s24  ;;  %684 = vrot.lane.b32.xlu0 %v610_v27, %s4579_s25  ;;  %973 = vst.msk [vmem:[#allocation3] sm:$0xff] %vm972_vm9, %v877_v31 }
  0xb9   : > { %v879_v34 = vpop.permute.xlu1 %878  ;;  %v669_v35 = vpop.permute.xlu0 %668 }
  0xba   : > { %764 = vst.msk [vmem:[#allocation3 + $0x8] sm:$0xff] %vm762_vm8, %v669_v35 }
  0xbb   : > { %1419 = vrot.lane.b32.xlu1 %v4899_v39, %s7126_s26  ;;  %1290 = vrot.lane.b32.xlu0 %v820_v29, %s4582_s12  ;;  %974 = vst.msk [vmem:[#allocation3 + $0x8] sm:$0xff] %vm972_vm9, %v879_v34  ;;  %v405_v34 = vld [vmem:[%s4695_s22 + $0xa0] sm:$0xff] }
  0xbc   : > { %439 = vst.msk [vmem:[#allocation2 + $0x109] sm:$0xff] %vm418_vm6, %v405_v34 }
  0xbd   : > { %v1010_v41 = vpop.permute.xlu1 %1009  ;;  %v1008_v42 = vpop.permute.xlu0 %1007 }
  0xbe   : > { %1105 = vst.msk [vmem:[#allocation3 + $0x8] sm:$0xff] %vm1103_vm10, %v1010_v41  ;;  %1104 = vst.msk [vmem:[#allocation3] sm:$0xff] %vm1103_vm10, %v1008_v42 }
  0xbf   : > { %1023 = vrot.lane.b32.xlu1 %v4899_v39, %s7127_s21  ;;  %894 = vrot.lane.b32.xlu0 %v820_v29, %s4578_s24 }
  0xc1   : > { %v671_v45 = vpop.permute.xlu1 %670  ;;  %v1143_v46 = vpop.permute.xlu0 %1142 }
  0xc2   : > { %765 = vst.msk [vmem:[#allocation3 + $0x10] sm:$0xff] %vm762_vm8, %v671_v45  ;;  %v621_v45 = vrot.slane %v4972_v2, 1 }
  0xc3   : > { %1239 = vst.msk [vmem:[#allocation3] sm:$0xff] %vm1238_vm11, %v1143_v46  ;;  %1554 = vrot.lane.b32.xlu1 %v613_v44, %s4584_s18  ;;  %1421 = vrot.lane.b32.xlu0 %v4901_v40, %s7126_s26  ;;  %v622_v46 = vrot.slane %v4984_v5, 1 }
  0xc5   : > { %v1277_v53 = vpop.permute.xlu1 %1276  ;;  %v1145_v54 = vpop.permute.xlu0 %1144  ;;  %v623_v52 = vsel %vm585_vm5, %v621_v45, %v622_v46  ;;  %v409_v45 = vld [vmem:[%s4695_s22 + $0xc0] sm:$0xff] }
  0xc6   : > { %1373 = vst.msk [vmem:[#allocation3] sm:$0xff] %vm1372_vm12, %v1277_v53 }
  0xc7   : > { %1240 = vst.msk [vmem:[#allocation3 + $0x8] sm:$0xff] %vm1238_vm11, %v1145_v54  ;;  %1158 = vrot.lane.b32.xlu1 %v613_v44, %s4581_s10  ;;  %1025 = vrot.lane.b32.xlu0 %v4901_v40, %s7127_s21  ;;  %v825_v40 = vsel %vm795_vm4, %v822_v51, %v824_v58  ;;  %v5184_v51 = vld [vmem:[#allocation2 + $0x110] sm:$0xff] }
  0xc8   : > { %528 = vst.msk [vmem:[#allocation3 + $0xb8] sm:$0xff] %vm418_vm6, %v5184_v51  ;;  %443 = vst.msk [vmem:[#allocation2 + $0x139] sm:$0xff] %vm418_vm6, %v409_v45 }
  0xc9   : > { %v881_v57 = vpop.permute.xlu1 %880  ;;  %v673_v39 = vpop.permute.xlu0 %672 }
  0xca   : > { %975 = vst.msk [vmem:[#allocation3 + $0x10] sm:$0xff] %vm972_vm9, %v881_v57  ;;  %v832_v57 = vrot.slane %v4984_v5, 2 }
  0xcb   : > { %766 = vst.msk [vmem:[#allocation3 + $0x18] sm:$0xff] %vm762_vm8, %v673_v39  ;;  %1688 = vrot.lane.b32.xlu1 %v823_v55, %s4585_s13  ;;  %1556 = vrot.lane.b32.xlu0 %v615_v56, %s4584_s18 }
  0xcd   : > { %v1408_v59 = vpop.permute.xlu1 %1407  ;;  %v1279_v60 = vpop.permute.xlu0 %1278 }
  0xce   : > { %1504 = vst.msk [vmem:[#allocation3] sm:$0xff] %vm1503_vm13, %v1408_v59 }
  0xcf   : > { %1374 = vst.msk [vmem:[#allocation3 + $0x8] sm:$0xff] %vm1372_vm12, %v1279_v60  ;;  %1160 = vrot.lane.b32.xlu1 %v615_v56, %s4581_s10  ;;  %686 = vrot.lane.b32.xlu0 %v613_v44, %s4579_s25  ;;  %v5170_v44 = vld [vmem:[#allocation2 + $0x108] sm:$0xff] }
  0xd0   : > { %527 = vst.msk [vmem:[#allocation3 + $0xb0] sm:$0xff] %vm418_vm6, %v5170_v44 }
  0xd1   : > { %v1012_v61 = vpop.permute.xlu1 %1011  ;;  %v883_v62 = vpop.permute.xlu0 %882 }
  0xd2   : > { %1106 = vst.msk [vmem:[#allocation3 + $0x10] sm:$0xff] %vm1103_vm10, %v1012_v61 }
  0xd3   : > { %976 = vst.msk [vmem:[#allocation3 + $0x18] sm:$0xff] %vm972_vm9, %v883_v62  ;;  %1690 = vrot.lane.b32.xlu1 %v825_v40, %s4585_s13  ;;  %1292 = vrot.lane.b32.xlu0 %v823_v55, %s4582_s12 }
  0xd5   : > { %v1543_v0 = vpop.permute.xlu1 %1542  ;;  %v1410_v1 = vpop.permute.xlu0 %1409 }
  0xd6   : > { %1639 = vst.msk [vmem:[#allocation3] sm:$0xff] %vm1638_vm14, %v1543_v0 }
  0xd7   : > { %1505 = vst.msk [vmem:[#allocation3 + $0x8] sm:$0xff] %vm1503_vm13, %v1410_v1  ;;  %896 = vrot.lane.b32.xlu1 %v823_v55, %s4578_s24  ;;  %688 = vrot.lane.b32.xlu0 %v615_v56, %s4579_s25  ;;  %v474_v55 = vld [vmem:[#allocation2 + $0xb8] sm:$0x3]  ;;  %v831_v56 = vrot.slane %v4972_v2, 2 }
  0xd8   : > { %v624_v39 = vrot.slane %v474_v55, 1  ;;  %v834_v63 = vrot.slane %v474_v55, 2  ;;  %v631_v55 = vrot.slane %v5055_v36, 1 }
  0xd9   : > { %v1147_v4 = vpop.permute.xlu1 %1146  ;;  %v1014_v6 = vpop.permute.xlu0 %1013 }
  0xda   : > { %1241 = vst.msk [vmem:[#allocation3 + $0x10] sm:$0xff] %vm1238_vm11, %v1147_v4 }
  0xdb   : > { %1107 = vst.msk [vmem:[#allocation3 + $0x18] sm:$0xff] %vm1103_vm10, %v1014_v6  ;;  %1423 = vrot.lane.b32.xlu1 %v4920_v47, %s7126_s26  ;;  %1294 = vrot.lane.b32.xlu0 %v825_v40, %s4582_s12 }
  0xdd   : > { %v1677_v10 = vpop.permute.xlu1 %1676  ;;  %v1545_v11 = vpop.permute.xlu0 %1544 }
  0xde   : > { %1773 = vst.msk [vmem:[#allocation3] sm:$0xff] %vm1772_vm15, %v1677_v10 }
  0xdf   : > { %1640 = vst.msk [vmem:[#allocation3 + $0x8] sm:$0xff] %vm1638_vm14, %v1545_v11  ;;  %1027 = vrot.lane.b32.xlu1 %v4920_v47, %s7127_s21  ;;  %898 = vrot.lane.b32.xlu0 %v825_v40, %s4578_s24  ;;  %v620_v47 = vsel %vm585_vm5, %v617_v9, %v619_v21  ;;  %v833_v40 = vsel %vm795_vm4, %v831_v56, %v832_v57  ;;  %v408_v11 = vld [vmem:[%s4695_s22 + $0xb8] sm:$0xff]  ;;  %v632_v56 = vrot.slane %v5070_v43, 1 }
  0xe0   : > { %442 = vst.msk [vmem:[#allocation2 + $0x129] sm:$0xff] %vm418_vm6, %v408_v11 }
  0xe1   : > { %v1149_v14 = vpop.permute.xlu1 %1148  ;;  %v675_v15 = vpop.permute.xlu0 %674 }
  0xe2   : > { %1242 = vst.msk [vmem:[#allocation3 + $0x18] sm:$0xff] %vm1238_vm11, %v1149_v14 }
  0xe3   : > { %767 = vst.msk [vmem:[#allocation3 + $0x20] sm:$0xff] %vm762_vm8, %v675_v15  ;;  %1558 = vrot.lane.b32.xlu1 %v618_v13, %s4584_s18  ;;  %1425 = vrot.lane.b32.xlu0 %v4932_v50, %s7126_s26  ;;  %v5228_v15 = vld [vmem:[#allocation2 + $0x120] sm:$0xff] }
  0xe4   : > { %529 = vst.msk [vmem:[#allocation3 + $0xc0] sm:$0xff] %vm418_vm6, %v5228_v15 }
  0xe5   : > { %v1679_v22 = vpop.permute.xlu1 %1678  ;;  %v1281_v23 = vpop.permute.xlu0 %1280  ;;  %v1805_v24 = vld [vmem:[#allocation3] sm:$0xff] }
  0xe6   : > { %1774 = vst.msk [vmem:[#allocation3 + $0x8] sm:$0xff] %vm1772_vm15, %v1679_v22  ;;  %4378 = vmatprep.mubr.msk.f32.mxu0 %vm1848_vm0, %v1805_v24 }
  0xe7   : > { %1375 = vst.msk [vmem:[#allocation3 + $0x10] sm:$0xff] %vm1372_vm12, %v1281_v23  ;;  %1162 = vrot.lane.b32.xlu1 %v618_v13, %s4581_s10  ;;  %1029 = vrot.lane.b32.xlu0 %v4932_v50, %s7127_s21  ;;  %v830_v50 = vsel %vm795_vm4, %v827_v19, %v829_v28  ;;  %v5242_v22 = vld [vmem:[#allocation2 + $0x128] sm:$0xff]  ;;  %v628_v23 = vsel %vm585_vm5, %v626_v16, %v627_v18  ;;  %v411_v16 = vld [vmem:[%s4695_s22 + $0xd0] sm:$0xff] }
  0xe8   : > { %530 = vst.msk [vmem:[#allocation3 + $0xc8] sm:$0xff] %vm418_vm6, %v5242_v22  ;;  %445 = vst.msk [vmem:[#allocation2 + $0x151] sm:$0xff] %vm418_vm6, %v411_v16 }
  0xe9   : > { %v885_v26 = vpop.permute.xlu1 %884  ;;  %v677_v27 = vpop.permute.xlu0 %676 }
  0xea   : > { %977 = vst.msk [vmem:[#allocation3 + $0x20] sm:$0xff] %vm972_vm9, %v885_v26  ;;  %v836_v26 = vrot.slane %v5012_v17, 2 }
  0xeb   : > { %768 = vst.msk [vmem:[#allocation3 + $0x28] sm:$0xff] %vm762_vm8, %v677_v27  ;;  %1692 = vrot.lane.b32.xlu1 %v828_v25, %s4585_s13  ;;  %1560 = vrot.lane.b32.xlu0 %v620_v47, %s4584_s18  ;;  %v837_v27 = vrot.slane %v5024_v20, 2 }
  0xed   : > { %v1412_v29 = vpop.permute.xlu1 %1411  ;;  %v1283_v30 = vpop.permute.xlu0 %1282  ;;  %v1806_v31 = vld [vmem:[#allocation3 + $0x8] sm:$0xff] }
  0xee   : > { %1506 = vst.msk [vmem:[#allocation3 + $0x10] sm:$0xff] %vm1503_vm13, %v1412_v29  ;;  %4379 = vmatmul.mubr.msk.f32.vlgmr.msra.gmra.mxu0 %vm1848_vm0, %v1806_v31 }
  0xef   : > { %1376 = vst.msk [vmem:[#allocation3 + $0x18] sm:$0xff] %vm1372_vm12, %v1283_v30  ;;  %1164 = vrot.lane.b32.xlu1 %v620_v47, %s4581_s10  ;;  %690 = vrot.lane.b32.xlu0 %v618_v13, %s4579_s25 }
  0xf1   : > { %v1016_v32 = vpop.permute.xlu1 %1015  ;;  %v887_v33 = vpop.permute.xlu0 %886 }
  0xf2   : > { %1108 = vst.msk [vmem:[#allocation3 + $0x20] sm:$0xff] %vm1103_vm10, %v1016_v32 }
  0xf3   : > { %978 = vst.msk [vmem:[#allocation3 + $0x28] sm:$0xff] %vm972_vm9, %v887_v33  ;;  %1694 = vrot.lane.b32.xlu1 %v830_v50, %s4585_s13  ;;  %1296 = vrot.lane.b32.xlu0 %v828_v25, %s4582_s12 }
  0xf5   : > { %v1547_v35 = vpop.permute.xlu1 %1546  ;;  %v1414_v37 = vpop.permute.xlu0 %1413 }
  0xf6   : > { %1641 = vst.msk [vmem:[#allocation3 + $0x10] sm:$0xff] %vm1638_vm14, %v1547_v35 }
  0xf7   : > { %1507 = vst.msk [vmem:[#allocation3 + $0x18] sm:$0xff] %vm1503_vm13, %v1414_v37  ;;  %900 = vrot.lane.b32.xlu1 %v828_v25, %s4578_s24  ;;  %692 = vrot.lane.b32.xlu0 %v620_v47, %s4579_s25  ;;  %v477_v47 = vld [vmem:[#allocation2 + $0xd0] sm:$0x3] }
  0xf8   : > { %v629_v28 = vrot.slane %v477_v47, 1  ;;  %v839_v34 = vrot.slane %v477_v47, 2  ;;  %v636_v47 = vrot.slane %v5112_v7, 1 }
  0xf9   : > { %v1151_v41 = vpop.permute.xlu1 %1150  ;;  %v1018_v42 = vpop.permute.xlu0 %1017 }
  0xfa   : > { %1243 = vst.msk [vmem:[#allocation3 + $0x20] sm:$0xff] %vm1238_vm11, %v1151_v41 }
  0xfb   : > { %1109 = vst.msk [vmem:[#allocation3 + $0x28] sm:$0xff] %vm1103_vm10, %v1018_v42  ;;  %1427 = vrot.lane.b32.xlu1 %v4972_v2, %s7126_s26  ;;  %1298 = vrot.lane.b32.xlu0 %v830_v50, %s4582_s12 }
  0xfd   : > { %v1681_v48 = vpop.permute.xlu1 %1680  ;;  %v1549_v49 = vpop.permute.xlu0 %1548 }
  0xfe   : > { %1775 = vst.msk [vmem:[#allocation3 + $0x10] sm:$0xff] %vm1772_vm15, %v1681_v48 }
  0xff   : > { %1642 = vst.msk [vmem:[#allocation3 + $0x18] sm:$0xff] %vm1638_vm14, %v1549_v49  ;;  %1031 = vrot.lane.b32.xlu1 %v4972_v2, %s7127_s21  ;;  %902 = vrot.lane.b32.xlu0 %v830_v50, %s4578_s24  ;;  %v625_v2 = vsel %vm585_vm5, %v622_v46, %v624_v39  ;;  %v838_v50 = vsel %vm795_vm4, %v836_v26, %v837_v27  ;;  %v410_v49 = vld [vmem:[%s4695_s22 + $0xc8] sm:$0xff]  ;;  %v637_v26 = vrot.slane %v5126_v12, 1 }
 0x100   : > { %444 = vst.msk [vmem:[#allocation2 + $0x141] sm:$0xff] %vm418_vm6, %v410_v49 }
 0x101   : > { %v1153_v53 = vpop.permute.xlu1 %1152  ;;  %v679_v54 = vpop.permute.xlu0 %678 }
 0x102   : > { %1244 = vst.msk [vmem:[#allocation3 + $0x28] sm:$0xff] %vm1238_vm11, %v1153_v53 }
 0x103   : > { %769 = vst.msk [vmem:[#allocation3 + $0x30] sm:$0xff] %vm762_vm8, %v679_v54  ;;  %1562 = vrot.lane.b32.xlu1 %v623_v52, %s4584_s18  ;;  %1429 = vrot.lane.b32.xlu0 %v4984_v5, %s7126_s26  ;;  %v5286_v54 = vld [vmem:[#allocation2 + $0x138] sm:$0xff] }
 0x104   : > { %531 = vst.msk [vmem:[#allocation3 + $0xd0] sm:$0xff] %vm418_vm6, %v5286_v54 }
 0x105   : > { %v1683_v58 = vpop.permute.xlu1 %1682  ;;  %v1285_v59 = vpop.permute.xlu0 %1284  ;;  %v1807_v60 = vld [vmem:[#allocation3 + $0x10] sm:$0xff] }
 0x106   : > { %1776 = vst.msk [vmem:[#allocation3 + $0x18] sm:$0xff] %vm1772_vm15, %v1683_v58  ;;  %4381 = vmatprep.mubr.msk.f32.mxu0 %vm1848_vm0, %v1807_v60 }
 0x107   : > { %1377 = vst.msk [vmem:[#allocation3 + $0x20] sm:$0xff] %vm1372_vm12, %v1285_v59  ;;  %1166 = vrot.lane.b32.xlu1 %v623_v52, %s4581_s10  ;;  %1033 = vrot.lane.b32.xlu0 %v4984_v5, %s7127_s21  ;;  %v835_v5 = vsel %vm795_vm4, %v832_v57, %v834_v63  ;;  %v5300_v58 = vld [vmem:[#allocation2 + $0x140] sm:$0xff]  ;;  %v633_v59 = vsel %vm585_vm5, %v631_v55, %v632_v56 }
 0x108   : > { %532 = vst.msk [vmem:[#allocation3 + $0xd8] sm:$0xff] %vm418_vm6, %v5300_v58  ;;  %v413_v55 = vld [vmem:[%s4695_s22 + $0xe0] sm:$0xff] }
 0x109   : > { %v889_v61 = vpop.permute.xlu1 %888  ;;  %v681_v62 = vpop.permute.xlu0 %680  ;;  %447 = vst.msk [vmem:[#allocation2 + $0x169] sm:$0xff] %vm418_vm6, %v413_v55 }
 0x10a   : > { %979 = vst.msk [vmem:[#allocation3 + $0x30] sm:$0xff] %vm972_vm9, %v889_v61  ;;  %v841_v61 = vrot.slane %v5055_v36, 2 }
 0x10b   : > { %770 = vst.msk [vmem:[#allocation3 + $0x38] sm:$0xff] %vm762_vm8, %v681_v62  ;;  %1696 = vrot.lane.b32.xlu1 %v833_v40, %s4585_s13  ;;  %1564 = vrot.lane.b32.xlu0 %v625_v2, %s4584_s18  ;;  %v842_v62 = vrot.slane %v5070_v43, 2 }
 0x10d   : > { %v1416_v0 = vpop.permute.xlu1 %1415  ;;  %v1287_v1 = vpop.permute.xlu0 %1286  ;;  %v1808_v3 = vld [vmem:[#allocation3 + $0x18] sm:$0xff] }
 0x10e   : > { %1508 = vst.msk [vmem:[#allocation3 + $0x20] sm:$0xff] %vm1503_vm13, %v1416_v0  ;;  %4382 = vmatmul.mubr.msk.f32.gmra.mxu0 %vm1848_vm0, %v1808_v3 }
 0x10f   : > { %1378 = vst.msk [vmem:[#allocation3 + $0x28] sm:$0xff] %vm1372_vm12, %v1287_v1  ;;  %1168 = vrot.lane.b32.xlu1 %v625_v2, %s4581_s10  ;;  %694 = vrot.lane.b32.xlu0 %v623_v52, %s4579_s25 }
 0x111   : > { %v1020_v4 = vpop.permute.xlu1 %1019  ;;  %v891_v6 = vpop.permute.xlu0 %890 }
 0x112   : > { %1110 = vst.msk [vmem:[#allocation3 + $0x30] sm:$0xff] %vm1103_vm10, %v1020_v4 }
 0x113   : > { %980 = vst.msk [vmem:[#allocation3 + $0x38] sm:$0xff] %vm972_vm9, %v891_v6  ;;  %1698 = vrot.lane.b32.xlu1 %v835_v5, %s4585_s13  ;;  %1300 = vrot.lane.b32.xlu0 %v833_v40, %s4582_s12 }
 0x115   : > { %v1551_v9 = vpop.permute.xlu1 %1550  ;;  %v1418_v10 = vpop.permute.xlu0 %1417 }
 0x116   : > { %1643 = vst.msk [vmem:[#allocation3 + $0x20] sm:$0xff] %vm1638_vm14, %v1551_v9 }
 0x117   : > { %1509 = vst.msk [vmem:[#allocation3 + $0x28] sm:$0xff] %vm1503_vm13, %v1418_v10  ;;  %904 = vrot.lane.b32.xlu1 %v833_v40, %s4578_s24  ;;  %696 = vrot.lane.b32.xlu0 %v625_v2, %s4579_s25  ;;  %v480_v2 = vld [vmem:[#allocation2 + $0xe8] sm:$0x3] }
 0x118   : > { %v634_v63 = vrot.slane %v480_v2, 1  ;;  %v844_v8 = vrot.slane %v480_v2, 2  ;;  %v641_v2 = vrot.slane %v5170_v44, 1 }
 0x119   : > { %v1155_v13 = vpop.permute.xlu1 %1154  ;;  %v1022_v14 = vpop.permute.xlu0 %1021 }
 0x11a   : > { %1245 = vst.msk [vmem:[#allocation3 + $0x30] sm:$0xff] %vm1238_vm11, %v1155_v13 }
 0x11b   : > { %1111 = vst.msk [vmem:[#allocation3 + $0x38] sm:$0xff] %vm1103_vm10, %v1022_v14  ;;  %1431 = vrot.lane.b32.xlu1 %v5012_v17, %s7126_s26  ;;  %1302 = vrot.lane.b32.xlu0 %v835_v5, %s4582_s12 }
 0x11d   : > { %v1685_v19 = vpop.permute.xlu1 %1684  ;;  %v1553_v21 = vpop.permute.xlu0 %1552 }
 0x11e   : > { %1777 = vst.msk [vmem:[#allocation3 + $0x20] sm:$0xff] %vm1772_vm15, %v1685_v19 }
 0x11f   : > { %1644 = vst.msk [vmem:[#allocation3 + $0x28] sm:$0xff] %vm1638_vm14, %v1553_v21  ;;  %1035 = vrot.lane.b32.xlu1 %v5012_v17, %s7127_s21  ;;  %906 = vrot.lane.b32.xlu0 %v835_v5, %s4578_s24  ;;  %v630_v17 = vsel %vm585_vm5, %v627_v18, %v629_v28  ;;  %v843_v5 = vsel %vm795_vm4, %v841_v61, %v842_v62  ;;  %v412_v21 = vld [vmem:[%s4695_s22 + $0xd8] sm:$0xff]  ;;  %v642_v61 = vrot.slane %v5184_v51, 1 }
 0x120   : > { %446 = vst.msk [vmem:[#allocation2 + $0x159] sm:$0xff] %vm418_vm6, %v412_v21 }
 0x121   : > { %v1157_v24 = vpop.permute.xlu1 %1156  ;;  %v683_v25 = vpop.permute.xlu0 %682 }
 0x122   : > { %1246 = vst.msk [vmem:[#allocation3 + $0x38] sm:$0xff] %vm1238_vm11, %v1157_v24 }
 0x123   : > { %771 = vst.msk [vmem:[#allocation3 + $0x40] sm:$0xff] %vm762_vm8, %v683_v25  ;;  %1566 = vrot.lane.b32.xlu1 %v628_v23, %s4584_s18  ;;  %1433 = vrot.lane.b32.xlu0 %v5024_v20, %s7126_s26  ;;  %v5344_v25 = vld [vmem:[#allocation2 + $0x150] sm:$0xff] }
 0x124   : > { %533 = vst.msk [vmem:[#allocation3 + $0xe0] sm:$0xff] %vm418_vm6, %v5344_v25 }
 0x125   : > { %v1687_v29 = vpop.permute.xlu1 %1686  ;;  %v1289_v30 = vpop.permute.xlu0 %1288  ;;  %v1809_v31 = vld [vmem:[#allocation3 + $0x20] sm:$0xff] }
 0x126   : > { %1778 = vst.msk [vmem:[#allocation3 + $0x28] sm:$0xff] %vm1772_vm15, %v1687_v29  ;;  %4384 = vmatprep.mubr.msk.f32.mxu0 %vm1848_vm0, %v1809_v31 }
 0x127   : > { %1379 = vst.msk [vmem:[#allocation3 + $0x30] sm:$0xff] %vm1372_vm12, %v1289_v30  ;;  %1170 = vrot.lane.b32.xlu1 %v628_v23, %s4581_s10  ;;  %1037 = vrot.lane.b32.xlu0 %v5024_v20, %s7127_s21  ;;  %v840_v20 = vsel %vm795_vm4, %v837_v27, %v839_v34  ;;  %v5358_v29 = vld [vmem:[#allocation2 + $0x158] sm:$0xff]  ;;  %v638_v30 = vsel %vm585_vm5, %v636_v47, %v637_v26  ;;  %v415_v47 = vld [vmem:[%s4695_s22 + $0xf0] sm:$0xff] }
 0x128   : > { %534 = vst.msk [vmem:[#allocation3 + $0xe8] sm:$0xff] %vm418_vm6, %v5358_v29  ;;  %449 = vst.msk [vmem:[#allocation2 + $0x181] sm:$0xff] %vm418_vm6, %v415_v47 }
 0x129   : > { %v893_v32 = vpop.permute.xlu1 %892  ;;  %v685_v33 = vpop.permute.xlu0 %684 }
 0x12a   : > { %981 = vst.msk [vmem:[#allocation3 + $0x40] sm:$0xff] %vm972_vm9, %v893_v32  ;;  %v846_v32 = vrot.slane %v5112_v7, 2 }
 0x12b   : > { %772 = vst.msk [vmem:[#allocation3 + $0x48] sm:$0xff] %vm762_vm8, %v685_v33  ;;  %1700 = vrot.lane.b32.xlu1 %v838_v50, %s4585_s13  ;;  %1568 = vrot.lane.b32.xlu0 %v630_v17, %s4584_s18  ;;  %v847_v33 = vrot.slane %v5126_v12, 2 }
 0x12d   : > { %v1420_v35 = vpop.permute.xlu1 %1419  ;;  %v1291_v37 = vpop.permute.xlu0 %1290  ;;  %v1810_v38 = vld [vmem:[#allocation3 + $0x28] sm:$0xff] }
 0x12e   : > { %1510 = vst.msk [vmem:[#allocation3 + $0x30] sm:$0xff] %vm1503_vm13, %v1420_v35  ;;  %4385 = vmatmul.mubr.msk.f32.gmra.mxu0 %vm1848_vm0, %v1810_v38 }
 0x12f   : > { %1380 = vst.msk [vmem:[#allocation3 + $0x38] sm:$0xff] %vm1372_vm12, %v1291_v37  ;;  %1172 = vrot.lane.b32.xlu1 %v630_v17, %s4581_s10  ;;  %698 = vrot.lane.b32.xlu0 %v628_v23, %s4579_s25 }
 0x131   : > { %v1024_v41 = vpop.permute.xlu1 %1023  ;;  %v895_v42 = vpop.permute.xlu0 %894 }
 0x132   : > { %1112 = vst.msk [vmem:[#allocation3 + $0x40] sm:$0xff] %vm1103_vm10, %v1024_v41 }
 0x133   : > { %982 = vst.msk [vmem:[#allocation3 + $0x48] sm:$0xff] %vm972_vm9, %v895_v42  ;;  %1702 = vrot.lane.b32.xlu1 %v840_v20, %s4585_s13  ;;  %1304 = vrot.lane.b32.xlu0 %v838_v50, %s4582_s12 }
 0x135   : > { %v1555_v46 = vpop.permute.xlu1 %1554  ;;  %v1422_v48 = vpop.permute.xlu0 %1421 }
 0x136   : > { %1645 = vst.msk [vmem:[#allocation3 + $0x30] sm:$0xff] %vm1638_vm14, %v1555_v46 }
 0x137   : > { %1511 = vst.msk [vmem:[#allocation3 + $0x38] sm:$0xff] %vm1503_vm13, %v1422_v48  ;;  %908 = vrot.lane.b32.xlu1 %v838_v50, %s4578_s24  ;;  %700 = vrot.lane.b32.xlu0 %v630_v17, %s4579_s25  ;;  %v483_v17 = vld [vmem:[#allocation2 + $0x100] sm:$0x3] }
 0x138   : > { %v639_v34 = vrot.slane %v483_v17, 1  ;;  %v849_v45 = vrot.slane %v483_v17, 2  ;;  %v647_v17 = vrot.slane %v5242_v22, 1 }
 0x139   : > { %v1159_v52 = vpop.permute.xlu1 %1158  ;;  %v1026_v53 = vpop.permute.xlu0 %1025 }
 0x13a   : > { %1247 = vst.msk [vmem:[#allocation3 + $0x40] sm:$0xff] %vm1238_vm11, %v1159_v52 }
 0x13b   : > { %1113 = vst.msk [vmem:[#allocation3 + $0x48] sm:$0xff] %vm1103_vm10, %v1026_v53  ;;  %1435 = vrot.lane.b32.xlu1 %v5055_v36, %s7126_s26  ;;  %1306 = vrot.lane.b32.xlu0 %v840_v20, %s4582_s12 }
 0x13d   : > { %v1689_v57 = vpop.permute.xlu1 %1688  ;;  %v1557_v39 = vpop.permute.xlu0 %1556 }
 0x13e   : > { %1779 = vst.msk [vmem:[#allocation3 + $0x30] sm:$0xff] %vm1772_vm15, %v1689_v57 }
 0x13f   : > { %1646 = vst.msk [vmem:[#allocation3 + $0x38] sm:$0xff] %vm1638_vm14, %v1557_v39  ;;  %1039 = vrot.lane.b32.xlu1 %v5055_v36, %s7127_s21  ;;  %910 = vrot.lane.b32.xlu0 %v840_v20, %s4578_s24  ;;  %v635_v36 = vsel %vm585_vm5, %v632_v56, %v634_v63  ;;  %v848_v20 = vsel %vm795_vm4, %v846_v32, %v847_v33  ;;  %v414_v39 = vld [vmem:[%s4695_s22 + $0xe8] sm:$0xff] }
 0x140   : > { %448 = vst.msk [vmem:[#allocation2 + $0x171] sm:$0xff] %vm418_vm6, %v414_v39 }
 0x141   : > { %v1161_v60 = vpop.permute.xlu1 %1160  ;;  %v687_v40 = vpop.permute.xlu0 %686 }
 0x142   : > { %1248 = vst.msk [vmem:[#allocation3 + $0x48] sm:$0xff] %vm1238_vm11, %v1161_v60 }
 0x143   : > { %773 = vst.msk [vmem:[#allocation3 + $0x50] sm:$0xff] %vm762_vm8, %v687_v40  ;;  %1570 = vrot.lane.b32.xlu1 %v633_v59, %s4584_s18  ;;  %1437 = vrot.lane.b32.xlu0 %v5070_v43, %s7126_s26  ;;  %v5402_v40 = vld [vmem:[#allocation2 + $0x168] sm:$0xff] }
 0x144   : > { %535 = vst.msk [vmem:[#allocation3 + $0xf0] sm:$0xff] %vm418_vm6, %v5402_v40 }
 0x145   : > { %v1691_v0 = vpop.permute.xlu1 %1690  ;;  %v1293_v1 = vpop.permute.xlu0 %1292  ;;  %v1811_v3 = vld [vmem:[#allocation3 + $0x30] sm:$0xff] }
 0x146   : > { %1780 = vst.msk [vmem:[#allocation3 + $0x38] sm:$0xff] %vm1772_vm15, %v1691_v0  ;;  %4387 = vmatprep.mubr.msk.f32.mxu0 %vm1848_vm0, %v1811_v3 }
 0x147   : > { %1381 = vst.msk [vmem:[#allocation3 + $0x40] sm:$0xff] %vm1372_vm12, %v1293_v1  ;;  %1174 = vrot.lane.b32.xlu1 %v633_v59, %s4581_s10  ;;  %1041 = vrot.lane.b32.xlu0 %v5070_v43, %s7127_s21  ;;  %v845_v43 = vsel %vm795_vm4, %v842_v62, %v844_v8  ;;  %v5416_v0 = vld [vmem:[#allocation2 + $0x170] sm:$0xff]  ;;  %v643_v1 = vsel %vm585_vm5, %v641_v2, %v642_v61 }
 0x148   : > { %536 = vst.msk [vmem:[#allocation3 + $0xf8] sm:$0xff] %vm418_vm6, %v5416_v0 }
 0x149   : > { %v897_v4 = vpop.permute.xlu1 %896  ;;  %v689_v6 = vpop.permute.xlu0 %688 }
 0x14a   : > { %983 = vst.msk [vmem:[#allocation3 + $0x50] sm:$0xff] %vm972_vm9, %v897_v4  ;;  %v851_v4 = vrot.slane %v5170_v44, 2 }
 0x14b   : > { %774 = vst.msk [vmem:[#allocation3 + $0x58] sm:$0xff] %vm762_vm8, %v689_v6  ;;  %1704 = vrot.lane.b32.xlu1 %v843_v5, %s4585_s13  ;;  %1572 = vrot.lane.b32.xlu0 %v635_v36, %s4584_s18  ;;  %v852_v6 = vrot.slane %v5184_v51, 2 }
 0x14d   : > { %v1424_v9 = vpop.permute.xlu1 %1423  ;;  %v1295_v10 = vpop.permute.xlu0 %1294  ;;  %v1812_v11 = vld [vmem:[#allocation3 + $0x38] sm:$0xff] }
 0x14e   : > { %1512 = vst.msk [vmem:[#allocation3 + $0x40] sm:$0xff] %vm1503_vm13, %v1424_v9  ;;  %4388 = vmatmul.mubr.msk.f32.gmra.mxu0 %vm1848_vm0, %v1812_v11 }
 0x14f   : > { %1382 = vst.msk [vmem:[#allocation3 + $0x48] sm:$0xff] %vm1372_vm12, %v1295_v10  ;;  %1176 = vrot.lane.b32.xlu1 %v635_v36, %s4581_s10  ;;  %702 = vrot.lane.b32.xlu0 %v633_v59, %s4579_s25 }
 0x151   : > { %v1028_v13 = vpop.permute.xlu1 %1027  ;;  %v899_v14 = vpop.permute.xlu0 %898 }
 0x152   : > { %1114 = vst.msk [vmem:[#allocation3 + $0x50] sm:$0xff] %vm1103_vm10, %v1028_v13 }
 0x153   : > { %984 = vst.msk [vmem:[#allocation3 + $0x58] sm:$0xff] %vm972_vm9, %v899_v14  ;;  %1706 = vrot.lane.b32.xlu1 %v845_v43, %s4585_s13  ;;  %1308 = vrot.lane.b32.xlu0 %v843_v5, %s4582_s12 }
 0x155   : > { %v1559_v18 = vpop.permute.xlu1 %1558  ;;  %v1426_v19 = vpop.permute.xlu0 %1425 }
 0x156   : > { %1647 = vst.msk [vmem:[#allocation3 + $0x40] sm:$0xff] %vm1638_vm14, %v1559_v18 }
 0x157   : > { %1513 = vst.msk [vmem:[#allocation3 + $0x48] sm:$0xff] %vm1503_vm13, %v1426_v19  ;;  %912 = vrot.lane.b32.xlu1 %v843_v5, %s4578_s24  ;;  %704 = vrot.lane.b32.xlu0 %v635_v36, %s4579_s25  ;;  %v486_v36 = vld [vmem:[#allocation2 + $0x118] sm:$0x3] }
 0x158   : > { %v644_v8 = vrot.slane %v486_v36, 1  ;;  %v854_v16 = vrot.slane %v486_v36, 2 }
 0x159   : > { %v1163_v23 = vpop.permute.xlu1 %1162  ;;  %v1030_v24 = vpop.permute.xlu0 %1029 }
 0x15a   : > { %1249 = vst.msk [vmem:[#allocation3 + $0x50] sm:$0xff] %vm1238_vm11, %v1163_v23 }
 0x15b   : > { %1115 = vst.msk [vmem:[#allocation3 + $0x58] sm:$0xff] %vm1103_vm10, %v1030_v24  ;;  %1439 = vrot.lane.b32.xlu1 %v5112_v7, %s7126_s26  ;;  %1310 = vrot.lane.b32.xlu0 %v845_v43, %s4582_s12 }
 0x15d   : > { %v1693_v27 = vpop.permute.xlu1 %1692  ;;  %v1561_v28 = vpop.permute.xlu0 %1560 }
 0x15e   : > { %1781 = vst.msk [vmem:[#allocation3 + $0x40] sm:$0xff] %vm1772_vm15, %v1693_v27 }
 0x15f   : > { %1648 = vst.msk [vmem:[#allocation3 + $0x48] sm:$0xff] %vm1638_vm14, %v1561_v28  ;;  %1043 = vrot.lane.b32.xlu1 %v5112_v7, %s7127_s21  ;;  %914 = vrot.lane.b32.xlu0 %v845_v43, %s4578_s24  ;;  %v640_v7 = vsel %vm585_vm5, %v637_v26, %v639_v34  ;;  %v853_v43 = vsel %vm795_vm4, %v851_v4, %v852_v6  ;;  %v416_v28 = vld [vmem:[%s4695_s22 + $0xf8] sm:$0xff]  ;;  %s4178_s22 = sshll.u32 %s4662_s9, 4 }
 0x160   : > { %450 = vst.msk [vmem:[#allocation2 + $0x189] sm:$0xff] %vm418_vm6, %v416_v28  ;;  %vm2749_vm6 = vcmask 654848  }
 0x161   : > { %v1165_v31 = vpop.permute.xlu1 %1164  ;;  %v691_v50 = vpop.permute.xlu0 %690 }
 0x162   : > { %1250 = vst.msk [vmem:[#allocation3 + $0x58] sm:$0xff] %vm1238_vm11, %v1165_v31 }
 0x163   : > { %775 = vst.msk [vmem:[#allocation3 + $0x60] sm:$0xff] %vm762_vm8, %v691_v50  ;;  %1574 = vrot.lane.b32.xlu1 %v638_v30, %s4584_s18  ;;  %1441 = vrot.lane.b32.xlu0 %v5126_v12, %s7126_s26  ;;  %v646_v50 = vrot.slane %v5228_v15, 1 }
 0x165   : > { %v1695_v35 = vpop.permute.xlu1 %1694  ;;  %v1297_v37 = vpop.permute.xlu0 %1296  ;;  %v1813_v38 = vld [vmem:[#allocation3 + $0x40] sm:$0xff]  ;;  %v648_v34 = vsel %vm585_vm5, %v646_v50, %v647_v17 }
 0x166   : > { %1782 = vst.msk [vmem:[#allocation3 + $0x48] sm:$0xff] %vm1772_vm15, %v1695_v35  ;;  %4390 = vmatprep.mubr.msk.f32.mxu0 %vm1848_vm0, %v1813_v38  ;;  %v489_v38 = vld [vmem:[#allocation2 + $0x130] sm:$0x3] }
 0x167   : > { %1383 = vst.msk [vmem:[#allocation3 + $0x50] sm:$0xff] %vm1372_vm12, %v1297_v37  ;;  %1178 = vrot.lane.b32.xlu1 %v638_v30, %s4581_s10  ;;  %1045 = vrot.lane.b32.xlu0 %v5126_v12, %s7127_s21  ;;  %v850_v12 = vsel %vm795_vm4, %v847_v33, %v849_v45 }
 0x169   : > { %v901_v41 = vpop.permute.xlu1 %900  ;;  %v693_v42 = vpop.permute.xlu0 %692 }
 0x16a   : > { %985 = vst.msk [vmem:[#allocation3 + $0x60] sm:$0xff] %vm972_vm9, %v901_v41  ;;  %v649_v41 = vrot.slane %v489_v38, 1 }
 0x16b   : > { %776 = vst.msk [vmem:[#allocation3 + $0x68] sm:$0xff] %vm762_vm8, %v693_v42  ;;  %1708 = vrot.lane.b32.xlu1 %v848_v20, %s4585_s13  ;;  %1576 = vrot.lane.b32.xlu0 %v640_v7, %s4584_s18 }
 0x16d   : > { %v1428_v46 = vpop.permute.xlu1 %1427  ;;  %v1299_v48 = vpop.permute.xlu0 %1298  ;;  %v1814_v49 = vld [vmem:[#allocation3 + $0x48] sm:$0xff] }
 0x16e   : > { %1514 = vst.msk [vmem:[#allocation3 + $0x50] sm:$0xff] %vm1503_vm13, %v1428_v46  ;;  %4391 = vmatmul.mubr.msk.f32.gmra.mxu0 %vm1848_vm0, %v1814_v49 }
 0x16f   : > { %1384 = vst.msk [vmem:[#allocation3 + $0x58] sm:$0xff] %vm1372_vm12, %v1299_v48  ;;  %1180 = vrot.lane.b32.xlu1 %v640_v7, %s4581_s10  ;;  %706 = vrot.lane.b32.xlu0 %v638_v30, %s4579_s25 }
 0x171   : > { %v1032_v52 = vpop.permute.xlu1 %1031  ;;  %v903_v53 = vpop.permute.xlu0 %902 }
 0x172   : > { %1116 = vst.msk [vmem:[#allocation3 + $0x60] sm:$0xff] %vm1103_vm10, %v1032_v52  ;;  %v859_v52 = vrot.slane %v489_v38, 2  ;;  %v867_v38 = vrot.slane %v5358_v29, 2 }
 0x173   : > { %986 = vst.msk [vmem:[#allocation3 + $0x68] sm:$0xff] %vm972_vm9, %v903_v53  ;;  %1710 = vrot.lane.b32.xlu1 %v850_v12, %s4585_s13  ;;  %1312 = vrot.lane.b32.xlu0 %v848_v20, %s4582_s12 }
 0x175   : > { %v1563_v56 = vpop.permute.xlu1 %1562  ;;  %v1430_v57 = vpop.permute.xlu0 %1429 }
 0x176   : > { %1649 = vst.msk [vmem:[#allocation3 + $0x50] sm:$0xff] %vm1638_vm14, %v1563_v56 }
 0x177   : > { %1515 = vst.msk [vmem:[#allocation3 + $0x58] sm:$0xff] %vm1503_vm13, %v1430_v57  ;;  %916 = vrot.lane.b32.xlu1 %v848_v20, %s4578_s24  ;;  %708 = vrot.lane.b32.xlu0 %v640_v7, %s4579_s25  ;;  %v856_v20 = vrot.slane %v5228_v15, 2  ;;  %v857_v7 = vrot.slane %v5242_v22, 2 }
 0x179   : > { %v1167_v59 = vpop.permute.xlu1 %1166  ;;  %v1034_v60 = vpop.permute.xlu0 %1033  ;;  %v858_v48 = vsel %vm795_vm4, %v856_v20, %v857_v7 }
 0x17a   : > { %1251 = vst.msk [vmem:[#allocation3 + $0x60] sm:$0xff] %vm1238_vm11, %v1167_v59 }
 0x17b   : > { %1117 = vst.msk [vmem:[#allocation3 + $0x68] sm:$0xff] %vm1103_vm10, %v1034_v60  ;;  %1443 = vrot.lane.b32.xlu1 %v5170_v44, %s7126_s26  ;;  %1314 = vrot.lane.b32.xlu0 %v850_v12, %s4582_s12 }
 0x17d   : > { %v1697_v62 = vpop.permute.xlu1 %1696  ;;  %v1565_v63 = vpop.permute.xlu0 %1564 }
 0x17e   : > { %1783 = vst.msk [vmem:[#allocation3 + $0x50] sm:$0xff] %vm1772_vm15, %v1697_v62  ;;  %v651_v62 = vrot.slane %v5286_v54, 1 }
 0x17f   : > { %1650 = vst.msk [vmem:[#allocation3 + $0x58] sm:$0xff] %vm1638_vm14, %v1565_v63  ;;  %1047 = vrot.lane.b32.xlu1 %v5170_v44, %s7127_s21  ;;  %918 = vrot.lane.b32.xlu0 %v850_v12, %s4578_s24  ;;  %v645_v44 = vsel %vm585_vm5, %v642_v61, %v644_v8  ;;  %v652_v63 = vrot.slane %v5300_v58, 1  ;;  %v861_v8 = vrot.slane %v5286_v54, 2 }
 0x181   : > { %v1169_v3 = vpop.permute.xlu1 %1168  ;;  %v695_v5 = vpop.permute.xlu0 %694 }
 0x182   : > { %1252 = vst.msk [vmem:[#allocation3 + $0x68] sm:$0xff] %vm1238_vm11, %v1169_v3 }
 0x183   : > { %777 = vst.msk [vmem:[#allocation3 + $0x70] sm:$0xff] %vm762_vm8, %v695_v5  ;;  %1578 = vrot.lane.b32.xlu1 %v643_v1, %s4584_s18  ;;  %1445 = vrot.lane.b32.xlu0 %v5184_v51, %s7126_s26  ;;  %v653_v5 = vsel %vm585_vm5, %v651_v62, %v652_v63 }
 0x185   : > { %v1699_v9 = vpop.permute.xlu1 %1698  ;;  %v1301_v10 = vpop.permute.xlu0 %1300  ;;  %v1815_v11 = vld [vmem:[#allocation3 + $0x50] sm:$0xff] }
 0x186   : > { %1784 = vst.msk [vmem:[#allocation3 + $0x58] sm:$0xff] %vm1772_vm15, %v1699_v9  ;;  %4393 = vmatprep.mubr.msk.f32.mxu0 %vm1848_vm0, %v1815_v11  ;;  %v862_v9 = vrot.slane %v5300_v58, 2 }
 0x187   : > { %1385 = vst.msk [vmem:[#allocation3 + $0x60] sm:$0xff] %vm1372_vm12, %v1301_v10  ;;  %1182 = vrot.lane.b32.xlu1 %v643_v1, %s4581_s10  ;;  %1049 = vrot.lane.b32.xlu0 %v5184_v51, %s7127_s21  ;;  %v855_v51 = vsel %vm795_vm4, %v852_v6, %v854_v16  ;;  %v492_v6 = vld [vmem:[#allocation2 + $0x148] sm:$0x3] }
 0x188   : > { %v654_v10 = vrot.slane %v492_v6, 1 }
 0x189   : > { %v905_v13 = vpop.permute.xlu1 %904  ;;  %v697_v14 = vpop.permute.xlu0 %696 }
 0x18a   : > { %987 = vst.msk [vmem:[#allocation3 + $0x70] sm:$0xff] %vm972_vm9, %v905_v13  ;;  %v863_v13 = vsel %vm795_vm4, %v861_v8, %v862_v9 }
 0x18b   : > { %778 = vst.msk [vmem:[#allocation3 + $0x78] sm:$0xff] %vm762_vm8, %v697_v14  ;;  %1712 = vrot.lane.b32.xlu1 %v853_v43, %s4585_s13  ;;  %1580 = vrot.lane.b32.xlu0 %v645_v44, %s4584_s18 }
 0x18d   : > { %v1432_v18 = vpop.permute.xlu1 %1431  ;;  %v1303_v19 = vpop.permute.xlu0 %1302  ;;  %v1816_v21 = vld [vmem:[#allocation3 + $0x58] sm:$0xff] }
 0x18e   : > { %1516 = vst.msk [vmem:[#allocation3 + $0x60] sm:$0xff] %vm1503_vm13, %v1432_v18  ;;  %4394 = vmatmul.mubr.msk.f32.gmra.mxu0 %vm1848_vm0, %v1816_v21  ;;  %v864_v18 = vrot.slane %v492_v6, 2 }
 0x18f   : > { %1386 = vst.msk [vmem:[#allocation3 + $0x68] sm:$0xff] %vm1372_vm12, %v1303_v19  ;;  %1184 = vrot.lane.b32.xlu1 %v645_v44, %s4581_s10  ;;  %710 = vrot.lane.b32.xlu0 %v643_v1, %s4579_s25 }
 0x191   : > { %v1036_v23 = vpop.permute.xlu1 %1035  ;;  %v907_v24 = vpop.permute.xlu0 %906 }
 0x192   : > { %1118 = vst.msk [vmem:[#allocation3 + $0x70] sm:$0xff] %vm1103_vm10, %v1036_v23 }
 0x193   : > { %988 = vst.msk [vmem:[#allocation3 + $0x78] sm:$0xff] %vm972_vm9, %v907_v24  ;;  %1714 = vrot.lane.b32.xlu1 %v855_v51, %s4585_s13  ;;  %1316 = vrot.lane.b32.xlu0 %v853_v43, %s4582_s12 }
 0x195   : > { %v1567_v26 = vpop.permute.xlu1 %1566  ;;  %v1434_v27 = vpop.permute.xlu0 %1433 }
 0x196   : > { %1651 = vst.msk [vmem:[#allocation3 + $0x60] sm:$0xff] %vm1638_vm14, %v1567_v26 }
 0x197   : > { %1517 = vst.msk [vmem:[#allocation3 + $0x68] sm:$0xff] %vm1503_vm13, %v1434_v27  ;;  %920 = vrot.lane.b32.xlu1 %v853_v43, %s4578_s24  ;;  %712 = vrot.lane.b32.xlu0 %v645_v44, %s4579_s25 }
 0x199   : > { %v1171_v30 = vpop.permute.xlu1 %1170  ;;  %v1038_v31 = vpop.permute.xlu0 %1037 }
 0x19a   : > { %1253 = vst.msk [vmem:[#allocation3 + $0x70] sm:$0xff] %vm1238_vm11, %v1171_v30  ;;  %v656_v30 = vrot.slane %v5344_v25, 1 }
 0x19b   : > { %1119 = vst.msk [vmem:[#allocation3 + $0x78] sm:$0xff] %vm1103_vm10, %v1038_v31  ;;  %1447 = vrot.lane.b32.xlu1 %v5228_v15, %s7126_s26  ;;  %1318 = vrot.lane.b32.xlu0 %v855_v51, %s4582_s12  ;;  %v657_v31 = vrot.slane %v5358_v29, 1 }
 0x19d   : > { %v1701_v32 = vpop.permute.xlu1 %1700  ;;  %v1569_v33 = vpop.permute.xlu0 %1568 }
 0x19e   : > { %1785 = vst.msk [vmem:[#allocation3 + $0x60] sm:$0xff] %vm1772_vm15, %v1701_v32  ;;  %v658_v32 = vsel %vm585_vm5, %v656_v30, %v657_v31 }
 0x19f   : > { %1652 = vst.msk [vmem:[#allocation3 + $0x68] sm:$0xff] %vm1638_vm14, %v1569_v33  ;;  %1051 = vrot.lane.b32.xlu1 %v5228_v15, %s7127_s21  ;;  %922 = vrot.lane.b32.xlu0 %v855_v51, %s4578_s24  ;;  %v650_v15 = vsel %vm585_vm5, %v647_v17, %v649_v41 }
 0x1a1   : > { %v1173_v35 = vpop.permute.xlu1 %1172  ;;  %v699_v37 = vpop.permute.xlu0 %698 }
 0x1a2   : > { %1254 = vst.msk [vmem:[#allocation3 + $0x78] sm:$0xff] %vm1238_vm11, %v1173_v35  ;;  %v495_v35 = vld [vmem:[#allocation2 + $0x160] sm:$0x3] }
 0x1a3   : > { %779 = vst.msk [vmem:[#allocation3 + $0x80] sm:$0xff] %vm762_vm8, %v699_v37  ;;  %1582 = vrot.lane.b32.xlu1 %v648_v34, %s4584_s18  ;;  %1449 = vrot.lane.b32.xlu0 %v5242_v22, %s7126_s26  ;;  %v866_v37 = vrot.slane %v5344_v25, 2  ;;  %v659_v20 = vrot.slane %v495_v35, 1 }
 0x1a5   : > { %v1703_v42 = vpop.permute.xlu1 %1702  ;;  %v1305_v45 = vpop.permute.xlu0 %1304  ;;  %v1817_v46 = vld [vmem:[#allocation3 + $0x60] sm:$0xff] }
 0x1a6   : > { %1786 = vst.msk [vmem:[#allocation3 + $0x68] sm:$0xff] %vm1772_vm15, %v1703_v42  ;;  %4396 = vmatprep.mubr.msk.f32.mxu0 %vm1848_vm0, %v1817_v46 }
 0x1a7   : > { %1387 = vst.msk [vmem:[#allocation3 + $0x70] sm:$0xff] %vm1372_vm12, %v1305_v45  ;;  %1186 = vrot.lane.b32.xlu1 %v648_v34, %s4581_s10  ;;  %1053 = vrot.lane.b32.xlu0 %v5242_v22, %s7127_s21  ;;  %v860_v22 = vsel %vm795_vm4, %v857_v7, %v859_v52  ;;  %v868_v45 = vsel %vm795_vm4, %v866_v37, %v867_v38 }
 0x1a9   : > { %v909_v49 = vpop.permute.xlu1 %908  ;;  %v701_v12 = vpop.permute.xlu0 %700 }
 0x1aa   : > { %989 = vst.msk [vmem:[#allocation3 + $0x80] sm:$0xff] %vm972_vm9, %v909_v49 }
 0x1ab   : > { %780 = vst.msk [vmem:[#allocation3 + $0x88] sm:$0xff] %vm762_vm8, %v701_v12  ;;  %1716 = vrot.lane.b32.xlu1 %v858_v48, %s4585_s13  ;;  %1584 = vrot.lane.b32.xlu0 %v650_v15, %s4584_s18 }
 0x1ad   : > { %v1436_v53 = vpop.permute.xlu1 %1435  ;;  %v1307_v55 = vpop.permute.xlu0 %1306  ;;  %v1818_v56 = vld [vmem:[#allocation3 + $0x68] sm:$0xff] }
 0x1ae   : > { %1518 = vst.msk [vmem:[#allocation3 + $0x70] sm:$0xff] %vm1503_vm13, %v1436_v53  ;;  %4397 = vmatmul.mubr.msk.f32.gmra.mxu0 %vm1848_vm0, %v1818_v56 }
 0x1af   : > { %1388 = vst.msk [vmem:[#allocation3 + $0x78] sm:$0xff] %vm1372_vm12, %v1307_v55  ;;  %1188 = vrot.lane.b32.xlu1 %v650_v15, %s4581_s10  ;;  %714 = vrot.lane.b32.xlu0 %v648_v34, %s4579_s25 }
 0x1b1   : > { %v1040_v57 = vpop.permute.xlu1 %1039  ;;  %v911_v39 = vpop.permute.xlu0 %910 }
 0x1b2   : > { %1120 = vst.msk [vmem:[#allocation3 + $0x80] sm:$0xff] %vm1103_vm10, %v1040_v57 }
 0x1b3   : > { %990 = vst.msk [vmem:[#allocation3 + $0x88] sm:$0xff] %vm972_vm9, %v911_v39  ;;  %1718 = vrot.lane.b32.xlu1 %v860_v22, %s4585_s13  ;;  %1320 = vrot.lane.b32.xlu0 %v858_v48, %s4582_s12 }
 0x1b5   : > { %v1571_v59 = vpop.permute.xlu1 %1570  ;;  %v1438_v60 = vpop.permute.xlu0 %1437 }
 0x1b6   : > { %1653 = vst.msk [vmem:[#allocation3 + $0x70] sm:$0xff] %vm1638_vm14, %v1571_v59  ;;  %v661_v59 = vrot.slane %v5402_v40, 1 }
 0x1b7   : > { %1519 = vst.msk [vmem:[#allocation3 + $0x78] sm:$0xff] %vm1503_vm13, %v1438_v60  ;;  %924 = vrot.lane.b32.xlu1 %v858_v48, %s4578_s24  ;;  %716 = vrot.lane.b32.xlu0 %v650_v15, %s4579_s25  ;;  %v869_v15 = vrot.slane %v495_v35, 2  ;;  %v662_v60 = vrot.slane %v5416_v0, 1 }
 0x1b9   : > { %v1175_v2 = vpop.permute.xlu1 %1174  ;;  %v1042_v61 = vpop.permute.xlu0 %1041  ;;  %v663_v62 = vsel %vm585_vm5, %v661_v59, %v662_v60 }
 0x1ba   : > { %1255 = vst.msk [vmem:[#allocation3 + $0x80] sm:$0xff] %vm1238_vm11, %v1175_v2 }
 0x1bb   : > { %1121 = vst.msk [vmem:[#allocation3 + $0x88] sm:$0xff] %vm1103_vm10, %v1042_v61  ;;  %1451 = vrot.lane.b32.xlu1 %v5286_v54, %s7126_s26  ;;  %1322 = vrot.lane.b32.xlu0 %v860_v22, %s4582_s12 }
 0x1bd   : > { %v1705_v1 = vpop.permute.xlu1 %1704  ;;  %v1573_v3 = vpop.permute.xlu0 %1572 }
 0x1be   : > { %1787 = vst.msk [vmem:[#allocation3 + $0x70] sm:$0xff] %vm1772_vm15, %v1705_v1 }
 0x1bf   : > { %1654 = vst.msk [vmem:[#allocation3 + $0x78] sm:$0xff] %vm1638_vm14, %v1573_v3  ;;  %1055 = vrot.lane.b32.xlu1 %v5286_v54, %s7127_s21  ;;  %926 = vrot.lane.b32.xlu0 %v860_v22, %s4578_s24  ;;  %v655_v54 = vsel %vm585_vm5, %v652_v63, %v654_v10  ;;  %v498_v3 = vld [vmem:[#allocation2 + $0x178] sm:$0x3] }
 0x1c1   : > { %v1177_v36 = vpop.permute.xlu1 %1176  ;;  %v703_v4 = vpop.permute.xlu0 %702 }
 0x1c2   : > { %1256 = vst.msk [vmem:[#allocation3 + $0x88] sm:$0xff] %vm1238_vm11, %v1177_v36  ;;  %v872_v36 = vrot.slane %v5416_v0, 2 }
 0x1c3   : > { %781 = vst.msk [vmem:[#allocation3 + $0x90] sm:$0xff] %vm762_vm8, %v703_v4  ;;  %1586 = vrot.lane.b32.xlu1 %v653_v5, %s4584_s18  ;;  %1453 = vrot.lane.b32.xlu0 %v5300_v58, %s7126_s26  ;;  %v664_v4 = vrot.slane %v498_v3, 1 }
 0x1c5   : > { %v1707_v11 = vpop.permute.xlu1 %1706  ;;  %v1309_v43 = vpop.permute.xlu0 %1308  ;;  %v1819_v44 = vld [vmem:[#allocation3 + $0x70] sm:$0xff] }
 0x1c6   : > { %1788 = vst.msk [vmem:[#allocation3 + $0x78] sm:$0xff] %vm1772_vm15, %v1707_v11  ;;  %4399 = vmatprep.mubr.msk.f32.mxu0 %vm1848_vm0, %v1819_v44  ;;  %v874_v44 = vrot.slane %v498_v3, 2 }
 0x1c7   : > { %1389 = vst.msk [vmem:[#allocation3 + $0x80] sm:$0xff] %vm1372_vm12, %v1309_v43  ;;  %1190 = vrot.lane.b32.xlu1 %v653_v5, %s4581_s10  ;;  %1057 = vrot.lane.b32.xlu0 %v5300_v58, %s7127_s21  ;;  %v865_v58 = vsel %vm795_vm4, %v862_v9, %v864_v18 }
 0x1c9   : > { %v913_v14 = vpop.permute.xlu1 %912  ;;  %v705_v16 = vpop.permute.xlu0 %704 }
 0x1ca   : > { %991 = vst.msk [vmem:[#allocation3 + $0x90] sm:$0xff] %vm972_vm9, %v913_v14 }
 0x1cb   : > { %782 = vst.msk [vmem:[#allocation3 + $0x98] sm:$0xff] %vm762_vm8, %v705_v16  ;;  %1720 = vrot.lane.b32.xlu1 %v863_v13, %s4585_s13  ;;  %1588 = vrot.lane.b32.xlu0 %v655_v54, %s4584_s18 }
 0x1cd   : > { %v1440_v19 = vpop.permute.xlu1 %1439  ;;  %v1311_v21 = vpop.permute.xlu0 %1310  ;;  %v1820_v51 = vld [vmem:[#allocation3 + $0x78] sm:$0xff] }
 0x1ce   : > { %1520 = vst.msk [vmem:[#allocation3 + $0x80] sm:$0xff] %vm1503_vm13, %v1440_v19  ;;  %4400 = vmatmul.mubr.msk.f32.gmra.mxu0 %vm1848_vm0, %v1820_v51  ;;  %v4586_v19 = vmov 0.0  }
 0x1cf   : > { %1390 = vst.msk [vmem:[#allocation3 + $0x88] sm:$0xff] %vm1372_vm12, %v1311_v21  ;;  %1192 = vrot.lane.b32.xlu1 %v655_v54, %s4581_s10  ;;  %718 = vrot.lane.b32.xlu0 %v653_v5, %s4579_s25  ;;  %v871_v5 = vrot.slane %v5402_v40, 2 }
 0x1d0   : > { %2270 = vmatprep.subr.mxu1 %v4586_v19  ;;  %2949 = vmatprep.subr.mxu0 %v4586_v19 }
 0x1d1   : > { %v1044_v23 = vpop.permute.xlu1 %1043  ;;  %v915_v24 = vpop.permute.xlu0 %914  ;;  %v873_v10 = vsel %vm795_vm4, %v871_v5, %v872_v36 }
 0x1d2   : > { %1122 = vst.msk [vmem:[#allocation3 + $0x90] sm:$0xff] %vm1103_vm10, %v1044_v23 }
 0x1d3   : > { %992 = vst.msk [vmem:[#allocation3 + $0x98] sm:$0xff] %vm972_vm9, %v915_v24  ;;  %1722 = vrot.lane.b32.xlu1 %v865_v58, %s4585_s13  ;;  %1324 = vrot.lane.b32.xlu0 %v863_v13, %s4582_s12 }
 0x1d5   : > { %v1575_v47 = vpop.permute.xlu1 %1574  ;;  %v1442_v26 = vpop.permute.xlu0 %1441 }
 0x1d6   : > { %1655 = vst.msk [vmem:[#allocation3 + $0x80] sm:$0xff] %vm1638_vm14, %v1575_v47  ;;  %v500_v47 = vld [vmem:[#allocation2 + $0x188] sm:$0xff] }
 0x1d7   : > { %1521 = vst.msk [vmem:[#allocation3 + $0x88] sm:$0xff] %vm1503_vm13, %v1442_v26  ;;  %928 = vrot.lane.b32.xlu1 %v863_v13, %s4578_s24  ;;  %720 = vrot.lane.b32.xlu0 %v655_v54, %s4579_s25 }
 0x1d9   : > { %v1179_v27 = vpop.permute.xlu1 %1178  ;;  %v1046_v28 = vpop.permute.xlu0 %1045 }
 0x1da   : > { %1257 = vst.msk [vmem:[#allocation3 + $0x90] sm:$0xff] %vm1238_vm11, %v1179_v27  ;;  %v1138_v27 = vrot.slane %v500_v47, 1 }
 0x1db   : > { %1123 = vst.msk [vmem:[#allocation3 + $0x98] sm:$0xff] %vm1103_vm10, %v1046_v28  ;;  %1455 = vrot.lane.b32.xlu1 %v5344_v25, %s7126_s26  ;;  %1326 = vrot.lane.b32.xlu0 %v865_v58, %s4582_s12 }
 0x1dd   : > { %v1709_v50 = vpop.permute.xlu1 %1708  ;;  %v1577_v17 = vpop.permute.xlu0 %1576 }
 0x1de   : > { %1789 = vst.msk [vmem:[#allocation3 + $0x80] sm:$0xff] %vm1772_vm15, %v1709_v50 }
 0x1df   : > { %1656 = vst.msk [vmem:[#allocation3 + $0x88] sm:$0xff] %vm1638_vm14, %v1577_v17  ;;  %1059 = vrot.lane.b32.xlu1 %v5344_v25, %s7127_s21  ;;  %930 = vrot.lane.b32.xlu0 %v865_v58, %s4578_s24  ;;  %v660_v25 = vsel %vm585_vm5, %v657_v31, %v659_v20  ;;  %v499_v58 = vld [vmem:[#allocation2 + $0x180] sm:$0xff] }
 0x1e0   : > { %v1137_v26 = vrot.slane %v499_v58, 1 }
 0x1e1   : > { %v1181_v33 = vpop.permute.xlu1 %1180  ;;  %v707_v34 = vpop.permute.xlu0 %706 }
 0x1e2   : > { %1258 = vst.msk [vmem:[#allocation3 + $0x98] sm:$0xff] %vm1238_vm11, %v1181_v33  ;;  %v1139_v31 = vsel %vm585_vm5, %v1137_v26, %v1138_v27  ;;  %v1271_v33 = vrot.slane %v499_v58, 2 }
 0x1e3   : > { %783 = vst.msk [vmem:[#allocation3 + $0xa0] sm:$0xff] %vm762_vm8, %v707_v34  ;;  %1590 = vrot.lane.b32.xlu1 %v658_v32, %s4584_s18  ;;  %1457 = vrot.lane.b32.xlu0 %v5358_v29, %s7126_s26  ;;  %v1272_v34 = vrot.slane %v500_v47, 2 }
 0x1e5   : > { %v1711_v7 = vpop.permute.xlu1 %1710  ;;  %v1313_v41 = vpop.permute.xlu0 %1312  ;;  %v1821_v42 = vld [vmem:[#allocation3 + $0x80] sm:$0xff] }
 0x1e6   : > { %1790 = vst.msk [vmem:[#allocation3 + $0x88] sm:$0xff] %vm1772_vm15, %v1711_v7  ;;  %4402 = vmatprep.mubr.msk.f32.mxu0 %vm1848_vm0, %v1821_v42 }
 0x1e7   : > { %1391 = vst.msk [vmem:[#allocation3 + $0x90] sm:$0xff] %vm1372_vm12, %v1313_v41  ;;  %1194 = vrot.lane.b32.xlu1 %v658_v32, %s4581_s10  ;;  %1061 = vrot.lane.b32.xlu0 %v5358_v29, %s7127_s21  ;;  %v870_v29 = vsel %vm795_vm4, %v867_v38, %v869_v15  ;;  %v1273_v41 = vsel %vm795_vm4, %v1271_v33, %v1272_v34 }
 0x1e9   : > { %v917_v46 = vpop.permute.xlu1 %916  ;;  %v709_v48 = vpop.permute.xlu0 %708 }
 0x1ea   : > { %993 = vst.msk [vmem:[#allocation3 + $0xa0] sm:$0xff] %vm972_vm9, %v917_v46 }
 0x1eb   : > { %784 = vst.msk [vmem:[#allocation3 + $0xa8] sm:$0xff] %vm762_vm8, %v709_v48  ;;  %1724 = vrot.lane.b32.xlu1 %v868_v45, %s4585_s13  ;;  %1592 = vrot.lane.b32.xlu0 %v660_v25, %s4584_s18 }
 0x1ed   : > { %v1444_v49 = vpop.permute.xlu1 %1443  ;;  %v1315_v12 = vpop.permute.xlu0 %1314  ;;  %v1822_v52 = vld [vmem:[#allocation3 + $0x88] sm:$0xff] }
 0x1ee   : > { %1522 = vst.msk [vmem:[#allocation3 + $0x90] sm:$0xff] %vm1503_vm13, %v1444_v49  ;;  %4403 = vmatmul.mubr.msk.f32.gmra.mxu0 %vm1848_vm0, %v1822_v52 }
 0x1ef   : > { %1392 = vst.msk [vmem:[#allocation3 + $0x98] sm:$0xff] %vm1372_vm12, %v1315_v12  ;;  %1196 = vrot.lane.b32.xlu1 %v660_v25, %s4581_s10  ;;  %722 = vrot.lane.b32.xlu0 %v658_v32, %s4579_s25  ;;  %v501_v32 = vld [vmem:[#allocation2 + $0x190] sm:$0x3] }
 0x1f0   : > { %v1140_v35 = vrot.slane %v501_v32, 1 }
 0x1f1   : > { %v1048_v53 = vpop.permute.xlu1 %1047  ;;  %v919_v55 = vpop.permute.xlu0 %918 }
 0x1f2   : > { %1124 = vst.msk [vmem:[#allocation3 + $0xa0] sm:$0xff] %vm1103_vm10, %v1048_v53  ;;  %v1141_v7 = vsel %vm585_vm5, %v1138_v27, %v1140_v35  ;;  %v503_v53 = vld [vmem:[#allocation2 + $0x1a0] sm:$0xff]  ;;  %v5714_v27 = vpop.f32.mrf.mxu0 }
 0x1f3   : > { %994 = vst.msk [vmem:[#allocation3 + $0xa8] sm:$0xff] %vm972_vm9, %v919_v55  ;;  %1726 = vrot.lane.b32.xlu1 %v870_v29, %s4585_s13  ;;  %1328 = vrot.lane.b32.xlu0 %v868_v45, %s4582_s12  ;;  %v504_v55 = vld [vmem:[#allocation2 + $0x1a8] sm:$0x3] }
 0x1f5   : > { %v1579_v56 = vpop.permute.xlu1 %1578  ;;  %v1446_v22 = vpop.permute.xlu0 %1445 }
 0x1f6   : > { %1657 = vst.msk [vmem:[#allocation3 + $0x90] sm:$0xff] %vm1638_vm14, %v1579_v56 }
 0x1f7   : > { %1523 = vst.msk [vmem:[#allocation3 + $0x98] sm:$0xff] %vm1503_vm13, %v1446_v22  ;;  %932 = vrot.lane.b32.xlu1 %v868_v45, %s4578_s24  ;;  %724 = vrot.lane.b32.xlu0 %v660_v25, %s4579_s25  ;;  %v1274_v25 = vrot.slane %v501_v32, 2  ;;  %v1538_v22 = vrot.slane %v503_v53, 1 }
 0x1f9   : > { %v1183_v57 = vpop.permute.xlu1 %1182  ;;  %v1050_v39 = vpop.permute.xlu0 %1049  ;;  %v1275_v49 = vsel %vm795_vm4, %v1272_v34, %v1274_v25 }
 0x1fa   : > { %1259 = vst.msk [vmem:[#allocation3 + $0xa0] sm:$0xff] %vm1238_vm11, %v1183_v57  ;;  %v1540_v57 = vrot.slane %v504_v55, 1 }
 0x1fb   : > { %1125 = vst.msk [vmem:[#allocation3 + $0xa8] sm:$0xff] %vm1103_vm10, %v1050_v39  ;;  %1459 = vrot.lane.b32.xlu1 %v5402_v40, %s7126_s26  ;;  %1330 = vrot.lane.b32.xlu0 %v870_v29, %s4582_s12 }
 0x1fd   : > { %v1713_v2 = vpop.permute.xlu1 %1712  ;;  %v1581_v61 = vpop.permute.xlu0 %1580 }
 0x1fe   : > { %1791 = vst.msk [vmem:[#allocation3 + $0x90] sm:$0xff] %vm1772_vm15, %v1713_v2  ;;  %v1672_v2 = vrot.slane %v503_v53, 2 }
 0x1ff   : > { %1658 = vst.msk [vmem:[#allocation3 + $0x98] sm:$0xff] %vm1638_vm14, %v1581_v61  ;;  %1063 = vrot.lane.b32.xlu1 %v5402_v40, %s7127_s21  ;;  %934 = vrot.lane.b32.xlu0 %v870_v29, %s4578_s24  ;;  %v665_v40 = vsel %vm585_vm5, %v662_v60, %v664_v4  ;;  %v502_v29 = vld [vmem:[#allocation2 + $0x198] sm:$0xff] }
 0x200   : > { %v1537_v56 = vrot.slane %v502_v29, 1  ;;  %v1671_v60 = vrot.slane %v502_v29, 2 }
 0x201   : > { %v1185_v63 = vpop.permute.xlu1 %1184  ;;  %v711_v1 = vpop.permute.xlu0 %710 }
 0x202   : > { %1260 = vst.msk [vmem:[#allocation3 + $0xa8] sm:$0xff] %vm1238_vm11, %v1185_v63  ;;  %v1539_v61 = vsel %vm585_vm5, %v1537_v56, %v1538_v22  ;;  %v1674_v63 = vrot.slane %v504_v55, 2  ;;  %v1673_v5 = vsel %vm795_vm4, %v1671_v60, %v1672_v2 }
 0x203   : > { %785 = vst.msk [vmem:[#allocation3 + $0xb0] sm:$0xff] %vm762_vm8, %v711_v1  ;;  %1594 = vrot.lane.b32.xlu1 %v663_v62, %s4584_s18  ;;  %1461 = vrot.lane.b32.xlu0 %v5416_v0, %s7126_s26 }
 0x205   : > { %v1715_v6 = vpop.permute.xlu1 %1714  ;;  %v1317_v8 = vpop.permute.xlu0 %1316  ;;  %v1823_v9 = vld [vmem:[#allocation3 + $0x90] sm:$0xff] }
 0x206   : > { %1792 = vst.msk [vmem:[#allocation3 + $0x98] sm:$0xff] %vm1772_vm15, %v1715_v6  ;;  %4405 = vmatprep.mubr.msk.f32.mxu0 %vm1848_vm0, %v1823_v9 }
 0x207   : > { %1393 = vst.msk [vmem:[#allocation3 + $0xa0] sm:$0xff] %vm1372_vm12, %v1317_v8  ;;  %1198 = vrot.lane.b32.xlu1 %v663_v62, %s4581_s10  ;;  %1065 = vrot.lane.b32.xlu0 %v5416_v0, %s7127_s21  ;;  %v875_v0 = vsel %vm795_vm4, %v872_v36, %v874_v44  ;;  %v1675_v36 = vsel %vm795_vm4, %v1672_v2, %v1674_v63 }
 0x209   : > { %v921_v11 = vpop.permute.xlu1 %920  ;;  %v713_v43 = vpop.permute.xlu0 %712 }
 0x20a   : > { %995 = vst.msk [vmem:[#allocation3 + $0xb0] sm:$0xff] %vm972_vm9, %v921_v11 }
 0x20b   : > { %786 = vst.msk [vmem:[#allocation3 + $0xb8] sm:$0xff] %vm762_vm8, %v713_v43  ;;  %1728 = vrot.lane.b32.xlu1 %v873_v10, %s4585_s13  ;;  %1596 = vrot.lane.b32.xlu0 %v665_v40, %s4584_s18 }
 0x20d   : > { %v1448_v13 = vpop.permute.xlu1 %1447  ;;  %v1319_v54 = vpop.permute.xlu0 %1318  ;;  %v1824_v14 = vld [vmem:[#allocation3 + $0x98] sm:$0xff] }
 0x20e   : > { %1524 = vst.msk [vmem:[#allocation3 + $0xa0] sm:$0xff] %vm1503_vm13, %v1448_v13  ;;  %4406 = vmatmul.mubr.msk.f32.gmra.mxu0 %vm1848_vm0, %v1824_v14 }
 0x20f   : > { %1394 = vst.msk [vmem:[#allocation3 + $0xa8] sm:$0xff] %vm1372_vm12, %v1319_v54  ;;  %1200 = vrot.lane.b32.xlu1 %v665_v40, %s4581_s10  ;;  %726 = vrot.lane.b32.xlu0 %v663_v62, %s4579_s25  ;;  %v1541_v62 = vsel %vm585_vm5, %v1538_v22, %v1540_v57 }
 0x211   : > { %v1052_v16 = vpop.permute.xlu1 %1051  ;;  %v923_v18 = vpop.permute.xlu0 %922 }
 0x212   : > { %1126 = vst.msk [vmem:[#allocation3 + $0xb0] sm:$0xff] %vm1103_vm10, %v1052_v16 }
 0x213   : > { %996 = vst.msk [vmem:[#allocation3 + $0xb8] sm:$0xff] %vm972_vm9, %v923_v18  ;;  %1730 = vrot.lane.b32.xlu1 %v875_v0, %s4585_s13  ;;  %1332 = vrot.lane.b32.xlu0 %v873_v10, %s4582_s12 }
 0x215   : > { %v1583_v21 = vpop.permute.xlu1 %1582  ;;  %v1450_v51 = vpop.permute.xlu0 %1449 }
 0x216   : > { %1659 = vst.msk [vmem:[#allocation3 + $0xa0] sm:$0xff] %vm1638_vm14, %v1583_v21 }
 0x217   : > { %1525 = vst.msk [vmem:[#allocation3 + $0xa8] sm:$0xff] %vm1503_vm13, %v1450_v51  ;;  %728 = vrot.lane.b32.xlu0 %v665_v40, %s4579_s25  ;;  %936 = vrot.lane.b32.xlu1 %v873_v10, %s4578_s24  ;;  %s4593_s25 = smov 112  }
 0x219   : > { %v1187_v23 = vpop.permute.xlu1 %1186  ;;  %v1054_v24 = vpop.permute.xlu0 %1053 }
 0x21a   : > { %1261 = vst.msk [vmem:[#allocation3 + $0xb0] sm:$0xff] %vm1238_vm11, %v1187_v23 }
 0x21b   : > { %1127 = vst.msk [vmem:[#allocation3 + $0xb8] sm:$0xff] %vm1103_vm10, %v1054_v24  ;;  %1334 = vrot.lane.b32.xlu0 %v875_v0, %s4582_s12  ;;  %1463 = vrot.lane.b32.xlu1 %v499_v58, %s7126_s26 }
 0x21d   : > { %v1717_v28 = vpop.permute.xlu1 %1716  ;;  %v1585_v30 = vpop.permute.xlu0 %1584 }
 0x21e   : > { %1793 = vst.msk [vmem:[#allocation3 + $0xa0] sm:$0xff] %vm1772_vm15, %v1717_v28 }
 0x21f   : > { %1660 = vst.msk [vmem:[#allocation3 + $0xa8] sm:$0xff] %vm1638_vm14, %v1585_v30  ;;  %938 = vrot.lane.b32.xlu0 %v875_v0, %s4578_s24  ;;  %1067 = vrot.lane.b32.xlu1 %v499_v58, %s7127_s21  ;;  %s4592_s24 = smov 96  }
 0x221   : > { %v1189_v50 = vpop.permute.xlu1 %1188  ;;  %v715_v17 = vpop.permute.xlu0 %714 }
 0x222   : > { %1262 = vst.msk [vmem:[#allocation3 + $0xb8] sm:$0xff] %vm1238_vm11, %v1189_v50  ;;  %v5719_v50 = vpop.f32.mrf.mxu0 }
 0x223   : > { %787 = vst.msk [vmem:[#allocation3 + $0xc0] sm:$0xff] %vm762_vm8, %v715_v17  ;;  %1465 = vrot.lane.b32.xlu0 %v500_v47, %s7126_s26  ;;  %1598 = vrot.lane.b32.xlu1 %v1139_v31, %s4584_s18 }
 0x224   : > { %v5721_v33 = vpop.f32.mrf.mxu0 }
 0x225   : > { %v1719_v37 = vpop.permute.xlu1 %1718  ;;  %v1321_v38 = vpop.permute.xlu0 %1320  ;;  %v1825_v20 = vld [vmem:[#allocation3 + $0xa0] sm:$0xff] }
 0x226   : > { %1794 = vst.msk [vmem:[#allocation3 + $0xa8] sm:$0xff] %vm1772_vm15, %v1719_v37  ;;  %4408 = vmatprep.mubr.msk.f32.mxu0 %vm1848_vm0, %v1825_v20 }
 0x227   : > { %1395 = vst.msk [vmem:[#allocation3 + $0xb0] sm:$0xff] %vm1372_vm12, %v1321_v38  ;;  %1069 = vrot.lane.b32.xlu0 %v500_v47, %s7127_s21  ;;  %1202 = vrot.lane.b32.xlu1 %v1139_v31, %s4581_s10  ;;  %v5725_v38 = vpop.f32.mrf.mxu0  ;;  %s4588_s21 = smov 32  }
 0x229   : > { %v925_v42 = vpop.permute.xlu1 %924  ;;  %v717_v45 = vpop.permute.xlu0 %716 }
 0x22a   : > { %997 = vst.msk [vmem:[#allocation3 + $0xc0] sm:$0xff] %vm972_vm9, %v925_v42  ;;  %v5730_v20 = vpop.f32.mrf.mxu0 }
 0x22b   : > { %788 = vst.msk [vmem:[#allocation3 + $0xc8] sm:$0xff] %vm762_vm8, %v717_v45  ;;  %1600 = vrot.lane.b32.xlu0 %v1141_v7, %s4584_s18  ;;  %1732 = vrot.lane.b32.xlu1 %v1273_v41, %s4585_s13 }
 0x22c   : > { %v5734_v42 = vpop.f32.mrf.mxu0 }
 0x22d   : > { %v1452_v46 = vpop.permute.xlu1 %1451  ;;  %v1323_v48 = vpop.permute.xlu0 %1322  ;;  %v1826_v15 = vld [vmem:[#allocation3 + $0xa8] sm:$0xff] }
 0x22e   : > { %1526 = vst.msk [vmem:[#allocation3 + $0xb0] sm:$0xff] %vm1503_vm13, %v1452_v46  ;;  %4409 = vmatmul.mubr.msk.f32.gmra.mxu0 %vm1848_vm0, %v1826_v15  ;;  %v5736_v46 = vpop.f32.mrf.mxu0 }
 0x22f   : > { %1396 = vst.msk [vmem:[#allocation3 + $0xb8] sm:$0xff] %vm1372_vm12, %v1323_v48  ;;  %1204 = vrot.lane.b32.xlu0 %v1141_v7, %s4581_s10  ;;  %1336 = vrot.lane.b32.xlu1 %v1273_v41, %s4582_s12 }
 0x231   : > { %v1056_v12 = vpop.permute.xlu1 %1055  ;;  %v927_v52 = vpop.permute.xlu0 %926 }
 0x232   : > { %1128 = vst.msk [vmem:[#allocation3 + $0xc0] sm:$0xff] %vm1103_vm10, %v1056_v12 }
 0x233   : > { %998 = vst.msk [vmem:[#allocation3 + $0xc8] sm:$0xff] %vm972_vm9, %v927_v52  ;;  %1734 = vrot.lane.b32.xlu0 %v1275_v49, %s4585_s13  ;;  %1338 = vrot.lane.b32.xlu1 %v1275_v49, %s4582_s12  ;;  %v5740_v49 = vpop.f32.mrf.mxu0  ;;  %s4591_s12 = smov 80  }
 0x235   : > { %v1587_v39 = vpop.permute.xlu1 %1586  ;;  %v1454_v59 = vpop.permute.xlu0 %1453 }
 0x236   : > { %1661 = vst.msk [vmem:[#allocation3 + $0xb0] sm:$0xff] %vm1638_vm14, %v1587_v39  ;;  %v4392_v12 = vpop.f32.mrf.mxu0 }
 0x237   : > { %1527 = vst.msk [vmem:[#allocation3 + $0xb8] sm:$0xff] %vm1503_vm13, %v1454_v59  ;;  %1467 = vrot.lane.b32.xlu0 %v502_v29, %s7126_s26  ;;  %1469 = vrot.lane.b32.xlu1 %v503_v53, %s7126_s26  ;;  %s4587_s26 = smov 16  }
 0x238   : > { %v2055_v53 = vpop.f32.mrf.mxu0 }
 0x239   : > { %v1191_v1 = vpop.permute.xlu1 %1190  ;;  %v1058_v3 = vpop.permute.xlu0 %1057 }
 0x23a   : > { %1263 = vst.msk [vmem:[#allocation3 + $0xc0] sm:$0xff] %vm1238_vm11, %v1191_v1 }
 0x23b   : > { %1129 = vst.msk [vmem:[#allocation3 + $0xc8] sm:$0xff] %vm1103_vm10, %v1058_v3  ;;  %1602 = vrot.lane.b32.xlu0 %v1539_v61, %s4584_s18  ;;  %1604 = vrot.lane.b32.xlu1 %v1541_v62, %s4584_s18  ;;  %s4589_s18 = smov 48  }
 0x23d   : > { %v1721_v4 = vpop.permute.xlu1 %1720  ;;  %v1589_v6 = vpop.permute.xlu0 %1588 }
 0x23e   : > { %1795 = vst.msk [vmem:[#allocation3 + $0xb0] sm:$0xff] %vm1772_vm15, %v1721_v4 }
 0x23f   : > { %1662 = vst.msk [vmem:[#allocation3 + $0xb8] sm:$0xff] %vm1638_vm14, %v1589_v6  ;;  %1736 = vrot.lane.b32.xlu0 %v1673_v5, %s4585_s13  ;;  %1738 = vrot.lane.b32.xlu1 %v1675_v36, %s4585_s13  ;;  %v5756_v36 = vld [vmem:[%s7112_s3] ss:$0 sm:$0xff]  ;;  %s4595_s13 = smov [#allocation7]  }
 0x241   : > { %v1193_v8 = vpop.permute.xlu1 %1192  ;;  %v719_v9 = vpop.permute.xlu0 %718 }
 0x242   : > { %1264 = vst.msk [vmem:[#allocation3 + $0xc8] sm:$0xff] %vm1238_vm11, %v1193_v8 }
 0x243   : > { %789 = vst.msk [vmem:[#allocation3 + $0xd0] sm:$0xff] %vm762_vm8, %v719_v9 }
 0x245   : > { %v1723_v10 = vpop.permute.xlu1 %1722  ;;  %v1325_v40 = vpop.permute.xlu0 %1324  ;;  %v1827_v11 = vld [vmem:[#allocation3 + $0xb0] sm:$0xff] }
 0x246   : > { %1796 = vst.msk [vmem:[#allocation3 + $0xb8] sm:$0xff] %vm1772_vm15, %v1723_v10  ;;  %4411 = vmatprep.mubr.msk.f32.mxu0 %vm1848_vm0, %v1827_v11 }
 0x247   : > { %1397 = vst.msk [vmem:[#allocation3 + $0xc0] sm:$0xff] %vm1372_vm12, %v1325_v40 }
 0x249   : > { %v929_v43 = vpop.permute.xlu1 %928  ;;  %v721_v44 = vpop.permute.xlu0 %720 }
 0x24a   : > { %999 = vst.msk [vmem:[#allocation3 + $0xd0] sm:$0xff] %vm972_vm9, %v929_v43 }
 0x24b   : > { %790 = vst.msk [vmem:[#allocation3 + $0xd8] sm:$0xff] %vm762_vm8, %v721_v44 }
 0x24d   : > { %v1456_v13 = vpop.permute.xlu1 %1455  ;;  %v1327_v54 = vpop.permute.xlu0 %1326  ;;  %v1828_v14 = vld [vmem:[#allocation3 + $0xb8] sm:$0xff] }
 0x24e   : > { %1528 = vst.msk [vmem:[#allocation3 + $0xc0] sm:$0xff] %vm1503_vm13, %v1456_v13  ;;  %4412 = vmatmul.mubr.msk.f32.gmra.mxu0 %vm1848_vm0, %v1828_v14  ;;  %v4395_v22 = vpop.f32.mrf.mxu0 }
 0x24f   : > { %1398 = vst.msk [vmem:[#allocation3 + $0xc8] sm:$0xff] %vm1372_vm12, %v1327_v54  ;;  %v2071_v54 = vadd.f32 %v4395_v22, %v5756_v36 }
 0x250   : > { %v2065_v60 = vpop.f32.mrf.mxu0 }
 0x251   : > { %v1060_v0 = vpop.permute.xlu1 %1059  ;;  %v931_v16 = vpop.permute.xlu0 %930 }
 0x252   : > { %1130 = vst.msk [vmem:[#allocation3 + $0xd0] sm:$0xff] %vm1103_vm10, %v1060_v0 }
 0x253   : > { %1000 = vst.msk [vmem:[#allocation3 + $0xd8] sm:$0xff] %vm972_vm9, %v931_v16 }
 0x255   : > { %v1591_v18 = vpop.permute.xlu1 %1590  ;;  %v1458_v21 = vpop.permute.xlu0 %1457 }
 0x256   : > { %1663 = vst.msk [vmem:[#allocation3 + $0xc0] sm:$0xff] %vm1638_vm14, %v1591_v18  ;;  %v2066_v18 = vadd.f32 %v5756_v36, %v2065_v60 }
 0x257   : > { %1529 = vst.msk [vmem:[#allocation3 + $0xc8] sm:$0xff] %vm1503_vm13, %v1458_v21 }
 0x259   : > { %v1195_v51 = vpop.permute.xlu1 %1194  ;;  %v1062_v58 = vpop.permute.xlu0 %1061 }
 0x25a   : > { %1265 = vst.msk [vmem:[#allocation3 + $0xd0] sm:$0xff] %vm1238_vm11, %v1195_v51  ;;  %v2061_v51 = vadd.f32 %v4392_v12, %v5756_v36 }
 0x25b   : > { %1131 = vst.msk [vmem:[#allocation3 + $0xd8] sm:$0xff] %vm1103_vm10, %v1062_v58  ;;  %v2185_v58 = vmax.f32 %v2071_v54, 0.0 }
 0x25d   : > { %v1725_v23 = vpop.permute.xlu1 %1724  ;;  %v1593_v24 = vpop.permute.xlu0 %1592 }
 0x25e   : > { %1797 = vst.msk [vmem:[#allocation3 + $0xc0] sm:$0xff] %vm1772_vm15, %v1725_v23 }
 0x25f   : > { %1664 = vst.msk [vmem:[#allocation3 + $0xc8] sm:$0xff] %vm1638_vm14, %v1593_v24 }
 0x261   : > { %v1197_v47 = vpop.permute.xlu1 %1196  ;;  %v723_v26 = vpop.permute.xlu0 %722 }
 0x262   : > { %1266 = vst.msk [vmem:[#allocation3 + $0xd8] sm:$0xff] %vm1238_vm11, %v1197_v47  ;;  %v2056_v47 = vadd.f32 %v5756_v36, %v2055_v53 }
 0x263   : > { %791 = vst.msk [vmem:[#allocation3 + $0xe0] sm:$0xff] %vm762_vm8, %v723_v26  ;;  %v2184_v26 = vmax.f32 %v2066_v18, 0.0 }
 0x265   : > { %v1727_v28 = vpop.permute.xlu1 %1726  ;;  %v1329_v30 = vpop.permute.xlu0 %1328  ;;  %v1829_v31 = vld [vmem:[#allocation3 + $0xc0] sm:$0xff] }
 0x266   : > { %1798 = vst.msk [vmem:[#allocation3 + $0xc8] sm:$0xff] %vm1772_vm15, %v1727_v28  ;;  %4414 = vmatprep.mubr.msk.f32.mxu0 %vm1848_vm0, %v1829_v31  ;;  %v2051_v28 = vadd.f32 %v5736_v46, %v5756_v36 }
 0x267   : > { %1399 = vst.msk [vmem:[#allocation3 + $0xd0] sm:$0xff] %vm1372_vm12, %v1329_v30  ;;  %v2183_v30 = vmax.f32 %v2061_v51, 0.0 }
 0x269   : > { %v933_v17 = vpop.permute.xlu1 %932  ;;  %v725_v32 = vpop.permute.xlu0 %724 }
 0x26a   : > { %1001 = vst.msk [vmem:[#allocation3 + $0xe0] sm:$0xff] %vm972_vm9, %v933_v17 }
 0x26b   : > { %792 = vst.msk [vmem:[#allocation3 + $0xe8] sm:$0xff] %vm762_vm8, %v725_v32  ;;  %v2046_v32 = vadd.f32 %v5756_v36, %v5740_v49 }
 0x26d   : > { %v1460_v34 = vpop.permute.xlu1 %1459  ;;  %v1331_v35 = vpop.permute.xlu0 %1330  ;;  %v1830_v37 = vld [vmem:[#allocation3 + $0xc8] sm:$0xff] }
 0x26e   : > { %1530 = vst.msk [vmem:[#allocation3 + $0xd0] sm:$0xff] %vm1503_vm13, %v1460_v34  ;;  %4415 = vmatmul.mubr.msk.f32.gmra.mxu0 %vm1848_vm0, %v1830_v37  ;;  %v4398_v2 = vpop.f32.mrf.mxu0  ;;  %v2182_v34 = vmax.f32 %v2056_v47, 0.0  ;;  %v2181_v37 = vmax.f32 %v2051_v28, 0.0 }
 0x26f   : > { %1400 = vst.msk [vmem:[#allocation3 + $0xd8] sm:$0xff] %vm1372_vm12, %v1331_v35  ;;  %v2081_v9 = vadd.f32 %v4398_v2, %v5756_v36  ;;  %v2041_v35 = vadd.f32 %v5730_v20, %v5756_v36  ;;  %v2031_v20 = vadd.f32 %v5721_v33, %v5756_v36  ;;  %v2021_v33 = vadd.f32 %v5714_v27, %v5756_v36 }
 0x270   : > { %v2075_v63 = vpop.f32.mrf.mxu0 }
 0x271   : > { %v1064_v7 = vpop.permute.xlu1 %1063  ;;  %v935_v41 = vpop.permute.xlu0 %934  ;;  %v2076_v44 = vadd.f32 %v5756_v36, %v2075_v63  ;;  %v2187_v14 = vmax.f32 %v2081_v9, 0.0  ;;  %v2179_v46 = vmax.f32 %v2041_v35, 0.0 }
 0x272   : > { %1132 = vst.msk [vmem:[#allocation3 + $0xe0] sm:$0xff] %vm1103_vm10, %v1064_v7 }
 0x273   : > { %1002 = vst.msk [vmem:[#allocation3 + $0xe8] sm:$0xff] %vm972_vm9, %v935_v41  ;;  %v2186_v21 = vmax.f32 %v2076_v44, 0.0 }
 0x275   : > { %v1595_v45 = vpop.permute.xlu1 %1594  ;;  %v1462_v25 = vpop.permute.xlu0 %1461 }
 0x276   : > { %1665 = vst.msk [vmem:[#allocation3 + $0xd0] sm:$0xff] %vm1638_vm14, %v1595_v45  ;;  %v2036_v45 = vadd.f32 %v5756_v36, %v5734_v42  ;;  %v2026_v42 = vadd.f32 %v5756_v36, %v5725_v38  ;;  %v2016_v38 = vadd.f32 %v5756_v36, %v5719_v50 }
 0x277   : > { %1531 = vst.msk [vmem:[#allocation3 + $0xd8] sm:$0xff] %vm1503_vm13, %v1462_v25  ;;  %v2180_v25 = vmax.f32 %v2046_v32, 0.0 }
 0x278   : > { %v2178_v12 = vmax.f32 %v2036_v45, 0.0 }
 0x279   : > { %v1199_v48 = vpop.permute.xlu1 %1198  ;;  %v1066_v15 = vpop.permute.xlu0 %1065 }
 0x27a   : > { %1267 = vst.msk [vmem:[#allocation3 + $0xe0] sm:$0xff] %vm1238_vm11, %v1199_v48 }
 0x27b   : > { %1133 = vst.msk [vmem:[#allocation3 + $0xe8] sm:$0xff] %vm1103_vm10, %v1066_v15 }
 0x27d   : > { %v1729_v52 = vpop.permute.xlu1 %1728  ;;  %v1597_v29 = vpop.permute.xlu0 %1596 }
 0x27e   : > { %1799 = vst.msk [vmem:[#allocation3 + $0xd0] sm:$0xff] %vm1772_vm15, %v1729_v52  ;;  %v2177_v52 = vmax.f32 %v2031_v20, 0.0 }
 0x27f   : > { %1666 = vst.msk [vmem:[#allocation3 + $0xd8] sm:$0xff] %vm1638_vm14, %v1597_v29 }
 0x281   : > { %v1201_v55 = vpop.permute.xlu1 %1200  ;;  %v727_v56 = vpop.permute.xlu0 %726 }
 0x282   : > { %1268 = vst.msk [vmem:[#allocation3 + $0xe8] sm:$0xff] %vm1238_vm11, %v1201_v55  ;;  %v2176_v55 = vmax.f32 %v2026_v42, 0.0 }
 0x283   : > { %793 = vst.msk [vmem:[#allocation3 + $0xf0] sm:$0xff] %vm762_vm8, %v727_v56  ;;  %v2175_v56 = vmax.f32 %v2021_v33, 0.0 }
 0x285   : > { %v1731_v57 = vpop.permute.xlu1 %1730  ;;  %v1333_v39 = vpop.permute.xlu0 %1332  ;;  %v1831_v59 = vld [vmem:[#allocation3 + $0xd0] sm:$0xff] }
 0x286   : > { %1800 = vst.msk [vmem:[#allocation3 + $0xd8] sm:$0xff] %vm1772_vm15, %v1731_v57  ;;  %4417 = vmatprep.mubr.msk.f32.mxu0 %vm1848_vm0, %v1831_v59 }
 0x287   : > { %1401 = vst.msk [vmem:[#allocation3 + $0xe0] sm:$0xff] %vm1372_vm12, %v1333_v39  ;;  %v2174_v39 = vmax.f32 %v2016_v38, 0.0  ;;  %v2211_v38 = vld [vmem:[%s7110_s1 + $0x28] sm:$0xff] }
 0x289   : > { %v729_v61 = vpop.permute.xlu0 %728  ;;  %v937_v62 = vpop.permute.xlu1 %936 }
 0x28a   : > { %794 = vst.msk [vmem:[#allocation3 + $0xf8] sm:$0xff] %vm762_vm8, %v729_v61  ;;  %v2207_v61 = vld [vmem:[%s7110_s1 + $0x8] sm:$0xff]  ;;  %vm2856_vm8 = vcmask 1048448  }
 0x28b   : > { %1003 = vst.msk [vmem:[#allocation3 + $0xf0] sm:$0xff] %vm972_vm9, %v937_v62  ;;  %2334 = vmatprep.mubr.f32.mxu1 %v2207_v61  ;;  %v2220_v61 = vld [vmem:[%s7110_s1 + $0x70] sm:$0xff] }
 0x28d   : > { %v1335_v1 = vpop.permute.xlu0 %1334  ;;  %v1464_v3 = vpop.permute.xlu1 %1463  ;;  %v1832_v5 = vld [vmem:[#allocation3 + $0xd8] sm:$0xff] }
 0x28e   : > { %1402 = vst.msk [vmem:[#allocation3 + $0xe8] sm:$0xff] %vm1372_vm12, %v1335_v1  ;;  %v4401_v4 = vpop.f32.mrf.mxu0  ;;  %4418 = vmatmul.mubr.msk.f32.gmra.mxu0 %vm1848_vm0, %v1832_v5 }
 0x28f   : > { %1532 = vst.msk [vmem:[#allocation3 + $0xe0] sm:$0xff] %vm1503_vm13, %v1464_v3  ;;  %v2091_v6 = vadd.f32 %v4401_v4, %v5756_v36 }
 0x290   : > { %v2085_v8 = vpop.f32.mrf.mxu0 }
 0x291   : > { %v2189_v10 = vmax.f32 %v2091_v6, 0.0  ;;  %v2086_v40 = vadd.f32 %v5756_v36, %v2085_v8  ;;  %v939_v11 = vpop.permute.xlu0 %938  ;;  %v1068_v43 = vpop.permute.xlu1 %1067 }
 0x292   : > { %1004 = vst.msk [vmem:[#allocation3 + $0xf8] sm:$0xff] %vm972_vm9, %v939_v11  ;;  %vm3094_vm9 = vcmask 523264  }
 0x293   : > { %1134 = vst.msk [vmem:[#allocation3 + $0xf0] sm:$0xff] %vm1103_vm10, %v1068_v43  ;;  %v2188_v13 = vmax.f32 %v2086_v40, 0.0  ;;  %2271 = vmatpush1.msra.mxu1 %v2189_v10 }
 0x294   : > { %2272 = vmatprep.subr.mxu1 %v4586_v19 }
 0x295   : > { %v1466_v0 = vpop.permute.xlu0 %1465  ;;  %2273 = vmatpush1.msra.mxu1 %v2188_v13  ;;  %v1599_v16 = vpop.permute.xlu1 %1598 }
 0x296   : > { %1533 = vst.msk [vmem:[#allocation3 + $0xe8] sm:$0xff] %vm1503_vm13, %v1466_v0  ;;  %2274 = vmatprep.subr.mxu1 %v4586_v19 }
 0x297   : > { %1667 = vst.msk [vmem:[#allocation3 + $0xe0] sm:$0xff] %vm1638_vm14, %v1599_v16  ;;  %2275 = vmatpush1.msra.mxu1 %v2187_v14 }
 0x298   : > { %2276 = vmatprep.subr.mxu1 %v4586_v19 }
 0x299   : > { %v1070_v23 = vpop.permute.xlu0 %1069  ;;  %2277 = vmatpush1.msra.mxu1 %v2186_v21  ;;  %v1203_v24 = vpop.permute.xlu1 %1202 }
 0x29a   : > { %1135 = vst.msk [vmem:[#allocation3 + $0xf8] sm:$0xff] %vm1103_vm10, %v1070_v23  ;;  %2278 = vmatprep.subr.mxu1 %v4586_v19 }
 0x29b   : > { %1269 = vst.msk [vmem:[#allocation3 + $0xf0] sm:$0xff] %vm1238_vm11, %v1203_v24  ;;  %2279 = vmatpush1.msra.mxu1 %v2185_v58 }
 0x29c   : > { %2280 = vmatprep.subr.mxu1 %v4586_v19 }
 0x29d   : > { %v1601_v31 = vpop.permute.xlu0 %1600  ;;  %2281 = vmatpush1.msra.mxu1 %v2184_v26  ;;  %v1733_v17 = vpop.permute.xlu1 %1732 }
 0x29e   : > { %1668 = vst.msk [vmem:[#allocation3 + $0xe8] sm:$0xff] %vm1638_vm14, %v1601_v31  ;;  %2282 = vmatprep.subr.mxu1 %v4586_v19 }
 0x29f   : > { %1801 = vst.msk [vmem:[#allocation3 + $0xe0] sm:$0xff] %vm1772_vm15, %v1733_v17  ;;  %2283 = vmatpush1.msra.mxu1 %v2183_v30 }
 0x2a0   : > { %2284 = vmatprep.subr.mxu1 %v4586_v19 }
 0x2a1   : > { %v1205_v7 = vpop.permute.xlu0 %1204  ;;  %2285 = vmatpush1.msra.mxu1 %v2182_v34  ;;  %v1337_v41 = vpop.permute.xlu1 %1336 }
 0x2a2   : > { %1270 = vst.msk [vmem:[#allocation3 + $0xf8] sm:$0xff] %vm1238_vm11, %v1205_v7  ;;  %2286 = vmatprep.subr.mxu1 %v4586_v19 }
 0x2a3   : > { %1403 = vst.msk [vmem:[#allocation3 + $0xf0] sm:$0xff] %vm1372_vm12, %v1337_v41  ;;  %2287 = vmatpush1.msra.mxu1 %v2181_v37 }
 0x2a4   : > { %2288 = vmatprep.subr.mxu1 %v4586_v19 }
 0x2a5   : > { %v1735_v48 = vpop.permute.xlu0 %1734  ;;  %2289 = vmatpush1.msra.mxu1 %v2180_v25  ;;  %v1339_v15 = vpop.permute.xlu1 %1338 }
 0x2a6   : > { %v1833_v49 = vld [vmem:[#allocation3 + $0xe0] sm:$0xff]  ;;  %1802 = vst.msk [vmem:[#allocation3 + $0xe8] sm:$0xff] %vm1772_vm15, %v1735_v48  ;;  %2290 = vmatprep.subr.mxu1 %v4586_v19 }
 0x2a7   : > { %1404 = vst.msk [vmem:[#allocation3 + $0xf8] sm:$0xff] %vm1372_vm12, %v1339_v15  ;;  %4420 = vmatprep.mubr.msk.f32.mxu0 %vm1848_vm0, %v1833_v49  ;;  %2291 = vmatpush1.msra.mxu1 %v2179_v46 }
 0x2a8   : > { %2292 = vmatprep.subr.mxu1 %v4586_v19 }
 0x2a9   : > { %v1468_v29 = vpop.permute.xlu0 %1467  ;;  %2293 = vmatpush1.msra.mxu1 %v2178_v12  ;;  %v1470_v53 = vpop.permute.xlu1 %1469 }
 0x2aa   : > { %1534 = vst.msk [vmem:[#allocation3 + $0xf0] sm:$0xff] %vm1503_vm13, %v1468_v29  ;;  %1535 = vst.msk [vmem:[#allocation3 + $0xf8] sm:$0xff] %vm1503_vm13, %v1470_v53  ;;  %2294 = vmatprep.subr.mxu1 %v4586_v19  ;;  %v2206_v29 = vld [vmem:[%s7110_s1] sm:$0xff]  ;;  %v2208_v53 = vld [vmem:[%s7110_s1 + $0x10] sm:$0xff] }
 0x2ab   : > { %2295 = vmatpush1.msra.mxu1 %v2177_v52 }
 0x2ac   : > { %2296 = vmatprep.subr.mxu1 %v4586_v19 }
 0x2ad   : > { %v1603_v22 = vpop.permute.xlu0 %1602  ;;  %2297 = vmatpush1.msra.mxu1 %v2176_v55  ;;  %v1605_v27 = vpop.permute.xlu1 %1604  ;;  %v1834_v57 = vld [vmem:[#allocation3 + $0xe8] sm:$0xff]  ;;  %v2210_v55 = vld [vmem:[%s7110_s1 + $0x20] sm:$0xff] }
 0x2ae   : > { %1669 = vst.msk [vmem:[#allocation3 + $0xf0] sm:$0xff] %vm1638_vm14, %v1603_v22  ;;  %1670 = vst.msk [vmem:[#allocation3 + $0xf8] sm:$0xff] %vm1638_vm14, %v1605_v27  ;;  %4421 = vmatmul.mubr.msk.f32.gmra.mxu0 %vm1848_vm0, %v1834_v57  ;;  %2298 = vmatprep.subr.mxu1 %v4586_v19  ;;  %v5826_v62 = vpop.f32.mrf.mxu0  ;;  %v2212_v22 = vld [vmem:[%s7110_s1 + $0x30] sm:$0xff]  ;;  %v2215_v27 = vld [vmem:[%s7110_s1 + $0x48] sm:$0xff] }
 0x2af   : > { %2299 = vmatpush1.msra.mxu1 %v2175_v56  ;;  %v2101_v15 = vadd.f32 %v5826_v62, %v5756_v36  ;;  %v2213_v56 = vld [vmem:[%s7110_s1 + $0x38] sm:$0xff]  ;;  %v2214_v57 = vld [vmem:[%s7110_s1 + $0x40] sm:$0xff]  ;;  %v2223_v62 = vld [vmem:[%s7110_s1 + $0x88] sm:$0xff] }
 0x2b0   : > { %2300 = vmatprep.subr.mxu1 %v4586_v19  ;;  %v5828_v63 = vpop.f32.mrf.mxu0 }
 0x2b1   : > { %v1737_v50 = vpop.permute.xlu0 %1736  ;;  %2301 = vmatpush1.msra.mxu1 %v2174_v39  ;;  %v1739_v59 = vpop.permute.xlu1 %1738  ;;  %v2096_v42 = vadd.f32 %v5756_v36, %v5828_v63  ;;  %v2191_v33 = vmax.f32 %v2101_v15, 0.0  ;;  %v2217_v39 = vld [vmem:[%s7110_s1 + $0x58] sm:$0xff]  ;;  %v2222_v63 = vld [vmem:[%s7110_s1 + $0x80] sm:$0xff] }
 0x2b2   : > { %1803 = vst.msk [vmem:[#allocation3 + $0xf0] sm:$0xff] %vm1772_vm15, %v1737_v50  ;;  %1804 = vst.msk [vmem:[#allocation3 + $0xf8] sm:$0xff] %vm1772_vm15, %v1739_v59  ;;  %2302 = vmatprep.subr.mxu1 %v4586_v19  ;;  %v2216_v50 = vld [vmem:[%s7110_s1 + $0x50] sm:$0xff]  ;;  %v2219_v59 = vld [vmem:[%s7110_s1 + $0x68] sm:$0xff] }
 0x2b3   : > { %v2190_v52 = vmax.f32 %v2096_v42, 0.0  ;;  %v2265_v15 = vld [vmem:[%s7110_s1 + $0x1d8] sm:$0xff]  ;;  %v2267_v42 = vld [vmem:[%s7110_s1 + $0x1e8] sm:$0xff] }
 0x2b9   : > { %v1835_v60 = vld [vmem:[#allocation3 + $0xf0] sm:$0xff]  ;;  %v1836_v2 = vld [vmem:[#allocation3 + $0xf8] sm:$0xff] }
 0x2ba   : > { %4423 = vmatprep.mubr.msk.f32.mxu0 %vm1848_vm0, %v1835_v60  ;;  %v2218_v60 = vld [vmem:[%s7110_s1 + $0x60] sm:$0xff] }
 0x2bb   : > { %4424 = vmatmul.mubr.msk.f32.gmra.mxu0 %vm1848_vm0, %v1836_v2  ;;  %v2221_v2 = vld [vmem:[%s7110_s1 + $0x78] sm:$0xff] }
 0x2ce   : > { %v4407_v1 = vpop.f32.mrf.mxu0 }
 0x2cf   : > { %v2111_v25 = vadd.f32 %v4407_v1, %v5756_v36  ;;  %v2225_v1 = vld [vmem:[%s7110_s1 + $0x98] sm:$0xff] }
 0x2d0   : > { %v2105_v3 = vpop.f32.mrf.mxu0 }
 0x2d1   : > { %v2106_v46 = vadd.f32 %v5756_v36, %v2105_v3  ;;  %v2193_v49 = vmax.f32 %v2111_v25, 0.0  ;;  %v2224_v3 = vld [vmem:[%s7110_s1 + $0x90] sm:$0xff]  ;;  %v2261_v25 = vld [vmem:[%s7110_s1 + $0x1b8] sm:$0xff] }
 0x2d3   : > { %v2192_v12 = vmax.f32 %v2106_v46, 0.0  ;;  %v2263_v46 = vld [vmem:[%s7110_s1 + $0x1c8] sm:$0xff] }
 0x2ee   : > { %v4410_v5 = vpop.f32.mrf.mxu0 }
 0x2ef   : > { %v2121_v37 = vadd.f32 %v4410_v5, %v5756_v36  ;;  %v2227_v5 = vld [vmem:[%s7110_s1 + $0xa8] sm:$0xff] }
 0x2f0   : > { %v2115_v4 = vpop.f32.mrf.mxu0 }
 0x2f1   : > { %v2116_v41 = vadd.f32 %v5756_v36, %v2115_v4  ;;  %v2195_v20 = vmax.f32 %v2121_v37, 0.0  ;;  %v2226_v4 = vld [vmem:[%s7110_s1 + $0xa0] sm:$0xff]  ;;  %v2257_v37 = vld [vmem:[%s7110_s1 + $0x198] sm:$0xff] }
 0x2f3   : > { %v2194_v48 = vmax.f32 %v2116_v41, 0.0  ;;  %v2259_v41 = vld [vmem:[%s7110_s1 + $0x1a8] sm:$0xff] }
 0x30e   : > { %v4413_v6 = vpop.f32.mrf.mxu0 }
 0x30f   : > { %v2131_v17 = vadd.f32 %v4413_v6, %v5756_v36  ;;  %v2229_v6 = vld [vmem:[%s7110_s1 + $0xb8] sm:$0xff] }
 0x310   : > { %v2125_v8 = vpop.f32.mrf.mxu0 }
 0x311   : > { %v2126_v34 = vadd.f32 %v5756_v36, %v2125_v8  ;;  %v2197_v7 = vmax.f32 %v2131_v17, 0.0  ;;  %v2228_v8 = vld [vmem:[%s7110_s1 + $0xb0] sm:$0xff]  ;;  %v2253_v17 = vld [vmem:[%s7110_s1 + $0x178] sm:$0xff] }
 0x313   : > { %v2196_v45 = vmax.f32 %v2126_v34, 0.0  ;;  %v2255_v34 = vld [vmem:[%s7110_s1 + $0x188] sm:$0xff] }
 0x32e   : > { %v4416_v9 = vpop.f32.mrf.mxu0 }
 0x32f   : > { %v2141_v26 = vadd.f32 %v4416_v9, %v5756_v36  ;;  %v2231_v9 = vld [vmem:[%s7110_s1 + $0xc8] sm:$0xff] }
 0x330   : > { %v2135_v10 = vpop.f32.mrf.mxu0 }
 0x331   : > { %v2136_v30 = vadd.f32 %v5756_v36, %v2135_v10  ;;  %v2199_v32 = vmax.f32 %v2141_v26, 0.0  ;;  %v2230_v10 = vld [vmem:[%s7110_s1 + $0xc0] sm:$0xff]  ;;  %v2249_v26 = vld [vmem:[%s7110_s1 + $0x158] sm:$0xff] }
 0x333   : > { %v2198_v35 = vmax.f32 %v2136_v30, 0.0  ;;  %v2251_v30 = vld [vmem:[%s7110_s1 + $0x168] sm:$0xff] }
 0x34e   : > { %v4419_v40 = vpop.f32.mrf.mxu0 }
 0x34f   : > { %v2151_v58 = vadd.f32 %v4419_v40, %v5756_v36  ;;  %v2233_v40 = vld [vmem:[%s7110_s1 + $0xd8] sm:$0xff] }
 0x350   : > { %v2145_v11 = vpop.f32.mrf.mxu0 }
 0x351   : > { %v2146_v24 = vadd.f32 %v5756_v36, %v2145_v11  ;;  %v2201_v28 = vmax.f32 %v2151_v58, 0.0  ;;  %v2232_v11 = vld [vmem:[%s7110_s1 + $0xd0] sm:$0xff]  ;;  %v2245_v58 = vld [vmem:[%s7110_s1 + $0x138] sm:$0xff] }
 0x353   : > { %v2200_v31 = vmax.f32 %v2146_v24, 0.0  ;;  %v2247_v24 = vld [vmem:[%s7110_s1 + $0x148] sm:$0xff] }
 0x36e   : > { %v4422_v43 = vpop.f32.mrf.mxu0 }
 0x36f   : > { %v2161_v0 = vadd.f32 %v4422_v43, %v5756_v36  ;;  %v2235_v43 = vld [vmem:[%s7110_s1 + $0xe8] sm:$0xff] }
 0x370   : > { %v2155_v44 = vpop.f32.mrf.mxu0 }
 0x371   : > { %v2156_v21 = vadd.f32 %v5756_v36, %v2155_v44  ;;  %v2203_v23 = vmax.f32 %v2161_v0, 0.0  ;;  %v2234_v44 = vld [vmem:[%s7110_s1 + $0xe0] sm:$0xff] }
 0x372   : > { %v2238_v0 = vld [vmem:[%s7110_s1 + $0x100] sm:$0xff] }
 0x373   : > { %v2202_v47 = vmax.f32 %v2156_v21, 0.0  ;;  %v2243_v21 = vld [vmem:[%s7110_s1 + $0x128] sm:$0xff] }
 0x37b   : > { %v4425_v13 = vpop.f32.mrf.mxu0 }
 0x37c   : > { %v2171_v54 = vadd.f32 %v4425_v13, %v5756_v36  ;;  %v2237_v13 = vld [vmem:[%s7110_s1 + $0xf8] sm:$0xff] }
 0x37d   : > { %v2165_v14 = vpop.f32.mrf.mxu0 }
 0x37e   : > { %v2205_v16 = vmax.f32 %v2171_v54, 0.0  ;;  %v2166_v18 = vadd.f32 %v5756_v36, %v2165_v14  ;;  %v2209_v36 = vld [vmem:[%s7110_s1 + $0x18] sm:$0xff]  ;;  %v2236_v54 = vld [vmem:[%s7110_s1 + $0xf0] sm:$0xff]  ;;  %v2239_v14 = vld [vmem:[%s7110_s1 + $0x108] sm:$0xff] }
 0x380   : > { %v2204_v51 = vmax.f32 %v2166_v18, 0.0  ;;  %2303 = vmatpush2.msra.mxu1 %v2205_v16  ;;  %v2241_v16 = vld [vmem:[%s7110_s1 + $0x118] sm:$0xff]  ;;  %v2240_v18 = vld [vmem:[%s7110_s1 + $0x110] sm:$0xff] }
 0x381   : > { %2304 = vmatprep.subr.mxu1 %v4586_v19 }
 0x382   : > { %2305 = vmatpush2.msra.mxu1 %v2204_v51  ;;  %v2242_v51 = vld [vmem:[%s7110_s1 + $0x120] sm:$0xff] }
 0x383   : > { %2306 = vmatprep.subr.mxu1 %v4586_v19 }
 0x384   : > { %2307 = vmatpush2.msra.mxu1 %v2203_v23  ;;  %v2244_v23 = vld [vmem:[%s7110_s1 + $0x130] sm:$0xff] }
 0x385   : > { %2308 = vmatprep.subr.mxu1 %v4586_v19 }
 0x386   : > { %2309 = vmatpush2.msra.mxu1 %v2202_v47  ;;  %v2246_v47 = vld [vmem:[%s7110_s1 + $0x140] sm:$0xff] }
 0x387   : > { %2310 = vmatprep.subr.mxu1 %v4586_v19 }
 0x388   : > { %2311 = vmatpush2.msra.mxu1 %v2201_v28  ;;  %v2248_v28 = vld [vmem:[%s7110_s1 + $0x150] sm:$0xff] }
 0x389   : > { %2312 = vmatprep.subr.mxu1 %v4586_v19 }
 0x38a   : > { %2313 = vmatpush2.msra.mxu1 %v2200_v31  ;;  %v2250_v31 = vld [vmem:[%s7110_s1 + $0x160] sm:$0xff] }
 0x38b   : > { %2314 = vmatprep.subr.mxu1 %v4586_v19 }
 0x38c   : > { %2315 = vmatpush2.msra.mxu1 %v2199_v32  ;;  %v2252_v32 = vld [vmem:[%s7110_s1 + $0x170] sm:$0xff] }
 0x38d   : > { %2316 = vmatprep.subr.mxu1 %v4586_v19 }
 0x38e   : > { %2317 = vmatpush2.msra.mxu1 %v2198_v35  ;;  %v2254_v35 = vld [vmem:[%s7110_s1 + $0x180] sm:$0xff] }
 0x38f   : > { %2318 = vmatprep.subr.mxu1 %v4586_v19 }
 0x390   : > { %2319 = vmatpush2.msra.mxu1 %v2197_v7  ;;  %v2256_v7 = vld [vmem:[%s7110_s1 + $0x190] sm:$0xff] }
 0x391   : > { %2320 = vmatprep.subr.mxu1 %v4586_v19 }
 0x392   : > { %2321 = vmatpush2.msra.mxu1 %v2196_v45  ;;  %v2258_v45 = vld [vmem:[%s7110_s1 + $0x1a0] sm:$0xff] }
 0x393   : > { %2322 = vmatprep.subr.mxu1 %v4586_v19 }
 0x394   : > { %2323 = vmatpush2.msra.mxu1 %v2195_v20  ;;  %v2260_v20 = vld [vmem:[%s7110_s1 + $0x1b0] sm:$0xff] }
 0x395   : > { %2324 = vmatprep.subr.mxu1 %v4586_v19 }
 0x396   : > { %2325 = vmatpush2.msra.mxu1 %v2194_v48  ;;  %v2262_v48 = vld [vmem:[%s7110_s1 + $0x1c0] sm:$0xff] }
 0x397   : > { %2326 = vmatprep.subr.mxu1 %v4586_v19 }
 0x398   : > { %2327 = vmatpush2.msra.mxu1 %v2193_v49  ;;  %v2264_v49 = vld [vmem:[%s7110_s1 + $0x1d0] sm:$0xff] }
 0x399   : > { %2328 = vmatprep.subr.mxu1 %v4586_v19 }
 0x39a   : > { %2329 = vmatpush2.msra.mxu1 %v2192_v12  ;;  %v2266_v12 = vld [vmem:[%s7110_s1 + $0x1e0] sm:$0xff] }
 0x39b   : > { %2330 = vmatprep.subr.mxu1 %v4586_v19 }
 0x39c   : > { %2331 = vmatpush2.msra.mxu1 %v2191_v33  ;;  %v2269_v33 = vld [vmem:[%s7110_s1 + $0x1f8] sm:$0xff] }
 0x39d   : > { %2332 = vmatprep.subr.mxu1 %v4586_v19 }
 0x39e   : > { %2333 = vmatpush2.msra.mxu1 %v2190_v52  ;;  %v2268_v52 = vld [vmem:[%s7110_s1 + $0x1f0] sm:$0xff] }
 0x39f   : > { %2335 = vmatmul.mubr.f32.vlgmr.msra.gmra.mxu1 %v2206_v29  ;;  %v2529_v29 = vld [vmem:[#allocation4] sm:$0xff] }
 0x3a0   : > { %2339 = vmatprep.mubr.f32.mxu1 %v2209_v36  ;;  %v2530_v36 = vld [vmem:[#allocation4 + $0x8] sm:$0x3]  ;;  %2549 = vst.msk [vmem:[#allocation5] sm:$0xff] %vm2520_vm1, %v2529_v29 }
 0x3a3   : > { %2340 = vmatmul.mubr.f32.gmra.mxu1 %v2208_v53  ;;  %v2573_v53 = vrot.slane %v2529_v29, 1 }
 0x3a4   : > { %2344 = vmatprep.mubr.f32.mxu1 %v2211_v38  ;;  %v2574_v38 = vrot.slane %v2530_v36, 1 }
 0x3a7   : > { %2345 = vmatmul.mubr.f32.gmra.mxu1 %v2210_v55  ;;  %v2575_v55 = vsel %vm585_vm5, %v2573_v53, %v2574_v38 }
 0x3a8   : > { %2349 = vmatprep.mubr.f32.mxu1 %v2213_v56  ;;  %2597 = vrot.lane.b32.xlu0 %v2575_v55, %s4587_s26  ;;  %v2630_v56 = vrot.slane %v2529_v29, 2  ;;  %v2913_v29 = vld [vmem:[%s7113_s4 + $0x68] sm:$0xff] }
 0x3ab   : > { %2350 = vmatmul.mubr.f32.gmra.mxu1 %v2212_v22  ;;  %v2631_v22 = vrot.slane %v2530_v36, 2  ;;  %v6128_v36 = vld [vmem:[#allocation4 + $0x98] sm:$0x3] }
 0x3ac   : > { %2354 = vmatprep.mubr.f32.mxu1 %v2215_v27  ;;  %v2866_v38 = vrot.slane %v6128_v36, 2 }
 0x3ad   : > { %v2632_v27 = vsel %vm795_vm4, %v2630_v56, %v2631_v22  ;;  %v2912_v22 = vld [vmem:[%s7113_s4 + $0x60] sm:$0xff] }
 0x3ae   : > { %2654 = vrot.lane.b32.xlu1 %v2632_v27, %s4588_s21  ;;  %v2911_v27 = vld [vmem:[%s7113_s4 + $0x58] sm:$0xff] }
 0x3af   : > { %2355 = vmatmul.mubr.f32.gmra.mxu1 %v2214_v57 }
 0x3b0   : > { %2359 = vmatprep.mubr.f32.mxu1 %v2217_v39 }
 0x3b3   : > { %2360 = vmatmul.mubr.f32.gmra.mxu1 %v2216_v50 }
 0x3b4   : > { %2364 = vmatprep.mubr.f32.mxu1 %v2219_v59 }
 0x3b7   : > { %2365 = vmatmul.mubr.f32.gmra.mxu1 %v2218_v60 }
 0x3b8   : > { %2369 = vmatprep.mubr.f32.mxu1 %v2221_v2 }
 0x3bb   : > { %2370 = vmatmul.mubr.f32.gmra.mxu1 %v2220_v61 }
 0x3bc   : > { %2374 = vmatprep.mubr.f32.mxu1 %v2223_v62 }
 0x3bf   : > { %2375 = vmatmul.mubr.f32.gmra.mxu1 %v2222_v63 }
 0x3c0   : > { %2379 = vmatprep.mubr.f32.mxu1 %v2225_v1 }
 0x3c3   : > { %2380 = vmatmul.mubr.f32.gmra.mxu1 %v2224_v3 }
 0x3c4   : > { %2384 = vmatprep.mubr.f32.mxu1 %v2227_v5 }
 0x3c7   : > { %2385 = vmatmul.mubr.f32.gmra.mxu1 %v2226_v4 }
 0x3c8   : > { %2389 = vmatprep.mubr.f32.mxu1 %v2229_v6 }
 0x3cb   : > { %2390 = vmatmul.mubr.f32.gmra.mxu1 %v2228_v8 }
 0x3cc   : > { %2394 = vmatprep.mubr.f32.mxu1 %v2231_v9 }
 0x3cf   : > { %2395 = vmatmul.mubr.f32.gmra.mxu1 %v2230_v10 }
 0x3d0   : > { %2399 = vmatprep.mubr.f32.mxu1 %v2233_v40 }
 0x3d3   : > { %2400 = vmatmul.mubr.f32.gmra.mxu1 %v2232_v11 }
 0x3d4   : > { %2404 = vmatprep.mubr.f32.mxu1 %v2235_v43 }
 0x3d7   : > { %2405 = vmatmul.mubr.f32.gmra.mxu1 %v2234_v44 }
 0x3d8   : > { %2409 = vmatprep.mubr.f32.mxu1 %v2237_v13 }
 0x3db   : > { %2410 = vmatmul.mubr.f32.gmra.mxu1 %v2236_v54 }
 0x3dc   : > { %2414 = vmatprep.mubr.f32.mxu1 %v2239_v14 }
 0x3df   : > { %2415 = vmatmul.mubr.f32.gmra.mxu1 %v2238_v0 }
 0x3e0   : > { %2419 = vmatprep.mubr.f32.mxu1 %v2241_v16 }
 0x3e3   : > { %2420 = vmatmul.mubr.f32.gmra.mxu1 %v2240_v18 }
 0x3e4   : > { %2424 = vmatprep.mubr.f32.mxu1 %v2243_v21 }
 0x3e7   : > { %2425 = vmatmul.mubr.f32.gmra.mxu1 %v2242_v51 }
 0x3e8   : > { %2429 = vmatprep.mubr.f32.mxu1 %v2245_v58 }
 0x3eb   : > { %2430 = vmatmul.mubr.f32.gmra.mxu1 %v2244_v23 }
 0x3ec   : > { %2434 = vmatprep.mubr.f32.mxu1 %v2247_v24 }
 0x3ef   : > { %2435 = vmatmul.mubr.f32.gmra.mxu1 %v2246_v47 }
 0x3f0   : > { %2439 = vmatprep.mubr.f32.mxu1 %v2249_v26 }
 0x3f3   : > { %2440 = vmatmul.mubr.f32.gmra.mxu1 %v2248_v28 }
 0x3f4   : > { %2444 = vmatprep.mubr.f32.mxu1 %v2251_v30 }
 0x3f7   : > { %2445 = vmatmul.mubr.f32.gmra.mxu1 %v2250_v31 }
 0x3f8   : > { %2449 = vmatprep.mubr.f32.mxu1 %v2253_v17 }
 0x3fb   : > { %2450 = vmatmul.mubr.f32.gmra.mxu1 %v2252_v32 }
 0x3fc   : > { %2454 = vmatprep.mubr.f32.mxu1 %v2255_v34 }
 0x3ff   : > { %2455 = vmatmul.mubr.f32.gmra.mxu1 %v2254_v35 }
 0x400   : > { %2459 = vmatprep.mubr.f32.mxu1 %v2257_v37 }
 0x403   : > { %2460 = vmatmul.mubr.f32.gmra.mxu1 %v2256_v7 }
 0x404   : > { %2464 = vmatprep.mubr.f32.mxu1 %v2259_v41 }
 0x407   : > { %2465 = vmatmul.mubr.f32.gmra.mxu1 %v2258_v45 }
 0x408   : > { %2469 = vmatprep.mubr.f32.mxu1 %v2261_v25 }
 0x40b   : > { %2470 = vmatmul.mubr.f32.gmra.mxu1 %v2260_v20 }
 0x40c   : > { %2474 = vmatprep.mubr.f32.mxu1 %v2263_v46 }
 0x40f   : > { %2475 = vmatmul.mubr.f32.gmra.mxu1 %v2262_v48 }
 0x410   : > { %2479 = vmatprep.mubr.f32.mxu1 %v2265_v15  ;;  %v2915_v15 = vld [vmem:[%s7113_s4 + $0x78] sm:$0xff] }
 0x411   : > { %2950 = vmatpush1.msra.mxu0 %v2915_v15 }
 0x412   : > { %2951 = vmatprep.subr.mxu0 %v4586_v19 }
 0x413   : > { %2480 = vmatmul.mubr.f32.gmra.mxu1 %v2264_v49 }
 0x414   : > { %2484 = vmatprep.mubr.f32.mxu1 %v2267_v42 }
 0x417   : > { %2485 = vmatmul.mubr.f32.gmra.mxu1 %v2266_v12  ;;  %v2914_v12 = vld [vmem:[%s7113_s4 + $0x70] sm:$0xff] }
 0x418   : > { %2489 = vmatprep.mubr.f32.mxu1 %v2269_v33  ;;  %v6122_v33 = vld [vmem:[#allocation4 + $0x90] sm:$0xff]  ;;  %2952 = vmatpush1.msra.mxu0 %v2914_v12 }
 0x419   : > { %2953 = vmatprep.subr.mxu0 %v4586_v19 }
 0x41a   : > { %2954 = vmatpush1.msra.mxu0 %v2913_v29 }
 0x41b   : > { %2490 = vmatmul.mubr.f32.gmra.mxu1 %v2268_v52  ;;  %v2865_v52 = vrot.slane %v6122_v33, 2  ;;  %2955 = vmatprep.subr.mxu0 %v4586_v19 }
 0x41c   : > { %2956 = vmatpush1.msra.mxu0 %v2912_v22  ;;  %v2900_v22 = vld [vmem:[%s7113_s4] sm:$0xff] }
 0x41d   : > { %v2867_v56 = vsel %vm795_vm4, %v2865_v52, %v2866_v38  ;;  %2957 = vmatprep.subr.mxu0 %v4586_v19 }
 0x41e   : > { %2883 = vst.msk [vmem:[#allocation5 + $0x78] sm:$0xff] %vm2520_vm1, %v2867_v56  ;;  %2958 = vmatpush1.msra.mxu0 %v2911_v27  ;;  %v2901_v56 = vld [vmem:[%s7113_s4 + $0x8] sm:$0xff] }
 0x41f   : > { %2959 = vmatprep.subr.mxu0 %v4586_v19 }
 0x45f   : > { %v6057_v57 = vpop.f32.mrf.mxu1 }
 0x461   : > { %v2338_v39 = vpop.f32.mrf.mxu1 }
 0x463   : > { %v6059_v50 = vpop.f32.mrf.mxu1 }
 0x465   : > { %v2343_v59 = vpop.f32.mrf.mxu1 }
 0x466   : > { %v2910_v59 = vld [vmem:[%s7113_s4 + $0x50] sm:$0xff] }
 0x467   : > { %v6061_v60 = vpop.f32.mrf.mxu1  ;;  %2960 = vmatpush1.msra.mxu0 %v2910_v59 }
 0x468   : > { %2961 = vmatprep.subr.mxu0 %v4586_v19 }
 0x469   : > { %v2348_v2 = vpop.f32.mrf.mxu1 }
 0x46a   : > { %v2598_v2 = vpop.permute.xlu0 %2597 }
 0x46b   : > { %v6063_v61 = vpop.f32.mrf.mxu1  ;;  %2622 = vst.msk [vmem:[#allocation5] sm:$0xff] %vm2621_vm2, %v2598_v2 }
 0x46d   : > { %v2353_v62 = vpop.f32.mrf.mxu1 }
 0x46f   : > { %v6065_v63 = vpop.f32.mrf.mxu1 }
 0x471   : > { %v2358_v1 = vpop.f32.mrf.mxu1 }
 0x473   : > { %v6067_v3 = vpop.f32.mrf.mxu1 }
 0x475   : > { %v2363_v5 = vpop.f32.mrf.mxu1 }
 0x476   : > { %v2655_v5 = vpop.permute.xlu1 %2654 }
 0x477   : > { %v6069_v4 = vpop.f32.mrf.mxu1  ;;  %2679 = vst.msk [vmem:[#allocation5] sm:$0xff] %vm2678_vm3, %v2655_v5 }
 0x479   : > { %v2368_v6 = vpop.f32.mrf.mxu1 }
 0x47b   : > { %v6071_v8 = vpop.f32.mrf.mxu1 }
 0x47d   : > { %v2373_v9 = vpop.f32.mrf.mxu1 }
 0x47e   : > { %v2909_v9 = vld [vmem:[%s7113_s4 + $0x48] sm:$0xff] }
 0x47f   : > { %v6073_v10 = vpop.f32.mrf.mxu1  ;;  %2962 = vmatpush1.msra.mxu0 %v2909_v9 }
 0x480   : > { %v2495_v40 = vmax.f32 %v6057_v57, %v6073_v10  ;;  %2963 = vmatprep.subr.mxu0 %v4586_v19 }
 0x481   : > { %v2378_v11 = vpop.f32.mrf.mxu1 }
 0x482   : > { %v2908_v11 = vld [vmem:[%s7113_s4 + $0x40] sm:$0xff] }
 0x483   : > { %v6077_v43 = vpop.f32.mrf.mxu1  ;;  %2964 = vmatpush1.msra.mxu0 %v2908_v11 }
 0x484   : > { %v2496_v44 = vmax.f32 %v6059_v50, %v6077_v43  ;;  %2965 = vmatprep.subr.mxu0 %v4586_v19 }
 0x485   : > { %v2383_v13 = vpop.f32.mrf.mxu1 }
 0x487   : > { %v6081_v54 = vpop.f32.mrf.mxu1 }
 0x488   : > { %v2497_v14 = vmax.f32 %v6061_v60, %v6081_v54  ;;  %v2902_v54 = vld [vmem:[%s7113_s4 + $0x10] sm:$0xff] }
 0x489   : > { %v2388_v0 = vpop.f32.mrf.mxu1 }
 0x48b   : > { %v6085_v16 = vpop.f32.mrf.mxu1 }
 0x48c   : > { %v2498_v18 = vmax.f32 %v6063_v61, %v6085_v16 }
 0x48d   : > { %v2393_v21 = vpop.f32.mrf.mxu1 }
 0x48f   : > { %v6089_v51 = vpop.f32.mrf.mxu1 }
 0x490   : > { %v2499_v58 = vmax.f32 %v6065_v63, %v6089_v51  ;;  %v2917_v63 = vld [vmem:[%s7113_s4 + $0x88] sm:$0xff] }
 0x491   : > { %v2398_v23 = vpop.f32.mrf.mxu1 }
 0x493   : > { %v6093_v24 = vpop.f32.mrf.mxu1 }
 0x494   : > { %v2500_v47 = vmax.f32 %v6067_v3, %v6093_v24 }
 0x495   : > { %v2403_v26 = vpop.f32.mrf.mxu1 }
 0x496   : > { %v2907_v26 = vld [vmem:[%s7113_s4 + $0x38] sm:$0xff] }
 0x497   : > { %v6097_v28 = vpop.f32.mrf.mxu1  ;;  %2966 = vmatpush1.msra.mxu0 %v2907_v26 }
 0x498   : > { %v2501_v30 = vmax.f32 %v6069_v4, %v6097_v28  ;;  %2967 = vmatprep.subr.mxu0 %v4586_v19 }
 0x499   : > { %v2408_v31 = vpop.f32.mrf.mxu1 }
 0x49a   : > { %v2906_v31 = vld [vmem:[%s7113_s4 + $0x30] sm:$0xff] }
 0x49b   : > { %v6101_v17 = vpop.f32.mrf.mxu1  ;;  %2968 = vmatpush1.msra.mxu0 %v2906_v31 }
 0x49c   : > { %v2502_v32 = vmax.f32 %v6071_v8, %v6101_v17  ;;  %2969 = vmatprep.subr.mxu0 %v4586_v19 }
 0x49d   : > { %v2413_v34 = vpop.f32.mrf.mxu1 }
 0x49f   : > { %v2416_v35 = vpop.f32.mrf.mxu1 }
 0x4a1   : > { %v2418_v37 = vpop.f32.mrf.mxu1 }
 0x4a2   : > { %v2904_v37 = vld [vmem:[%s7113_s4 + $0x20] sm:$0xff] }
 0x4a3   : > { %v6105_v7 = vpop.f32.mrf.mxu1 }
 0x4a5   : > { %v2423_v41 = vpop.f32.mrf.mxu1 }
 0x4a7   : > { %v6107_v45 = vpop.f32.mrf.mxu1 }
 0x4a9   : > { %v2428_v25 = vpop.f32.mrf.mxu1 }
 0x4ab   : > { %v6109_v20 = vpop.f32.mrf.mxu1 }
 0x4ad   : > { %v2433_v46 = vpop.f32.mrf.mxu1 }
 0x4ae   : > { %v2903_v46 = vld [vmem:[%s7113_s4 + $0x18] sm:$0xff] }
 0x4af   : > { %v6111_v48 = vpop.f32.mrf.mxu1 }
 0x4b1   : > { %v2438_v49 = vpop.f32.mrf.mxu1 }
 0x4b3   : > { %v6117_v42 = vpop.f32.mrf.mxu1 }
 0x4b5   : > { %v2443_v53 = vpop.f32.mrf.mxu1 }
 0x4b7   : > { %v6132_v55 = vpop.f32.mrf.mxu1 }
 0x4b9   : > { %v2448_v39 = vpop.f32.mrf.mxu1 }
 0x4bb   : > { %v6147_v62 = vpop.f32.mrf.mxu1 }
 0x4bd   : > { %v2453_v1 = vpop.f32.mrf.mxu1 }
 0x4bf   : > { %v2456_v6 = vpop.f32.mrf.mxu1 }
 0x4c0   : > { %v2503_v13 = vmax.f32 %v2416_v35, %v2456_v6  ;;  %v2916_v6 = vld [vmem:[%s7113_s4 + $0x80] sm:$0xff] }
 0x4c1   : > { %v2458_v0 = vpop.f32.mrf.mxu1 }
 0x4c2   : > { %v2511_v21 = vmax.f32 %v2495_v40, %v2503_v13  ;;  %v2905_v40 = vld [vmem:[%s7113_s4 + $0x28] sm:$0xff] }
 0x4c3   : > { %v2461_v23 = vpop.f32.mrf.mxu1  ;;  %2970 = vmatpush1.msra.mxu0 %v2905_v40 }
 0x4c4   : > { %2521 = vst.msk [vmem:[#allocation4 + $0x11] sm:$0xff] %vm2520_vm1, %v2511_v21  ;;  %v2504_v34 = vmax.f32 %v6105_v7, %v2461_v23  ;;  %2971 = vmatprep.subr.mxu0 %v4586_v19 }
 0x4c5   : > { %v2463_v35 = vpop.f32.mrf.mxu1  ;;  %2972 = vmatpush1.msra.mxu0 %v2904_v37 }
 0x4c6   : > { %v2512_v57 = vmax.f32 %v2496_v44, %v2504_v34  ;;  %2973 = vmatprep.subr.mxu0 %v4586_v19 }
 0x4c7   : > { %v2466_v10 = vpop.f32.mrf.mxu1  ;;  %2974 = vmatpush1.msra.mxu0 %v2903_v46 }
 0x4c8   : > { %2522 = vst.msk [vmem:[#allocation4 + $0x21] sm:$0xff] %vm2520_vm1, %v2512_v57  ;;  %v2505_v7 = vmax.f32 %v6107_v45, %v2466_v10  ;;  %2975 = vmatprep.subr.mxu0 %v4586_v19 }
 0x4c9   : > { %v2468_v41 = vpop.f32.mrf.mxu1  ;;  %2976 = vmatpush1.msra.mxu0 %v2902_v54 }
 0x4ca   : > { %v2513_v50 = vmax.f32 %v2497_v14, %v2505_v7  ;;  %2977 = vmatprep.subr.mxu0 %v4586_v19 }
 0x4cb   : > { %v2471_v43 = vpop.f32.mrf.mxu1  ;;  %v2531_v44 = vld [vmem:[#allocation4 + $0x10] sm:$0xff]  ;;  %v2532_v25 = vld [vmem:[#allocation4 + $0x18] sm:$0x3]  ;;  %2978 = vmatpush1.msra.mxu0 %v2901_v56 }
 0x4cc   : > { %2523 = vst.msk [vmem:[#allocation4 + $0x31] sm:$0xff] %vm2520_vm1, %v2513_v50  ;;  %v2506_v45 = vmax.f32 %v6109_v20, %v2471_v43  ;;  %2688 = vrot.lane.b32.xlu0 %v2531_v44, %s4589_s18  ;;  %v2576_v15 = vrot.slane %v2531_v44, 1  ;;  %2550 = vst.msk [vmem:[#allocation5 + $0x10] sm:$0xff] %vm2520_vm1, %v2531_v44  ;;  %v2577_v60 = vrot.slane %v2532_v25, 1  ;;  %v2633_v20 = vrot.slane %v2531_v44, 2  ;;  %2979 = vmatprep.subr.mxu0 %v4586_v19 }
 0x4cd   : > { %v2473_v14 = vpop.f32.mrf.mxu1  ;;  %v2634_v52 = vrot.slane %v2532_v25, 2  ;;  %2980 = vmatpush1.msra.mxu0 %v2900_v22 }
 0x4ce   : > { %v2514_v49 = vmax.f32 %v2498_v18, %v2506_v45  ;;  %v2578_v12 = vsel %vm585_vm5, %v2576_v15, %v2577_v60  ;;  %3009 = vmatprep.subr.mxu0 %v4586_v19 }
 0x4cf   : > { %2725 = vrot.lane.b32.xlu1 %v2578_v12, %s7123_s17  ;;  %v2476_v29 = vpop.f32.mrf.mxu1  ;;  %v2533_v53 = vld [vmem:[#allocation4 + $0x20] sm:$0xff]  ;;  %v2534_v38 = vld [vmem:[#allocation4 + $0x28] sm:$0x3]  ;;  %3010 = vmatpush2.msra.mxu0 %v2917_v63 }
 0x4d0   : > { %2524 = vst.msk [vmem:[#allocation4 + $0x41] sm:$0xff] %vm2520_vm1, %v2514_v49  ;;  %v2507_v61 = vmax.f32 %v6111_v48, %v2476_v29  ;;  %2599 = vrot.lane.b32.xlu0 %v2578_v12, %s4587_s26  ;;  %v2637_v16 = vrot.slane %v2534_v38, 2  ;;  %v2636_v18 = vrot.slane %v2533_v53, 2  ;;  %2551 = vst.msk [vmem:[#allocation5 + $0x20] sm:$0xff] %vm2520_vm1, %v2533_v53  ;;  %v2635_v48 = vsel %vm795_vm4, %v2633_v20, %v2634_v52 }
 0x4d1   : > { %v2478_v27 = vpop.f32.mrf.mxu1  ;;  %3011 = vmatprep.subr.mxu0 %v4586_v19  ;;  %v2579_v13 = vrot.slane %v2533_v53, 1  ;;  %v2580_v0 = vrot.slane %v2534_v38, 1 }
 0x4d2   : > { %v2515_v39 = vmax.f32 %v2499_v58, %v2507_v61  ;;  %v6223_v59 = vsel %vm795_vm4, %v2636_v18, %v2637_v16  ;;  %3012 = vmatpush2.msra.mxu0 %v2916_v6  ;;  %v2830_v6 = vrot.slane %v6128_v36, 1 }
 0x4d3   : > { %2761 = vrot.lane.b32.xlu1 %v2635_v48, %s4591_s12  ;;  %v2481_v2 = vpop.f32.mrf.mxu1  ;;  %2876 = vst.msk [vmem:[#allocation5 + $0x8] sm:$0xff] %vm2520_vm1, %v6223_v59  ;;  %v6228_v1 = vld [vmem:[#allocation4 + $0x30] sm:$0xff]  ;;  %v6230_v5 = vld [vmem:[#allocation4 + $0x38] sm:$0x3] }
 0x4d4   : > { %2525 = vst.msk [vmem:[#allocation4 + $0x51] sm:$0xff] %vm2520_vm1, %v2515_v39  ;;  %v2508_v51 = vmax.f32 %v6117_v42, %v2481_v2  ;;  %2656 = vrot.lane.b32.xlu0 %v2635_v48, %s4588_s21  ;;  %2552 = vst.msk [vmem:[#allocation5 + $0x30] sm:$0xff] %vm2520_vm1, %v6228_v1  ;;  %v2639_v58 = vrot.slane %v6228_v1, 2  ;;  %v2640_v11 = vrot.slane %v6230_v5, 2  ;;  %v2582_v17 = vrot.slane %v6228_v1, 1 }
 0x4d5   : > { %v2483_v9 = vpop.f32.mrf.mxu1 }
 0x4d6   : > { %v2516_v42 = vmax.f32 %v2500_v47, %v2508_v51  ;;  %v6252_v23 = vsel %vm795_vm4, %v2639_v58, %v2640_v11  ;;  %v2829_v58 = vrot.slane %v6122_v33, 1 }
 0x4d7   : > { %2795 = vrot.lane.b32.xlu1 %v2533_v53, %s4592_s24  ;;  %v2486_v21 = vpop.f32.mrf.mxu1  ;;  %v6254_v26 = vld [vmem:[#allocation4 + $0x40] sm:$0xff]  ;;  %v6256_v31 = vld [vmem:[#allocation4 + $0x48] sm:$0x3]  ;;  %2877 = vst.msk [vmem:[#allocation5 + $0x18] sm:$0xff] %vm2520_vm1, %v6252_v23 }
 0x4d8   : > { %2526 = vst.msk [vmem:[#allocation4 + $0x61] sm:$0xff] %vm2520_vm1, %v2516_v42  ;;  %v2509_v34 = vmax.f32 %v6132_v55, %v2486_v21  ;;  %2690 = vrot.lane.b32.xlu0 %v2533_v53, %s4589_s18  ;;  %2553 = vst.msk [vmem:[#allocation5 + $0x40] sm:$0xff] %vm2520_vm1, %v6254_v26  ;;  %v2642_v3 = vrot.slane %v6254_v26, 2  ;;  %v2643_v47 = vrot.slane %v6256_v31, 2  ;;  %v2581_v55 = vsel %vm585_vm5, %v2579_v13, %v2580_v0 }
 0x4d9   : > { %v2488_v24 = vpop.f32.mrf.mxu1  ;;  %v2585_v38 = vrot.slane %v6254_v26, 1  ;;  %v2586_v56 = vrot.slane %v6256_v31, 1  ;;  %v2831_v9 = vsel %vm585_vm5, %v2829_v58, %v2830_v6 }
 0x4da   : > { %v2517_v35 = vmax.f32 %v2501_v30, %v2509_v34  ;;  %v2885_v57 = vld [vmem:[#allocation5 + $0x8] sm:$0xff]  ;;  %v2644_v40 = vsel %vm795_vm4, %v2642_v3, %v2643_v47 }
 0x4db   : > { %4166 = vmatprep.mubr.msk.f32.mxu0 %vm2520_vm1, %v2885_v57  ;;  %2832 = vrot.lane.b32.xlu1 %v2581_v55, %s4593_s25  ;;  %v2491_v10 = vpop.f32.mrf.mxu1  ;;  %v6274_v37 = vld [vmem:[#allocation4 + $0x50] sm:$0xff]  ;;  %v2540_v7 = vld [vmem:[#allocation4 + $0x58] sm:$0x3]  ;;  %2878 = vst.msk [vmem:[#allocation5 + $0x28] sm:$0xff] %vm2520_vm1, %v2644_v40  ;;  %v2587_v61 = vsel %vm585_vm5, %v2585_v38, %v2586_v56 }
 0x4dc   : > { %2527 = vst.msk [vmem:[#allocation4 + $0x71] sm:$0xff] %vm2520_vm1, %v2517_v35  ;;  %v2510_v41 = vmax.f32 %v6147_v62, %v2491_v10  ;;  %2727 = vrot.lane.b32.xlu0 %v2581_v55, %s7123_s17  ;;  %2554 = vst.msk [vmem:[#allocation5 + $0x50] sm:$0xff] %vm2520_vm1, %v6274_v37  ;;  %v2645_v4 = vrot.slane %v6274_v37, 2  ;;  %v2646_v28 = vrot.slane %v2540_v7, 2  ;;  %v2588_v16 = vrot.slane %v6274_v37, 1 }
 0x4dd   : > { %v2493_v30 = vpop.f32.mrf.mxu1  ;;  %v2589_v18 = vrot.slane %v2540_v7, 1 }
 0x4de   : > { %v2518_v50 = vmax.f32 %v2502_v32, %v2510_v41  ;;  %v2647_v43 = vsel %vm795_vm4, %v2645_v4, %v2646_v28  ;;  %v2583_v32 = vrot.slane %v6230_v5, 1  ;;  %v2887_v35 = vld [vmem:[#allocation5 + $0x18] sm:$0xff] }
 0x4df   : > { %2601 = vrot.lane.b32.xlu1 %v2581_v55, %s4587_s26  ;;  %v2541_v62 = vld [vmem:[#allocation4 + $0x60] sm:$0xff]  ;;  %v2542_v44 = vld [vmem:[#allocation4 + $0x68] sm:$0x3]  ;;  %2879 = vst.msk [vmem:[#allocation5 + $0x38] sm:$0xff] %vm2520_vm1, %v2647_v43  ;;  %v2590_v22 = vsel %vm585_vm5, %v2588_v16, %v2589_v18 }
 0x4e0   : > { %2528 = vst.msk [vmem:[#allocation4 + $0x81] sm:$0xff] %vm2520_vm1, %v2518_v50  ;;  %2763 = vrot.lane.b32.xlu0 %v6223_v59, %s4591_s12  ;;  %2555 = vst.msk [vmem:[#allocation5 + $0x60] sm:$0xff] %vm2520_vm1, %v2541_v62  ;;  %v2648_v25 = vrot.slane %v2541_v62, 2  ;;  %v2649_v46 = vrot.slane %v2542_v44, 2  ;;  %v2584_v49 = vsel %vm585_vm5, %v2582_v17, %v2583_v32  ;;  %v2591_v27 = vrot.slane %v2541_v62, 1 }
 0x4e1   : > { %v2592_v39 = vrot.slane %v2542_v44, 1 }
 0x4e2   : > { %v2650_v8 = vsel %vm795_vm4, %v2648_v25, %v2649_v46  ;;  %v2889_v4 = vld [vmem:[#allocation5 + $0x28] sm:$0xff] }
 0x4e3   : > { %2658 = vrot.lane.b32.xlu1 %v6223_v59, %s4588_s21  ;;  %2880 = vst.msk [vmem:[#allocation5 + $0x48] sm:$0xff] %vm2520_vm1, %v2650_v8  ;;  %v2543_v45 = vld [vmem:[#allocation4 + $0x70] sm:$0xff]  ;;  %v2544_v15 = vld [vmem:[#allocation4 + $0x78] sm:$0x3]  ;;  %v2593_v48 = vsel %vm585_vm5, %v2591_v27, %v2592_v39 }
 0x4e4   : > { %2797 = vrot.lane.b32.xlu0 %v6228_v1, %s4592_s24  ;;  %2556 = vst.msk [vmem:[#allocation5 + $0x70] sm:$0xff] %vm2520_vm1, %v2543_v45  ;;  %v2651_v60 = vrot.slane %v2543_v45, 2  ;;  %v2652_v54 = vrot.slane %v2544_v15, 2  ;;  %v2594_v59 = vrot.slane %v2543_v45, 1  ;;  %v2595_v2 = vrot.slane %v2544_v15, 1 }
 0x4e6   : > { %v2653_v14 = vsel %vm795_vm4, %v2651_v60, %v2652_v54  ;;  %v2891_v17 = vld [vmem:[#allocation5 + $0x38] sm:$0xff] }
 0x4e7   : > { %2692 = vrot.lane.b32.xlu1 %v6228_v1, %s4589_s18  ;;  %2881 = vst.msk [vmem:[#allocation5 + $0x58] sm:$0xff] %vm2520_vm1, %v2653_v14  ;;  %v2545_v20 = vld [vmem:[#allocation4 + $0x80] sm:$0xff]  ;;  %v2546_v12 = vld [vmem:[#allocation4 + $0x88] sm:$0x3]  ;;  %v2596_v1 = vsel %vm585_vm5, %v2594_v59, %v2595_v2 }
 0x4e8   : > { %2834 = vrot.lane.b32.xlu0 %v2584_v49, %s4593_s25  ;;  %v2758_v52 = vrot.slane %v2545_v20, 2  ;;  %v2759_v29 = vrot.slane %v2546_v12, 2  ;;  %v2722_v5 = vrot.slane %v2545_v20, 1  ;;  %v2723_v63 = vrot.slane %v2546_v12, 1 }
 0x4ea   : > { %v2760_v53 = vsel %vm795_vm4, %v2758_v52, %v2759_v29  ;;  %v2724_v51 = vsel %vm585_vm5, %v2722_v5, %v2723_v63  ;;  %vm2712_vm4 = vcmask 523648   ;;  %vm2819_vm5 = vcmask 917248  }
 0x4eb   : > { %2729 = vrot.lane.b32.xlu1 %v2584_v49, %s7123_s17  ;;  %2882 = vst.msk [vmem:[#allocation5 + $0x68] sm:$0xff] %vm2520_vm1, %v2760_v53 }
 0x4ec   : > { %2603 = vrot.lane.b32.xlu0 %v2584_v49, %s4587_s26 }
 0x4ef   : > { %2765 = vrot.lane.b32.xlu1 %v6252_v23, %s4591_s12 }
 0x4f0   : > { %2660 = vrot.lane.b32.xlu0 %v6252_v23, %s4588_s21 }
 0x4f2   : > { %v2897_v63 = vld [vmem:[#allocation5 + $0x68] sm:$0xff] }
 0x4f3   : > { %2799 = vrot.lane.b32.xlu1 %v6254_v26, %s4592_s24 }
 0x4f4   : > { %2694 = vrot.lane.b32.xlu0 %v6254_v26, %s4589_s18 }
 0x4f7   : > { %2836 = vrot.lane.b32.xlu1 %v2587_v61, %s4593_s25 }
 0x4f8   : > { %2731 = vrot.lane.b32.xlu0 %v2587_v61, %s7123_s17 }
 0x4fb   : > { %2605 = vrot.lane.b32.xlu1 %v2587_v61, %s4587_s26 }
 0x4fc   : > { %2767 = vrot.lane.b32.xlu0 %v2644_v40, %s4591_s12 }
 0x4ff   : > { %2662 = vrot.lane.b32.xlu1 %v2644_v40, %s4588_s21 }
 0x500   : > { %2801 = vrot.lane.b32.xlu0 %v6274_v37, %s4592_s24 }
 0x503   : > { %2696 = vrot.lane.b32.xlu1 %v6274_v37, %s4589_s18 }
 0x504   : > { %2838 = vrot.lane.b32.xlu0 %v2590_v22, %s4593_s25 }
 0x507   : > { %2733 = vrot.lane.b32.xlu1 %v2590_v22, %s7123_s17 }
 0x508   : > { %2607 = vrot.lane.b32.xlu0 %v2590_v22, %s4587_s26  ;;  %v2895_v22 = vld [vmem:[#allocation5 + $0x58] sm:$0xff] }
 0x50b   : > { %2769 = vrot.lane.b32.xlu1 %v2647_v43, %s4591_s12 }
 0x50c   : > { %2664 = vrot.lane.b32.xlu0 %v2647_v43, %s4588_s21 }
 0x50f   : > { %2803 = vrot.lane.b32.xlu1 %v2541_v62, %s4592_s24 }
 0x510   : > { %2698 = vrot.lane.b32.xlu0 %v2541_v62, %s4589_s18 }
 0x513   : > { %2840 = vrot.lane.b32.xlu1 %v2593_v48, %s4593_s25 }
 0x514   : > { %2735 = vrot.lane.b32.xlu0 %v2593_v48, %s7123_s17 }
 0x517   : > { %2609 = vrot.lane.b32.xlu1 %v2593_v48, %s4587_s26 }
 0x518   : > { %2771 = vrot.lane.b32.xlu0 %v2650_v8, %s4591_s12 }
 0x51b   : > { %2666 = vrot.lane.b32.xlu1 %v2650_v8, %s4588_s21 }
 0x51c   : > { %2805 = vrot.lane.b32.xlu0 %v2543_v45, %s4592_s24 }
 0x51f   : > { %2700 = vrot.lane.b32.xlu1 %v2543_v45, %s4589_s18 }
 0x520   : > { %2842 = vrot.lane.b32.xlu0 %v2596_v1, %s4593_s25 }
 0x523   : > { %2737 = vrot.lane.b32.xlu1 %v2596_v1, %s7123_s17 }
 0x524   : > { %2611 = vrot.lane.b32.xlu0 %v2596_v1, %s4587_s26 }
 0x527   : > { %2773 = vrot.lane.b32.xlu1 %v2653_v14, %s4591_s12 }
 0x528   : > { %2668 = vrot.lane.b32.xlu0 %v2653_v14, %s4588_s21 }
 0x52b   : > { %2807 = vrot.lane.b32.xlu1 %v2545_v20, %s4592_s24 }
 0x52c   : > { %2702 = vrot.lane.b32.xlu0 %v2545_v20, %s4589_s18  ;;  %v2893_v20 = vld [vmem:[#allocation5 + $0x48] sm:$0xff]  ;;  %s7137_s18 = sand.u32 1, %s4567_s28  }
 0x52d   : > { %s4057_s10 = scalar_lea.sflag [#allocation8], %s7137_s18 }
 0x52f   : > { %2844 = vrot.lane.b32.xlu1 %v2724_v51, %s4593_s25 }
 0x530   : > { %2739 = vrot.lane.b32.xlu0 %v2724_v51, %s7123_s17 }
 0x533   : > { %2775 = vrot.lane.b32.xlu1 %v2760_v53, %s4591_s12 }
 0x534   : > { %2809 = vrot.lane.b32.xlu0 %v6122_v33, %s4592_s24 }
 0x537   : > { %2846 = vrot.lane.b32.xlu1 %v2831_v9, %s4593_s25 }
 0x53e   : > { %v2689_v11 = vpop.permute.xlu0 %2688 }
 0x53f   : > { %2713 = vst.msk [vmem:[#allocation5] sm:$0xff] %vm2712_vm4, %v2689_v11 }
 0x541   : > { %v2726_v42 = vpop.permute.xlu1 %2725 }
 0x542   : > { %2750 = vst.msk [vmem:[#allocation5] sm:$0xff] %vm2749_vm6, %v2726_v42  ;;  %v2600_v13 = vpop.permute.xlu0 %2599 }
 0x543   : > { %2623 = vst.msk [vmem:[#allocation5 + $0x10] sm:$0xff] %vm2621_vm2, %v2600_v13  ;;  %v2899_v13 = vld [vmem:[#allocation5 + $0x78] sm:$0xff] }
 0x545   : > { %v2762_v36 = vpop.permute.xlu1 %2761 }
 0x546   : > { %2786 = vst.msk [vmem:[#allocation5] sm:$0xff] %vm2785_vm7, %v2762_v36  ;;  %v2657_v33 = vpop.permute.xlu0 %2656 }
 0x547   : > { %2680 = vst.msk [vmem:[#allocation5 + $0x10] sm:$0xff] %vm2678_vm3, %v2657_v33 }
 0x549   : > { %v2796_v0 = vpop.permute.xlu1 %2795 }
 0x54a   : > { %2820 = vst.msk [vmem:[#allocation5] sm:$0xff] %vm2819_vm5, %v2796_v0  ;;  %v2691_v21 = vpop.permute.xlu0 %2690 }
 0x54b   : > { %2714 = vst.msk [vmem:[#allocation5 + $0x10] sm:$0xff] %vm2712_vm4, %v2691_v21  ;;  %v4165_v21 = vld [vmem:[%s7114_s5] ss:$0 sm:$0xff] }
 0x54d   : > { %v2833_v23 = vpop.permute.xlu1 %2832 }
 0x54e   : > { %2857 = vst.msk [vmem:[#allocation5] sm:$0xff] %vm2856_vm8, %v2833_v23  ;;  %v2728_v26 = vpop.permute.xlu0 %2727 }
 0x54f   : > { %2751 = vst.msk [vmem:[#allocation5 + $0x10] sm:$0xff] %vm2749_vm6, %v2728_v26 }
 0x551   : > { %v2602_v31 = vpop.permute.xlu1 %2601 }
 0x552   : > { %2624 = vst.msk [vmem:[#allocation5 + $0x20] sm:$0xff] %vm2621_vm2, %v2602_v31  ;;  %v2764_v34 = vpop.permute.xlu0 %2763 }
 0x553   : > { %2787 = vst.msk [vmem:[#allocation5 + $0x10] sm:$0xff] %vm2785_vm7, %v2764_v34 }
 0x555   : > { %v2659_v3 = vpop.permute.xlu1 %2658  ;;  %v2884_v24 = vld [vmem:[#allocation5] sm:$0xff] }
 0x556   : > { %2681 = vst.msk [vmem:[#allocation5 + $0x20] sm:$0xff] %vm2678_vm3, %v2659_v3  ;;  %3014 = vmatmul.mubr.f32.vlgmr.msra.gmra.mxu0 %v2884_v24  ;;  %v2798_v47 = vpop.permute.xlu0 %2797 }
 0x557   : > { %2821 = vst.msk [vmem:[#allocation5 + $0x10] sm:$0xff] %vm2819_vm5, %v2798_v47  ;;  %4167 = vmatprep.mubr.msk.f32.mxu0 %vm2520_vm1, %v2887_v35 }
 0x559   : > { %v2693_v57 = vpop.permute.xlu1 %2692 }
 0x55a   : > { %2715 = vst.msk [vmem:[#allocation5 + $0x20] sm:$0xff] %vm2712_vm4, %v2693_v57  ;;  %v2835_v55 = vpop.permute.xlu0 %2834 }
 0x55b   : > { %2858 = vst.msk [vmem:[#allocation5 + $0x10] sm:$0xff] %vm2856_vm8, %v2835_v55 }
 0x55d   : > { %v2730_v10 = vpop.permute.xlu1 %2729 }
 0x55e   : > { %2752 = vst.msk [vmem:[#allocation5 + $0x20] sm:$0xff] %vm2749_vm6, %v2730_v10  ;;  %v2604_v40 = vpop.permute.xlu0 %2603 }
 0x55f   : > { %2625 = vst.msk [vmem:[#allocation5 + $0x30] sm:$0xff] %vm2621_vm2, %v2604_v40 }
 0x561   : > { %v2766_v37 = vpop.permute.xlu1 %2765 }
 0x562   : > { %2788 = vst.msk [vmem:[#allocation5 + $0x20] sm:$0xff] %vm2785_vm7, %v2766_v37  ;;  %v2661_v7 = vpop.permute.xlu0 %2660  ;;  %v2886_v41 = vld [vmem:[#allocation5 + $0x10] sm:$0xff] }
 0x563   : > { %2682 = vst.msk [vmem:[#allocation5 + $0x30] sm:$0xff] %vm2678_vm3, %v2661_v7  ;;  %3019 = vmatmul.mubr.f32.gmra.mxu0 %v2886_v41 }
 0x564   : > { %4168 = vmatprep.mubr.msk.f32.mxu0 %vm2520_vm1, %v2889_v4 }
 0x565   : > { %v2800_v28 = vpop.permute.xlu1 %2799 }
 0x566   : > { %2822 = vst.msk [vmem:[#allocation5 + $0x20] sm:$0xff] %vm2819_vm5, %v2800_v28  ;;  %v2695_v30 = vpop.permute.xlu0 %2694 }
 0x567   : > { %2716 = vst.msk [vmem:[#allocation5 + $0x30] sm:$0xff] %vm2712_vm4, %v2695_v30 }
 0x569   : > { %v2837_v50 = vpop.permute.xlu1 %2836 }
 0x56a   : > { %2859 = vst.msk [vmem:[#allocation5 + $0x20] sm:$0xff] %vm2856_vm8, %v2837_v50  ;;  %v2732_v43 = vpop.permute.xlu0 %2731 }
 0x56b   : > { %2753 = vst.msk [vmem:[#allocation5 + $0x30] sm:$0xff] %vm2749_vm6, %v2732_v43 }
 0x56d   : > { %v2606_v62 = vpop.permute.xlu1 %2605 }
 0x56e   : > { %2626 = vst.msk [vmem:[#allocation5 + $0x40] sm:$0xff] %vm2621_vm2, %v2606_v62  ;;  %v2768_v44 = vpop.permute.xlu0 %2767 }
 0x56f   : > { %2789 = vst.msk [vmem:[#allocation5 + $0x30] sm:$0xff] %vm2785_vm7, %v2768_v44 }
 0x571   : > { %v2663_v25 = vpop.permute.xlu1 %2662  ;;  %v2888_v46 = vld [vmem:[#allocation5 + $0x20] sm:$0xff] }
 0x572   : > { %2683 = vst.msk [vmem:[#allocation5 + $0x40] sm:$0xff] %vm2678_vm3, %v2663_v25  ;;  %3024 = vmatmul.mubr.f32.gmra.mxu0 %v2888_v46  ;;  %v2802_v8 = vpop.permute.xlu0 %2801 }
 0x573   : > { %2823 = vst.msk [vmem:[#allocation5 + $0x30] sm:$0xff] %vm2819_vm5, %v2802_v8  ;;  %4169 = vmatprep.mubr.msk.f32.mxu0 %vm2520_vm1, %v2891_v17 }
 0x575   : > { %v2697_v32 = vpop.permute.xlu1 %2696 }
 0x576   : > { %2717 = vst.msk [vmem:[#allocation5 + $0x40] sm:$0xff] %vm2712_vm4, %v2697_v32  ;;  %v2839_v45 = vpop.permute.xlu0 %2838 }
 0x577   : > { %2860 = vst.msk [vmem:[#allocation5 + $0x30] sm:$0xff] %vm2856_vm8, %v2839_v45 }
 0x579   : > { %v2734_v15 = vpop.permute.xlu1 %2733 }
 0x57a   : > { %2754 = vst.msk [vmem:[#allocation5 + $0x40] sm:$0xff] %vm2749_vm6, %v2734_v15  ;;  %v2608_v60 = vpop.permute.xlu0 %2607 }
 0x57b   : > { %2627 = vst.msk [vmem:[#allocation5 + $0x50] sm:$0xff] %vm2621_vm2, %v2608_v60 }
 0x57d   : > { %v2770_v54 = vpop.permute.xlu1 %2769 }
 0x57e   : > { %2790 = vst.msk [vmem:[#allocation5 + $0x40] sm:$0xff] %vm2785_vm7, %v2770_v54  ;;  %v2665_v14 = vpop.permute.xlu0 %2664  ;;  %v2890_v49 = vld [vmem:[#allocation5 + $0x30] sm:$0xff] }
 0x57f   : > { %2684 = vst.msk [vmem:[#allocation5 + $0x50] sm:$0xff] %vm2678_vm3, %v2665_v14  ;;  %3029 = vmatmul.mubr.f32.gmra.mxu0 %v2890_v49 }
 0x580   : > { %4170 = vmatprep.mubr.msk.f32.mxu0 %vm2520_vm1, %v2893_v20 }
 0x581   : > { %v2804_v12 = vpop.permute.xlu1 %2803 }
 0x582   : > { %2824 = vst.msk [vmem:[#allocation5 + $0x40] sm:$0xff] %vm2819_vm5, %v2804_v12  ;;  %v2699_v52 = vpop.permute.xlu0 %2698 }
 0x583   : > { %2718 = vst.msk [vmem:[#allocation5 + $0x50] sm:$0xff] %vm2712_vm4, %v2699_v52 }
 0x585   : > { %v2841_v29 = vpop.permute.xlu1 %2840 }
 0x586   : > { %2861 = vst.msk [vmem:[#allocation5 + $0x40] sm:$0xff] %vm2856_vm8, %v2841_v29  ;;  %v2736_v53 = vpop.permute.xlu0 %2735 }
 0x587   : > { %2755 = vst.msk [vmem:[#allocation5 + $0x50] sm:$0xff] %vm2749_vm6, %v2736_v53 }
 0x589   : > { %v2610_v38 = vpop.permute.xlu1 %2609 }
 0x58a   : > { %2628 = vst.msk [vmem:[#allocation5 + $0x60] sm:$0xff] %vm2621_vm2, %v2610_v38  ;;  %v2772_v56 = vpop.permute.xlu0 %2771 }
 0x58b   : > { %2791 = vst.msk [vmem:[#allocation5 + $0x50] sm:$0xff] %vm2785_vm7, %v2772_v56 }
 0x58d   : > { %v2667_v61 = vpop.permute.xlu1 %2666  ;;  %v2892_v16 = vld [vmem:[#allocation5 + $0x40] sm:$0xff] }
 0x58e   : > { %2685 = vst.msk [vmem:[#allocation5 + $0x60] sm:$0xff] %vm2678_vm3, %v2667_v61  ;;  %3034 = vmatmul.mubr.f32.gmra.mxu0 %v2892_v16  ;;  %v2806_v18 = vpop.permute.xlu0 %2805 }
 0x58f   : > { %2825 = vst.msk [vmem:[#allocation5 + $0x50] sm:$0xff] %vm2819_vm5, %v2806_v18  ;;  %4171 = vmatprep.mubr.msk.f32.mxu0 %vm2520_vm1, %v2895_v22 }
 0x591   : > { %v2701_v27 = vpop.permute.xlu1 %2700 }
 0x592   : > { %2719 = vst.msk [vmem:[#allocation5 + $0x60] sm:$0xff] %vm2712_vm4, %v2701_v27  ;;  %v2843_v39 = vpop.permute.xlu0 %2842 }
 0x593   : > { %2862 = vst.msk [vmem:[#allocation5 + $0x50] sm:$0xff] %vm2856_vm8, %v2843_v39 }
 0x595   : > { %v2738_v48 = vpop.permute.xlu1 %2737 }
 0x596   : > { %2756 = vst.msk [vmem:[#allocation5 + $0x60] sm:$0xff] %vm2749_vm6, %v2738_v48  ;;  %v2612_v59 = vpop.permute.xlu0 %2611 }
 0x597   : > { %2629 = vst.msk [vmem:[#allocation5 + $0x70] sm:$0xff] %vm2621_vm2, %v2612_v59 }
 0x599   : > { %v2774_v2 = vpop.permute.xlu1 %2773 }
 0x59a   : > { %2792 = vst.msk [vmem:[#allocation5 + $0x60] sm:$0xff] %vm2785_vm7, %v2774_v2  ;;  %v2669_v1 = vpop.permute.xlu0 %2668  ;;  %v2894_v5 = vld [vmem:[#allocation5 + $0x50] sm:$0xff] }
 0x59b   : > { %2686 = vst.msk [vmem:[#allocation5 + $0x70] sm:$0xff] %vm2678_vm3, %v2669_v1  ;;  %3039 = vmatmul.mubr.f32.gmra.mxu0 %v2894_v5  ;;  %v3280_v5 = vlaneseq }
 0x59c   : > { %4172 = vmatprep.mubr.msk.f32.mxu0 %vm2520_vm1, %v2897_v63  ;;  %v4594_v63 = vmov 1966171168  }
 0x59d   : > { %v2808_v51 = vpop.permute.xlu1 %2807  ;;  %vm6450_vm2 = vcmp.lt.s32.totalorder %v3280_v5, 32 }
 0x59e   : > { %2826 = vst.msk [vmem:[#allocation5 + $0x60] sm:$0xff] %vm2819_vm5, %v2808_v51  ;;  %v2703_v58 = vpop.permute.xlu0 %2702  ;;  %v3287_v51 = vunpack.c.l.s4 %v4594_v63 }
 0x59f   : > { %2720 = vst.msk [vmem:[#allocation5 + $0x70] sm:$0xff] %vm2712_vm4, %v2703_v58 }
 0x5a1   : > { %v2845_v6 = vpop.permute.xlu1 %2844 }
 0x5a2   : > { %2863 = vst.msk [vmem:[#allocation5 + $0x60] sm:$0xff] %vm2856_vm8, %v2845_v6  ;;  %v2740_v9 = vpop.permute.xlu0 %2739 }
 0x5a3   : > { %2757 = vst.msk [vmem:[#allocation5 + $0x70] sm:$0xff] %vm2749_vm6, %v2740_v9  ;;  %v3288_v9 = vunpack.c.0.s8 %v3287_v51 }
 0x5a5   : > { %v2776_v11 = vpop.permute.xlu1 %2775 }
 0x5a6   : > { %2793 = vst.msk [vmem:[#allocation5 + $0x70] sm:$0xff] %vm2785_vm7, %v2776_v11  ;;  %v2810_v42 = vpop.permute.xlu0 %2809  ;;  %v6440_v11 = vshrl.u32 %v3280_v5, 7 }
 0x5a7   : > { %2827 = vst.msk [vmem:[#allocation5 + $0x70] sm:$0xff] %vm2819_vm5, %v2810_v42 }
 0x5a9   : > { %v2847_v36 = vpop.permute.xlu1 %2846  ;;  %v2896_v33 = vld [vmem:[#allocation5 + $0x60] sm:$0xff] }
 0x5aa   : > { %2864 = vst.msk [vmem:[#allocation5 + $0x70] sm:$0xff] %vm2856_vm8, %v2847_v36  ;;  %3044 = vmatmul.mubr.f32.gmra.mxu0 %v2896_v33  ;;  %v6445_v33 = vsub.s32 %v3288_v9, %v6440_v11 }
 0x5ab   : > { %4173 = vmatprep.mubr.msk.f32.mxu0 %vm2520_vm1, %v2899_v13 }
 0x5b1   : > { %v2898_v0 = vld [vmem:[#allocation5 + $0x70] sm:$0xff] }
 0x5b2   : > { %3049 = vmatmul.mubr.f32.gmra.mxu0 %v2898_v0 }
 0x616   : > { %v3015_v23 = vpop.f32.mrf.mxu0 }
 0x617   : > { %v3016_v26 = vadd.f32 %v4165_v21, %v3015_v23 }
 0x618   : > { %v3017_v31 = vpop.f32.mrf.mxu0 }
 0x619   : > { %v3054_v34 = vmax.f32 %v3016_v26, 0.0 }
 0x61b   : > { %3062 = vxpose.xlu0.b32.start [1/8] (short) (narrow) %v3054_v34, 32 }
 0x623   : > { %v3020_v3 = vpop.f32.mrf.mxu0 }
 0x624   : > { %v3021_v24 = vadd.f32 %v4165_v21, %v3020_v3 }
 0x625   : > { %v3022_v47 = vpop.f32.mrf.mxu0 }
 0x626   : > { %v3055_v35 = vmax.f32 %v3021_v24, 0.0 }
 0x628   : > { %3063 = vxpose.xlu0.b32.cont [2/8] (short) (narrow) %v3055_v35, 32 }
 0x632   : > { %v3025_v57 = vpop.f32.mrf.mxu0 }
 0x633   : > { %v3026_v55 = vadd.f32 %v4165_v21, %v3025_v57 }
 0x634   : > { %v3027_v10 = vpop.f32.mrf.mxu0 }
 0x635   : > { %v3056_v40 = vmax.f32 %v3026_v55, 0.0 }
 0x637   : > { %3064 = vxpose.xlu0.b32.cont [3/8] (short) (narrow) %v3056_v40, 32 }
 0x63f   : > { %v3030_v37 = vpop.f32.mrf.mxu0 }
 0x640   : > { %v3031_v7 = vadd.f32 %v4165_v21, %v3030_v37 }
 0x641   : > { %v3032_v41 = vpop.f32.mrf.mxu0 }
 0x642   : > { %v3057_v4 = vmax.f32 %v3031_v7, 0.0 }
 0x644   : > { %3065 = vxpose.xlu0.b32.cont [4/8] (short) (narrow) %v3057_v4, 32 }
 0x64e   : > { %v3035_v28 = vpop.f32.mrf.mxu0 }
 0x64f   : > { %v3036_v30 = vadd.f32 %v4165_v21, %v3035_v28 }
 0x650   : > { %v3037_v50 = vpop.f32.mrf.mxu0 }
 0x651   : > { %v3058_v43 = vmax.f32 %v3036_v30, 0.0 }
 0x653   : > { %3066 = vxpose.xlu0.b32.cont [5/8] (short) (narrow) %v3058_v43, 32 }
 0x65b   : > { %v3040_v62 = vpop.f32.mrf.mxu0 }
 0x65c   : > { %v3041_v44 = vadd.f32 %v4165_v21, %v3040_v62 }
 0x65d   : > { %v3042_v25 = vpop.f32.mrf.mxu0 }
 0x65e   : > { %v3059_v46 = vmax.f32 %v3041_v44, 0.0 }
 0x660   : > { %3067 = vxpose.xlu0.b32.cont [6/8] (short) (narrow) %v3059_v46, 32 }
 0x66a   : > { %v3045_v8 = vpop.f32.mrf.mxu0 }
 0x66b   : > { %v3046_v17 = vadd.f32 %v4165_v21, %v3045_v8 }
 0x66c   : > { %v3047_v32 = vpop.f32.mrf.mxu0 }
 0x66d   : > { %v3060_v45 = vmax.f32 %v3046_v17, 0.0 }
 0x66f   : > { %3068 = vxpose.xlu0.b32.cont [7/8] (short) (narrow) %v3060_v45, 32 }
 0x672   : > { %v3050_v15 = vpop.f32.mrf.mxu0 }
 0x673   : > { %v3051_v60 = vadd.f32 %v4165_v21, %v3050_v15 }
 0x674   : > { %v3052_v54 = vpop.f32.mrf.mxu0 }
 0x675   : > { %v3061_v14 = vmax.f32 %v3051_v60, 0.0 }
 0x677   : > { %3069 = vxpose.xlu0.b32.end [8/8] (short) (narrow) %v3061_v14, 32  ;;  %4426 = vmatprep.subr.mxu0 %v3061_v14 }
 0x678   : > { %4427 = vmatpush3.msra.mxu0 %v3061_v14 }
 0x679   : > { %4428 = vmatprep.subr.mxu0 %v3060_v45 }
 0x67a   : > { %4429 = vmatpush3.msra.mxu0 %v3060_v45 }
 0x67b   : > { %4430 = vmatprep.subr.mxu0 %v3059_v46 }
 0x67c   : > { %4431 = vmatpush3.msra.mxu0 %v3059_v46 }
 0x67d   : > { %4432 = vmatprep.subr.mxu0 %v3058_v43 }
 0x67e   : > { %4433 = vmatpush3.msra.mxu0 %v3058_v43 }
 0x67f   : > { %4434 = vmatprep.subr.mxu0 %v3057_v4 }
 0x680   : > { %4435 = vmatpush3.msra.mxu0 %v3057_v4 }
 0x681   : > { %4436 = vmatprep.subr.mxu0 %v3056_v40 }
 0x682   : > { %4437 = vmatpush3.msra.mxu0 %v3056_v40 }
 0x683   : > { %4438 = vmatprep.subr.mxu0 %v3055_v35 }
 0x684   : > { %4439 = vmatpush3.msra.mxu0 %v3055_v35 }
 0x685   : > { %4440 = vmatprep.subr.mxu0 %v3054_v34 }
 0x686   : > { %4441 = vmatpush3.msra.mxu0 %v3054_v34 }
 0x6d7   : > { %v3078_v49 = vpop.trf.xlu0 }
 0x6d8   : > { %4442 = vmatprep.mubr.msk.f32.mxu0 %vm3094_vm9, %v3078_v49 }
 0x6db   : > { %v3079_v20 = vpop.trf.xlu0 }
 0x6dc   : > { %4443 = vmatmul.mubr.msk.f32.vlgmr.msra.gmra.mxu0 %vm3094_vm9, %v3079_v20 }
 0x6df   : > { %v3080_v12 = vpop.trf.xlu0 }
 0x6e0   : > { %4445 = vmatprep.mubr.msk.f32.mxu0 %vm3094_vm9, %v3080_v12 }
 0x6e3   : > { %v3081_v52 = vpop.trf.xlu0 }
 0x6e4   : > { %4446 = vmatmul.mubr.msk.f32.gmra.mxu0 %vm3094_vm9, %v3081_v52 }
 0x79c   : > { %v4444_v29 = vpop.f32.mrf.mxu0 }
 0x79d   : > { %v3193_v53 = vmul.f32 0.015625, %v4444_v29 }
 0x79e   : > { %v3173_v38 = vpop.f32.mrf.mxu0 }
 0x79f   : > { %v3213_v56 = vand.u32 2147483647, %v3193_v53  ;;  %v3192_v61 = vmul.f32 0.015625, %v3173_v38  ;;  %vm3201_vm10 = vcmp.lt.f32.partialorder %v3193_v53, 0.0  ;;  %vm3197_vm13 = vcmp.gt.f32.partialorder %v3193_v53, 0.0 }
 0x7a0   : > { %v3205_v13 = vsel %vm3201_vm10, -1.0, %v4586_v19 }
 0x7a1   : > { %v3217_v16 = vadd.f32 1e-08, %v3213_v56  ;;  %v3212_v18 = vand.u32 2147483647, %v3192_v61  ;;  %vm3200_vm11 = vcmp.lt.f32.partialorder %v3192_v61, 0.0  ;;  %vm3196_vm15 = vcmp.gt.f32.partialorder %v3192_v61, 0.0 }
 0x7a2   : > { %v3204_v21 = vsel %vm3200_vm11, -1.0, %v4586_v19  ;;  %v3209_v34 = vsel %vm3197_vm13, 1.0, %v3205_v13  ;;  %vm3256_vm11 = vcmask 261120   ;;  %v3697_v13 = vld [vmem:[%s7115_s6 + $0x2f8] sm:$0xff]  ;;  %vm3312_vm13 = vcmp.lt.s32.totalorder %v3280_v5, 64 }
 0x7a3   : > { %4505 = vrsqrt.f32 %v3217_v16  ;;  %v3216_v22 = vadd.f32 1e-08, %v3212_v18  ;;  %vm3229_vm14 = vcmp.eq.f32.partialorder %v3217_v16, inf  ;;  %v3232_v0 = vand.u32 2147483648, %v3217_v16  ;;  %4300 = vmatprep.subr.mxu1 %v3697_v13  ;;  %v3674_v13 = vld [vmem:[%s7115_s6 + $0x240] sm:$0xff] }
 0x7a4   : > { %v4447_v27 = vpop.f32.mrf.mxu0  ;;  %vm3231_vm0 = vcmp.eq.f32.partialorder %v3217_v16, 0.0  ;;  %v3208_v55 = vsel %vm3196_vm15, 1.0, %v3204_v21  ;;  %v3681_v21 = vld [vmem:[%s7115_s6 + $0x278] sm:$0xff]  ;;  %vm3319_vm15 = vcmp.ge.s32.totalorder %v3280_v5, 64 }
 0x7a5   : > { %v3195_v39 = vmul.f32 0.015625, %v4447_v27  ;;  %4507 = vrsqrt.f32 %v3216_v22  ;;  %vm3222_vm3 = vcmp.eq.f32.partialorder %v3216_v22, inf  ;;  %v3225_v57 = vand.u32 2147483648, %v3216_v22  ;;  %4301 = vmatpush3.msra.mxu1 %v3681_v21 }
 0x7a6   : > { %v3183_v48 = vpop.f32.mrf.mxu0  ;;  %vm3224_vm4 = vcmp.eq.f32.partialorder %v3216_v22, 0.0 }
 0x7a7   : > { %v3215_v59 = vand.u32 2147483647, %v3195_v39  ;;  %v6431_v2 = vmul.f32 0.015625, %v3183_v48  ;;  %vm3203_vm12 = vcmp.lt.f32.partialorder %v3195_v39, 0.0  ;;  %vm3199_vm1 = vcmp.gt.f32.partialorder %v3195_v39, 0.0 }
 0x7a8   : > { %v3207_v31 = vsel %vm3203_vm12, -1.0, %v4586_v19  ;;  %vm3311_vm12 = vcmp.ge.s32.totalorder %v3280_v5, 32 }
 0x7a9   : > { %v6433_v1 = vadd.f32 1e-08, %v3215_v59  ;;  %v3214_v58 = vand.u32 2147483647, %v6431_v2  ;;  %v3211_v40 = vsel %vm3199_vm1, 1.0, %v3207_v31  ;;  %vm3202_vm6 = vcmp.lt.f32.partialorder %v6431_v2, 0.0 }
 0x7aa   : > { %vm3198_vm5 = vcmp.gt.f32.partialorder %v6431_v2, 0.0  ;;  %v3206_v44 = vsel %vm3202_vm6, -1.0, %v4586_v19  ;;  %v3696_v31 = vld [vmem:[%s7115_s6 + $0x2f0] sm:$0xff]  ;;  %vm4054_vm6 = vcmask 73728  }
 0x7ab   : > { %4509 = vrsqrt.f32 %v6433_v1  ;;  %v6437_v6 = vadd.f32 1e-08, %v3214_v58  ;;  %vm3243_vm7 = vcmp.eq.f32.partialorder %v6433_v1, inf  ;;  %v3246_v30 = vand.u32 2147483648, %v6433_v1  ;;  %4302 = vmatprep.subr.mxu1 %v3696_v31  ;;  %v3608_v31 = vld [vmem:[%s7115_s6 + $0x30] sm:$0xff] }
 0x7ac   : > { %vm3245_vm8 = vcmp.eq.f32.partialorder %v6433_v1, 0.0  ;;  %v3210_v14 = vsel %vm3198_vm5, 1.0, %v3206_v44  ;;  %v3678_v44 = vld [vmem:[%s7115_s6 + $0x260] sm:$0xff] }
 0x7ad   : > { %4511 = vrsqrt.f32 %v6437_v6  ;;  %vm3236_vm9 = vcmp.eq.f32.partialorder %v6437_v6, inf  ;;  %v3239_v25 = vand.u32 2147483648, %v6437_v6  ;;  %vm3238_vm10 = vcmp.eq.f32.partialorder %v6437_v6, 0.0 }
 0x7b0   : > { %v4506_v42 = vpop.eup %4505 }
 0x7b1   : > { %v3228_v36 = vmul.f32 %v4506_v42, %v3217_v16 }
 0x7b2   : > { %v4508_v23 = vpop.eup %4507 }
 0x7b3   : > { %v3230_v26 = vsel %vm3229_vm14, %v3217_v16, %v3228_v36  ;;  %v3221_v24 = vmul.f32 %v4508_v23, %v3216_v22  ;;  %vm6796_vm14 = vmand %vm3311_vm12, %vm3312_vm13 }
 0x7b4   : > { %v3233_v3 = vsel %vm3231_vm0, %v3232_v0, %v3230_v26  ;;  %vm3320_vm0 = vcmp.lt.s32.totalorder %v3280_v5, 96 }
 0x7b5   : > { %v6454_v35 = vmul.f32 %v3233_v3, %v3209_v34  ;;  %v3223_v10 = vsel %vm3222_vm3, %v3216_v22, %v3221_v24  ;;  %v3680_v24 = vld [vmem:[%s7115_s6 + $0x270] sm:$0xff]  ;;  %vm6804_vm1 = vmand %vm3319_vm15, %vm3320_vm0  ;;  %vm3328_vm3 = vcmp.lt.s32.totalorder %v3280_v5, 128 }
 0x7b6   : > { %v3226_v37 = vsel %vm3224_vm4, %v3225_v57, %v3223_v10  ;;  %4303 = vmatpush3.msra.mxu1 %v3680_v24  ;;  %v3695_v10 = vld [vmem:[%s7115_s6 + $0x2e8] sm:$0xff] }
 0x7b7   : > { %v3378_v7 = vrot.slane %v6454_v35, %v6445_v33  ;;  %v3408_v41 = vcombine.high %v6454_v35, %v6454_v35  ;;  %3370 = vst.msk [vmem:[#allocation6 + $0x2] sm:$0x1] %vm6450_vm2, %v6454_v35  ;;  %v3248_v28 = vmul.f32 %v3226_v37, %v3208_v55  ;;  %4304 = vmatprep.subr.mxu1 %v3695_v10  ;;  %v3607_v24 = vld [vmem:[%s7115_s6 + $0x28] sm:$0xff] }
 0x7b8   : > { %v4510_v4 = vpop.eup %4509  ;;  %v3671_v10 = vld [vmem:[%s7115_s6 + $0x228] sm:$0xff] }
 0x7b9   : > { %v3242_v50 = vmul.f32 %v4510_v4, %v6433_v1  ;;  %v3379_v43 = vcombine.high %v3378_v7, %v3378_v7  ;;  %v3415_v62 = vrot.slane %v3408_v41, %v6445_v33  ;;  %v3331_v46 = vcombine.high %v3248_v28, %v3248_v28  ;;  %3284 = vst.msk [vmem:[#allocation6] sm:$0x1] %vm6450_vm2, %v3248_v28 }
 0x7ba   : > { %v4512_v8 = vpop.eup %4511  ;;  %v3386_v45 = vrot.slane %v3378_v7, %v6445_v33  ;;  %v3292_v15 = vrot.slane %v3248_v28, %v6445_v33  ;;  %v3252_v18 = vmul.f32 %v3248_v28, %v3248_v28  ;;  %v3679_v7 = vld [vmem:[%s7115_s6 + $0x268] sm:$0xff]  ;;  %v3253_v41 = vmul.f32 %v6454_v35, %v6454_v35 }
 0x7bb   : > { %v3244_v17 = vsel %vm3243_vm7, %v6433_v1, %v3242_v50  ;;  %v6477_v32 = vrot.slane %v3379_v43, %v6445_v33  ;;  %v3235_v19 = vmul.f32 %v4512_v8, %v6437_v6  ;;  %v3422_v49 = vrot.slane %v3415_v62, %v6445_v33  ;;  %4305 = vmatpush3.msra.mxu1 %v3679_v7  ;;  %v3693_v8 = vld [vmem:[%s7115_s6 + $0x2d8] sm:$0xff]  ;;  %v3670_v7 = vld [vmem:[%s7115_s6 + $0x220] sm:$0xff] }
 0x7bc   : > { %v3247_v60 = vsel %vm3245_vm8, %v3246_v30, %v3244_v17  ;;  %v3338_v20 = vrot.slane %v3331_v46, %v6445_v33  ;;  %v3398_v29 = vcombine.high %v3386_v45, %v3386_v45  ;;  %v3293_v53 = vcombine.high %v3292_v15, %v3292_v15  ;;  %v3694_v30 = vld [vmem:[%s7115_s6 + $0x2e0] sm:$0xff]  ;;  %v3677_v45 = vld [vmem:[%s7115_s6 + $0x258] sm:$0xff] }
 0x7bd   : > { %v6483_v54 = vmul.f32 %v3247_v60, %v3211_v40  ;;  %3394 = vrot.lane.b32.xlu1 %v6477_v32, %s4588_s21  ;;  %v3237_v12 = vsel %vm3236_vm9, %v6437_v6, %v3235_v19  ;;  %3424 = vst.msk [vmem:[#allocation6 + $0x3] sm:$0x1] %vm6450_vm2, %v3422_v49  ;;  %v3425_v39 = vcombine.high %v3415_v62, %v3415_v62  ;;  %v6517_v2 = vsel %vm3256_vm11, %v3252_v18, 0.0  ;;  %v3617_v60 = vld [vmem:[%s7115_s6 + $0x78] sm:$0xff]  ;;  %v3612_v18 = vld [vmem:[%s7115_s6 + $0x50] sm:$0xff] }
 0x7be   : > { %v3240_v52 = vsel %vm3238_vm10, %v3239_v25, %v3237_v12  ;;  %v3345_v61 = vrot.slane %v3338_v20, %v6445_v33  ;;  %v6509_v22 = vrot.slane %v3293_v53, %v6445_v33  ;;  %v3300_v51 = vrot.slane %v3292_v15, %v6445_v33  ;;  %4306 = vmatprep.subr.mxu1 %v3694_v30  ;;  %v3633_v15 = vld [vmem:[%s7115_s6 + $0xf8] sm:$0xff]  ;;  %v3692_v12 = vld [vmem:[%s7115_s6 + $0x2d0] sm:$0xff] }
 0x7bf   : > { %v3562_v38 = vcombine.high %v6483_v54, %v6483_v54  ;;  %3524 = vst.msk [vmem:[#allocation6 + $0x6] sm:$0x1] %vm6450_vm2, %v6483_v54  ;;  %v3250_v56 = vmul.f32 %v3240_v52, %v3210_v14  ;;  %v6521_v63 = vrot.slane %v3425_v39, %v6445_v33  ;;  %v3437_v36 = vcombine.high %v3422_v49, %v3422_v49  ;;  %v3616_v14 = vld [vmem:[%s7115_s6 + $0x70] sm:$0xff]  ;;  %v3631_v49 = vld [vmem:[%s7115_s6 + $0xe8] sm:$0xff]  ;;  %v3685_v30 = vld [vmem:[%s7115_s6 + $0x298] sm:$0xff] }
 0x7c0   : > { %3347 = vst.msk [vmem:[#allocation6 + $0x1] sm:$0x1] %vm6450_vm2, %v3345_v61  ;;  %v3315_v42 = vcombine.high %v3300_v51, %v3300_v51  ;;  %v3348_v0 = vcombine.high %v3338_v20, %v3338_v20  ;;  %v3532_v26 = vrot.slane %v6483_v54, %v6445_v33  ;;  %v3360_v34 = vcombine.high %v3345_v61, %v3345_v61  ;;  %v3615_v20 = vld [vmem:[%s7115_s6 + $0x68] sm:$0xff]  ;;  %v3676_v53 = vld [vmem:[%s7115_s6 + $0x250] sm:$0xff]  ;;  %v3610_v51 = vld [vmem:[%s7115_s6 + $0x40] sm:$0xff] }
 0x7c1   : > { %3399 = vrot.lane.b32.xlu1 %v3398_v29, %s7123_s17  ;;  %v3569_v16 = vrot.slane %v3562_v38, %v6445_v33  ;;  %3447 = vst.msk [vmem:[#allocation6 + $0x4] sm:$0x1] %vm6450_vm2, %v3250_v56  ;;  %v3485_v59 = vcombine.high %v3250_v56, %v3250_v56  ;;  %v3254_v1 = vmul.f32 %v3250_v56, %v3250_v56  ;;  %v3260_v50 = vsel %vm3256_vm11, %v3253_v41, 0.0  ;;  %v3630_v29 = vld [vmem:[%s7115_s6 + $0xe0] sm:$0xff]  ;;  %v3691_v39 = vld [vmem:[%s7115_s6 + $0x2c8] sm:$0xff] }
 0x7c2   : > { %v3355_v23 = vrot.slane %v3348_v0, %v6445_v33  ;;  %v3533_v3 = vcombine.high %v3532_v26, %v3532_v26  ;;  %v3540_v57 = vrot.slane %v3532_v26, %v6445_v33  ;;  %v3455_v55 = vrot.slane %v3250_v56, %v6445_v33  ;;  %4307 = vmatpush3.msra.mxu1 %v3678_v44  ;;  %v3614_v38 = vld [vmem:[%s7115_s6 + $0x60] sm:$0xff]  ;;  %v3613_v56 = vld [vmem:[%s7115_s6 + $0x58] sm:$0xff]  ;;  %v3619_v44 = vld [vmem:[%s7115_s6 + $0x88] sm:$0xff] }
 0x7c3   : > { %v3576_v27 = vrot.slane %v3569_v16, %v6445_v33  ;;  %v6525_v58 = vrot.slane %v3485_v59, %v6445_v33  ;;  %v6528_v6 = vsel %vm3256_vm11, %v3254_v1, 0.0  ;;  %v3579_v28 = vcombine.high %v3569_v16, %v3569_v16  ;;  %4308 = vmatprep.subr.mxu1 %v3693_v8  ;;  %4230 = vmatprep.subr.mxu0 %v3633_v15  ;;  %v3628_v16 = vld [vmem:[%s7115_s6 + $0xd0] sm:$0xff]  ;;  %v3626_v1 = vld [vmem:[%s7115_s6 + $0xc0] sm:$0xff]  ;;  %v3689_v0 = vld [vmem:[%s7115_s6 + $0x2b8] sm:$0xff] }
 0x7c4   : > { %v6559_v47 = vrot.slane %v3533_v3, %v6445_v33  ;;  %v3552_v40 = vcombine.high %v3540_v57, %v3540_v57  ;;  %v3456_v37 = vcombine.high %v3455_v55, %v3455_v55  ;;  %v3255_v43 = vmul.f32 %v6483_v54, %v6483_v54  ;;  %4309 = vmatpush3.msra.mxu1 %v3677_v45  ;;  %v3632_v54 = vld [vmem:[%s7115_s6 + $0xf0] sm:$0xff]  ;;  %v3673_v26 = vld [vmem:[%s7115_s6 + $0x238] sm:$0xff]  ;;  %v3687_v57 = vld [vmem:[%s7115_s6 + $0x2a8] sm:$0xff] }
 0x7c5   : > { %3308 = vrot.lane.b32.xlu1 %v6509_v22, %s4588_s21  ;;  %v3591_v48 = vcombine.high %v3576_v27, %v3576_v27  ;;  %3578 = vst.msk [vmem:[#allocation6 + $0x7] sm:$0x1] %vm6450_vm2, %v3576_v27  ;;  %v6534_v9 = vrot.slane %v6525_v58, %v6445_v33  ;;  %v6586_v35 = vrot.slane %v3579_v28, %v6445_v33  ;;  %v3611_v27 = vld [vmem:[%s7115_s6 + $0x48] sm:$0xff]  ;;  %v3672_v3 = vld [vmem:[%s7115_s6 + $0x230] sm:$0xff]  ;;  %v3605_v28 = vld [vmem:[%s7115_s6 + $0x18] sm:$0xff] }
 0x7c6   : > { %v6575_v4 = vrot.slane %v3456_v37, %v6445_v33  ;;  %v3463_v62 = vrot.slane %v3455_v55, %v6445_v33  ;;  %v3266_v25 = vsel %vm3256_vm11, %v3255_v43, 0.0  ;;  %v3323_v17 = vcombine.high %v6509_v22, %v6509_v22  ;;  %4231 = vmatpush3.msra.mxu0 %v3617_v60  ;;  %4310 = vmatprep.subr.mxu1 %v3692_v12  ;;  %v3627_v22 = vld [vmem:[%s7115_s6 + $0xc8] sm:$0xff]  ;;  %v3622_v55 = vld [vmem:[%s7115_s6 + $0xa0] sm:$0xff]  ;;  %v3621_v37 = vld [vmem:[%s7115_s6 + $0x98] sm:$0xff] }
 0x7c7   : > { %3592 = vrot.lane.b32.xlu0 %v3591_v48, %s7123_s17  ;;  %3501 = vst.msk [vmem:[#allocation6 + $0x5] sm:$0x1] %vm6450_vm2, %v6534_v9  ;;  %v3365_v19 = vcombine.high %v3355_v23, %v3355_v23  ;;  %4232 = vmatprep.subr.mxu0 %v3632_v54  ;;  %v3403_v52 = vcombine.high %v6477_v32, %v6477_v32  ;;  %v3629_v32 = vld [vmem:[%s7115_s6 + $0xd8] sm:$0xff]  ;;  %v3604_v43 = vld [vmem:[%s7115_s6 + $0x10] sm:$0xff]  ;;  %v3603_v8 = vld [vmem:[%s7115_s6 + $0x8] sm:$0xff]  ;;  %vm3327_vm2 = vcmp.ge.s32.totalorder %v3280_v5, 96 }
 0x7c8   : > { %v3475_v46 = vcombine.high %v3463_v62, %v3463_v62  ;;  %4233 = vmatpush3.msra.mxu0 %v3616_v14  ;;  %4311 = vmatpush3.msra.mxu1 %v3676_v53  ;;  %v3442_v61 = vcombine.high %v6521_v63, %v6521_v63  ;;  %v3557_v48 = vcombine.high %v6559_v47, %v6559_v47  ;;  %v3684_v62 = vld [vmem:[%s7115_s6 + $0x290] sm:$0xff]  ;;  %v3618_v45 = vld [vmem:[%s7115_s6 + $0x80] sm:$0xff]  ;;  %v3667_v15 = vld [vmem:[%s7115_s6 + $0x208] sm:$0xff] }
 0x7c9   : > { %3433 = vrot.lane.b32.xlu1 %v6521_v63, %s4588_s21  ;;  %4234 = vmatprep.subr.mxu0 %v3631_v49  ;;  %v3502_v59 = vcombine.high %v6525_v58, %v6525_v58  ;;  %v3675_v63 = vld [vmem:[%s7115_s6 + $0x248] sm:$0xff]  ;;  %v3690_v58 = vld [vmem:[%s7115_s6 + $0x2c0] sm:$0xff]  ;;  %v3480_v41 = vcombine.high %v6575_v4, %v6575_v4  ;;  %v3596_v54 = vcombine.high %v6586_v35, %v6586_v35  ;;  %v3665_v14 = vld [vmem:[%s7115_s6 + $0x1f8] sm:$0xff] }
 0x7ca   : > { %4235 = vmatpush3.msra.mxu0 %v3615_v20  ;;  %4312 = vmatprep.subr.mxu1 %v3691_v39  ;;  %v3602_v60 = vld [vmem:[%s7115_s6] sm:$0xff]  ;;  %vm6838_vm4 = vmand %vm3327_vm2, %vm3328_vm3  ;;  %v3651_v12 = vld [vmem:[%s7115_s6 + $0x188] sm:$0xff] }
 0x7cb   : > { %4236 = vmatprep.subr.mxu0 %v3630_v29  ;;  %4313 = vmatpush3.msra.mxu1 %v3675_v63  ;;  %v3509_v21 = vrot.slane %v3502_v59, %v6445_v33  ;;  %v3688_v33 = vld [vmem:[%s7115_s6 + $0x2b0] sm:$0xff]  ;;  %v3666_v49 = vld [vmem:[%s7115_s6 + $0x200] sm:$0xff] }
 0x7cc   : > { %4237 = vmatpush3.msra.mxu0 %v3614_v38  ;;  %4314 = vmatprep.subr.mxu1 %v3690_v58  ;;  %v3726_v39 = vld [vmem:[%s7115_s6 + $0x3e0] sm:$0xff] }
 0x7cd   : > { %3316 = vrot.lane.b32.xlu1 %v3315_v42, %s7123_s17  ;;  %4238 = vmatprep.subr.mxu0 %v3629_v32  ;;  %v3625_v42 = vld [vmem:[%s7115_s6 + $0xb8] sm:$0xff] }
 0x7ce   : > { %4239 = vmatpush3.msra.mxu0 %v3613_v56  ;;  %4315 = vmatpush3.msra.mxu1 %v3674_v13 }
 0x7cf   : > { %4240 = vmatprep.subr.mxu0 %v3628_v16  ;;  %4316 = vmatprep.subr.mxu1 %v3689_v0  ;;  %v3737_v0 = vsub.s32 1, %v6440_v11 }
 0x7d0   : > { %4241 = vmatpush3.msra.mxu0 %v3612_v18  ;;  %4317 = vmatpush3.msra.mxu1 %v3673_v26  ;;  %v3749_v26 = vsub.s32 4, %v6440_v11 }
 0x7d1   : > { %3438 = vrot.lane.b32.xlu1 %v3437_v36, %s7123_s17  ;;  %4242 = vmatprep.subr.mxu0 %v3627_v22  ;;  %v3609_v36 = vld [vmem:[%s7115_s6 + $0x38] sm:$0xff] }
 0x7d2   : > { %4243 = vmatpush3.msra.mxu0 %v3611_v27  ;;  %4318 = vmatprep.subr.mxu1 %v3688_v33 }
 0x7d3   : > { %4244 = vmatprep.subr.mxu0 %v3626_v1  ;;  %4319 = vmatpush3.msra.mxu1 %v3672_v3 }
 0x7d4   : > { %4245 = vmatpush3.msra.mxu0 %v3610_v51  ;;  %4320 = vmatprep.subr.mxu1 %v3687_v57  ;;  %v3649_v57 = vld [vmem:[%s7115_s6 + $0x178] sm:$0xff] }
 0x7d5   : > { %3356 = vrot.lane.b32.xlu1 %v3355_v23, %s4588_s21  ;;  %4246 = vmatprep.subr.mxu0 %v3625_v42  ;;  %v3624_v23 = vld [vmem:[%s7115_s6 + $0xb0] sm:$0xff] }
 0x7d6   : > { %4247 = vmatpush3.msra.mxu0 %v3609_v36  ;;  %4321 = vmatpush3.msra.mxu1 %v3671_v10 }
 0x7d7   : > { %4248 = vmatprep.subr.mxu0 %v3624_v23  ;;  %v3733_v23 = vsub.s32 0, %v6440_v11 }
 0x7d8   : > { %4249 = vmatpush3.msra.mxu0 %v3608_v31  ;;  %v3745_v31 = vsub.s32 3, %v6440_v11 }
 0x7d9   : > { %3361 = vrot.lane.b32.xlu1 %v3360_v34, %s7123_s17  ;;  %v3623_v34 = vld [vmem:[%s7115_s6 + $0xa8] sm:$0xff] }
 0x7da   : > { %4250 = vmatprep.subr.mxu0 %v3623_v34 }
 0x7db   : > { %4251 = vmatpush3.msra.mxu0 %v3607_v24 }
 0x7dc   : > { %4252 = vmatprep.subr.mxu0 %v3622_v55  ;;  %v3664_v55 = vld [vmem:[%s7115_s6 + $0x1f0] sm:$0xff] }
 0x7dd   : > { %3548 = vrot.lane.b32.xlu1 %v6559_v47, %s4588_s21  ;;  %v3514_v47 = vcombine.high %v6534_v9, %v6534_v9  ;;  %v3606_v9 = vld [vmem:[%s7115_s6 + $0x20] sm:$0xff] }
 0x7de   : > { %4253 = vmatpush3.msra.mxu0 %v3606_v9  ;;  %v3648_v9 = vld [vmem:[%s7115_s6 + $0x170] sm:$0xff] }
 0x7df   : > { %4254 = vmatprep.subr.mxu0 %v3621_v37  ;;  %v3647_v37 = vld [vmem:[%s7115_s6 + $0x168] sm:$0xff] }
 0x7e0   : > { %4255 = vmatpush3.msra.mxu0 %v3605_v28  ;;  %v3661_v28 = vld [vmem:[%s7115_s6 + $0x1d8] sm:$0xff] }
 0x7e1   : > { %3553 = vrot.lane.b32.xlu1 %v3552_v40, %s7123_s17  ;;  %v3686_v40 = vld [vmem:[%s7115_s6 + $0x2a0] sm:$0xff] }
 0x7e2   : > { %4322 = vmatprep.subr.mxu1 %v3686_v40  ;;  %v3663_v40 = vld [vmem:[%s7115_s6 + $0x1e8] sm:$0xff] }
 0x7e3   : > { %4323 = vmatpush3.msra.mxu1 %v3670_v7  ;;  %v3662_v7 = vld [vmem:[%s7115_s6 + $0x1e0] sm:$0xff] }
 0x7e4   : > { %4324 = vmatprep.subr.mxu1 %v3685_v30  ;;  %v3645_v30 = vld [vmem:[%s7115_s6 + $0x158] sm:$0xff] }
 0x7e5   : > { %3471 = vrot.lane.b32.xlu1 %v6575_v4, %s4588_s21  ;;  %v3669_v4 = vld [vmem:[%s7115_s6 + $0x218] sm:$0xff] }
 0x7e6   : > { %3261 = vadd.xlane.f32.xlu0 %v3260_v50  ;;  %v3620_v50 = vld [vmem:[%s7115_s6 + $0x90] sm:$0xff]  ;;  %4325 = vmatpush3.msra.mxu1 %v3669_v4 }
 0x7e7   : > { %4256 = vmatprep.subr.mxu0 %v3620_v50  ;;  %4326 = vmatprep.subr.mxu1 %v3684_v62  ;;  %v3660_v50 = vld [vmem:[%s7115_s6 + $0x1d0] sm:$0xff]  ;;  %v3643_v62 = vld [vmem:[%s7115_s6 + $0x148] sm:$0xff] }
 0x7e8   : > { %4257 = vmatpush3.msra.mxu0 %v3604_v43  ;;  %v3644_v4 = vld [vmem:[%s7115_s6 + $0x150] sm:$0xff]  ;;  %v3659_v43 = vld [vmem:[%s7115_s6 + $0x1c8] sm:$0xff] }
 0x7e9   : > { %3587 = vrot.lane.b32.xlu1 %v6586_v35, %s4588_s21  ;;  %4258 = vmatprep.subr.mxu0 %v3619_v44  ;;  %v3658_v44 = vld [vmem:[%s7115_s6 + $0x1c0] sm:$0xff]  ;;  %v3652_v35 = vld [vmem:[%s7115_s6 + $0x190] sm:$0xff] }
 0x7ea   : > { %3267 = vadd.xlane.f32.xlu0 %v3266_v25  ;;  %v3519_v25 = vcombine.high %v3509_v21, %v3509_v21  ;;  %4259 = vmatpush3.msra.mxu0 %v3603_v8  ;;  %v3641_v8 = vld [vmem:[%s7115_s6 + $0x138] sm:$0xff] }
 0x7eb   : > { %4260 = vmatprep.subr.mxu0 %v3618_v45  ;;  %v3640_v45 = vld [vmem:[%s7115_s6 + $0x130] sm:$0xff] }
 0x7ec   : > { %4261 = vmatpush3.msra.mxu0 %v3602_v60  ;;  %v3639_v60 = vld [vmem:[%s7115_s6 + $0x128] sm:$0xff] }
 0x7ed   : > { %3476 = vrot.lane.b32.xlu1 %v3475_v46, %s7123_s17  ;;  %v3668_v46 = vld [vmem:[%s7115_s6 + $0x210] sm:$0xff]  ;;  %4265 = vmatprep.subr.mxu0 %v3665_v14  ;;  %v3653_v14 = vld [vmem:[%s7115_s6 + $0x198] sm:$0xff]  ;;  %s4519_s17 = sshll.u32 %s4595_s13, 4  ;;  %s4520_s17 = int_to_ptr.vmem [resolvable:$false] %s4519_s17 }
 0x7ee   : > { %4327 = vmatpush3.msra.mxu1 %v3668_v46  ;;  %v3657_v46 = vld [vmem:[%s7115_s6 + $0x1b8] sm:$0xff]  ;;  %s4521_s9 = scalar_lea.vmem %s4520_s17, 32 }
 0x7f1   : > { %3324 = vrot.lane.b32.xlu1 %v3323_v17, %s4592_s24  ;;  %v3683_v17 = vld [vmem:[%s7115_s6 + $0x288] sm:$0xff] }
 0x7f2   : > { %4328 = vmatprep.subr.mxu1 %v3683_v17  ;;  %v3656_v17 = vld [vmem:[%s7115_s6 + $0x1b0] sm:$0xff] }
 0x7f3   : > { %4329 = vmatpush3.msra.mxu1 %v3667_v15  ;;  %v3655_v15 = vld [vmem:[%s7115_s6 + $0x1a8] sm:$0xff] }
 0x7f5   : > { %3366 = vrot.lane.b32.xlu1 %v3365_v19, %s4592_s24  ;;  %v3682_v19 = vld [vmem:[%s7115_s6 + $0x280] sm:$0xff] }
 0x7f6   : > { %4330 = vmatprep.subr.mxu1 %v3682_v19  ;;  %v3654_v19 = vld [vmem:[%s7115_s6 + $0x1a0] sm:$0xff] }
 0x7f7   : > { %4331 = vmatpush3.msra.mxu1 %v3666_v49  ;;  %v3637_v49 = vld [vmem:[%s7115_s6 + $0x118] sm:$0xff] }
 0x7f9   : > { %3404 = vrot.lane.b32.xlu1 %v3403_v52, %s4592_s24 }
 0x7fd   : > { %3443 = vrot.lane.b32.xlu1 %v3442_v61, %s4592_s24 }
 0x801   : > { %3558 = vrot.lane.b32.xlu1 %v3557_v48, %s4592_s24 }
 0x805   : > { %3510 = vrot.lane.b32.xlu1 %v3509_v21, %s4588_s21  ;;  %v3753_v21 = vsub.s32 5, %v6440_v11  ;;  %s4069_s21 = sshll.u32 %s4699_s23, 4  ;;  %s4070_s21 = int_to_ptr.vmem [resolvable:$true] %s4069_s21 }
 0x806   : > { %s4515_s12 = scalar_lea.vmem %s4070_s21, 16  ;;  %p4522_p1 = scmp.lt.s32.totalorder %s4070_s21, %s4520_s17 }
 0x807   : > { %p4516_p12 = scmp.ne.s32.totalorder %s4070_s21, %s4515_s12  ;;  %p4523_p2 = scmp.lt.s32.totalorder %s4521_s9, %s4515_s12 }
 0x809   : > { %3515 = vrot.lane.b32.xlu1 %v3514_v47, %s7130_s19  ;;  %p4517_p13 = pnand %p4516_p12, %p4679_p5  ;;  %p4524_p3 = por %p4523_p2, %p4522_p1 }
 0x80b   : > { %p4518_p0 = pneg %p4517_p13 }
 0x80d   : > { %3481 = vrot.lane.b32.xlu1 %v3480_v41, %s4592_s24  ;;  %v3646_v41 = vld [vmem:[%s7115_s6 + $0x160] sm:$0xff]  ;;  %p4525_p4 = pnand %p4524_p3, %p4518_p0 }
 0x811   : > { %3520 = vrot.lane.b32.xlu1 %v3519_v25, %s4592_s24  ;;  %v3642_v25 = vld [vmem:[%s7115_s6 + $0x140] sm:$0xff] }
 0x815   : > { %3597 = vrot.lane.b32.xlu1 %v3596_v54, %s4592_s24  ;;  %v3638_v54 = vld [vmem:[%s7115_s6 + $0x120] sm:$0xff]  ;;  %s4067_s24 = scalar_lea.hbm %s7117_s8, %s4178_s22 }
 0x82f   : > { %v3395_v20 = vpop.permute.xlu1 %3394 }
 0x830   : > { %3397 = vst.msk [vmem:[#allocation6 + $0x2] sm:$0x1] %vm6796_vm14, %v3395_v20  ;;  %v3636_v20 = vld [vmem:[%s7115_s6 + $0x110] sm:$0xff] }
 0x833   : > { %v3400_v52 = vpop.permute.xlu1 %3399 }
 0x834   : > { %3402 = vst.msk [vmem:[#allocation6 + $0x2] sm:$0x1] %vm6804_vm1, %v3400_v52  ;;  %v3635_v52 = vld [vmem:[%s7115_s6 + $0x108] sm:$0xff] }
 0x837   : > { %v3309_v29 = vpop.permute.xlu1 %3308 }
 0x838   : > { %3314 = vst.msk [vmem:[#allocation6] sm:$0x1] %vm6796_vm14, %v3309_v29  ;;  %v3741_v29 = vsub.s32 2, %v6440_v11 }
 0x839   : > { %3258 = vadd.xlane.f32.xlu1 %v6517_v2  ;;  %v3593_v22 = vpop.permute.xlu0 %3592 }
 0x83b   : > { %v3434_v53 = vpop.permute.xlu1 %3433 }
 0x83c   : > { %3436 = vst.msk [vmem:[#allocation6 + $0x3] sm:$0x1] %vm6796_vm14, %v3434_v53  ;;  %v3650_v53 = vld [vmem:[%s7115_s6 + $0x180] sm:$0xff] }
 0x83d   : > { %3264 = vadd.xlane.f32.xlu1 %v6528_v6 }
 0x83f   : > { %v3317_v38 = vpop.permute.xlu1 %3316 }
 0x840   : > { %3322 = vst.msk [vmem:[#allocation6] sm:$0x1] %vm6804_vm1, %v3317_v38  ;;  %v3761_v38 = vsub.s32 7, %v6440_v11 }
 0x843   : > { %v3439_v32 = vpop.permute.xlu1 %3438 }
 0x844   : > { %3441 = vst.msk [vmem:[#allocation6 + $0x3] sm:$0x1] %vm6804_vm1, %v3439_v32  ;;  %v3634_v32 = vld [vmem:[%s7115_s6 + $0x100] sm:$0xff] }
 0x847   : > { %v3357_v56 = vpop.permute.xlu1 %3356 }
 0x848   : > { %3359 = vst.msk [vmem:[#allocation6 + $0x1] sm:$0x1] %vm6796_vm14, %v3357_v56  ;;  %v3729_v56 = vld [vmem:[%s7115_s6 + $0x3f8] sm:$0xff] }
 0x84b   : > { %v3362_v61 = vpop.permute.xlu1 %3361 }
 0x84c   : > { %3364 = vst.msk [vmem:[#allocation6 + $0x1] sm:$0x1] %vm6804_vm1, %v3362_v61 }
 0x84f   : > { %v3549_v2 = vpop.permute.xlu1 %3548 }
 0x850   : > { %3551 = vst.msk [vmem:[#allocation6 + $0x6] sm:$0x1] %vm6796_vm14, %v3549_v2  ;;  %v3713_v2 = vld [vmem:[%s7115_s6 + $0x378] sm:$0xff] }
 0x853   : > { %v3554_v6 = vpop.permute.xlu1 %3553 }
 0x854   : > { %3556 = vst.msk [vmem:[#allocation6 + $0x6] sm:$0x1] %vm6804_vm1, %v3554_v6 }
 0x857   : > { %v3472_v16 = vpop.permute.xlu1 %3471 }
 0x858   : > { %3474 = vst.msk [vmem:[#allocation6 + $0x4] sm:$0x1] %vm6796_vm14, %v3472_v16  ;;  %v3728_v16 = vld [vmem:[%s7115_s6 + $0x3f0] sm:$0xff] }
 0x85b   : > { %v3588_v18 = vpop.permute.xlu1 %3587 }
 0x85c   : > { %3590 = vst.msk [vmem:[#allocation6 + $0x7] sm:$0x1] %vm6796_vm14, %v3588_v18  ;;  %v3712_v18 = vld [vmem:[%s7115_s6 + $0x370] sm:$0xff] }
 0x85d   : > { %3595 = vst.msk [vmem:[#allocation6 + $0x7] sm:$0x1] %vm6804_vm1, %v3593_v22  ;;  %v3727_v22 = vld [vmem:[%s7115_s6 + $0x3e8] sm:$0xff] }
 0x85f   : > { %v3477_v27 = vpop.permute.xlu1 %3476 }
 0x860   : > { %3479 = vst.msk [vmem:[#allocation6 + $0x4] sm:$0x1] %vm6804_vm1, %v3477_v27  ;;  %v3711_v27 = vld [vmem:[%s7115_s6 + $0x368] sm:$0xff] }
 0x863   : > { %v3325_v48 = vpop.permute.xlu1 %3324 }
 0x864   : > { %3330 = vst.msk [vmem:[#allocation6] sm:$0x1] %vm6838_vm4, %v3325_v48  ;;  %v3710_v48 = vld [vmem:[%s7115_s6 + $0x360] sm:$0xff] }
 0x867   : > { %v3367_v59 = vpop.permute.xlu1 %3366 }
 0x868   : > { %3369 = vst.msk [vmem:[#allocation6 + $0x1] sm:$0x1] %vm6838_vm4, %v3367_v59  ;;  %v3725_v59 = vld [vmem:[%s7115_s6 + $0x3d8] sm:$0xff] }
 0x86b   : > { %v3405_v1 = vpop.permute.xlu1 %3404 }
 0x86c   : > { %3407 = vst.msk [vmem:[#allocation6 + $0x2] sm:$0x1] %vm6838_vm4, %v3405_v1  ;;  %v3709_v1 = vld [vmem:[%s7115_s6 + $0x358] sm:$0xff] }
 0x86f   : > { %v3444_v5 = vpop.permute.xlu1 %3443 }
 0x870   : > { %3446 = vst.msk [vmem:[#allocation6 + $0x3] sm:$0x1] %vm6838_vm4, %v3444_v5  ;;  %v3724_v5 = vld [vmem:[%s7115_s6 + $0x3d0] sm:$0xff] }
 0x873   : > { %v3559_v63 = vpop.permute.xlu1 %3558 }
 0x874   : > { %3561 = vst.msk [vmem:[#allocation6 + $0x6] sm:$0x1] %vm6838_vm4, %v3559_v63  ;;  %v3708_v63 = vld [vmem:[%s7115_s6 + $0x350] sm:$0xff] }
 0x877   : > { %v3511_v51 = vpop.permute.xlu1 %3510 }
 0x878   : > { %3513 = vst.msk [vmem:[#allocation6 + $0x5] sm:$0x1] %vm6796_vm14, %v3511_v51  ;;  %v3723_v51 = vld [vmem:[%s7115_s6 + $0x3c8] sm:$0xff] }
 0x87b   : > { %v3516_v58 = vpop.permute.xlu1 %3515 }
 0x87c   : > { %3518 = vst.msk [vmem:[#allocation6 + $0x5] sm:$0x1] %vm6804_vm1, %v3516_v58  ;;  %v3707_v58 = vld [vmem:[%s7115_s6 + $0x348] sm:$0xff] }
 0x87f   : > { %v3482_v42 = vpop.permute.xlu1 %3481 }
 0x880   : > { %3484 = vst.msk [vmem:[#allocation6 + $0x4] sm:$0x1] %vm6838_vm4, %v3482_v42  ;;  %v3722_v42 = vld [vmem:[%s7115_s6 + $0x3c0] sm:$0xff] }
 0x883   : > { %v3521_v13 = vpop.permute.xlu1 %3520 }
 0x884   : > { %3523 = vst.msk [vmem:[#allocation6 + $0x5] sm:$0x1] %vm6838_vm4, %v3521_v13  ;;  %v3706_v13 = vld [vmem:[%s7115_s6 + $0x340] sm:$0xff] }
 0x887   : > { %v3598_v36 = vpop.permute.xlu1 %3597 }
 0x888   : > { %3600 = vst.msk [vmem:[#allocation6 + $0x7] sm:$0x1] %vm6838_vm4, %v3598_v36  ;;  %v3721_v36 = vld [vmem:[%s7115_s6 + $0x3b8] sm:$0xff] }
 0x88f   : > { %v6867_v33 = vld [vmem:[#allocation6] sm:$0xff] }
 0x890   : > { %v3738_v34 = vrot.slane %v6867_v33, %v3737_v0  ;;  %v3754_v3 = vrot.slane %v6867_v33, %v3753_v21  ;;  %v3734_v24 = vrot.slane %v6867_v33, %v3733_v23  ;;  %v3750_v47 = vrot.slane %v6867_v33, %v3749_v26  ;;  %v3705_v0 = vld [vmem:[%s7115_s6 + $0x338] sm:$0xff]  ;;  %v3720_v21 = vld [vmem:[%s7115_s6 + $0x3b0] sm:$0xff]  ;;  %v3719_v26 = vld [vmem:[%s7115_s6 + $0x3a8] sm:$0xff] }
 0x891   : > { %v3746_v10 = vrot.slane %v6867_v33, %v3745_v31  ;;  %v3742_v61 = vrot.slane %v6867_v33, %v3741_v29  ;;  %v3762_v6 = vrot.slane %v6867_v33, %v3761_v38  ;;  %v3704_v23 = vld [vmem:[%s7115_s6 + $0x330] sm:$0xff]  ;;  %v3703_v31 = vld [vmem:[%s7115_s6 + $0x328] sm:$0xff] }
 0x892   : > { %3835 = vmatprep.mubr.f32.mxu0 %v3738_v34  ;;  %3975 = vmatprep.mubr.f32.mxu1 %v3754_v3  ;;  %v3718_v34 = vld [vmem:[%s7115_s6 + $0x3a0] sm:$0xff] }
 0x893   : > { %3836 = vmatmul.mubr.f32.vlgmr.msra.gmra.mxu0 %v3734_v24  ;;  %3976 = vmatmul.mubr.f32.vlgmr.msra.gmra.mxu1 %v3750_v47  ;;  %v3702_v3 = vld [vmem:[%s7115_s6 + $0x320] sm:$0xff]  ;;  %v3717_v24 = vld [vmem:[%s7115_s6 + $0x398] sm:$0xff] }
 0x894   : > { %4266 = vmatpush3.msra.mxu0 %v3649_v57  ;;  %3905 = vmatprep.mubr.f32.mxu0 %v3746_v10  ;;  %v3701_v47 = vld [vmem:[%s7115_s6 + $0x318] sm:$0xff]  ;;  %v3716_v57 = vld [vmem:[%s7115_s6 + $0x390] sm:$0xff]  ;;  %v3715_v10 = vld [vmem:[%s7115_s6 + $0x388] sm:$0xff] }
 0x895   : > { %4267 = vmatprep.subr.mxu0 %v3664_v55  ;;  %v3700_v55 = vld [vmem:[%s7115_s6 + $0x310] sm:$0xff] }
 0x896   : > { %4268 = vmatpush3.msra.mxu0 %v3648_v9  ;;  %v3699_v9 = vld [vmem:[%s7115_s6 + $0x308] sm:$0xff] }
 0x897   : > { %4269 = vmatprep.subr.mxu0 %v3663_v40  ;;  %v3757_v40 = vsub.s32 6, %v6440_v11 }
 0x898   : > { %4270 = vmatpush3.msra.mxu0 %v3647_v37  ;;  %v3714_v37 = vld [vmem:[%s7115_s6 + $0x380] sm:$0xff] }
 0x899   : > { %4271 = vmatprep.subr.mxu0 %v3662_v7  ;;  %v3698_v7 = vld [vmem:[%s7115_s6 + $0x300] sm:$0xff] }
 0x89a   : > { %4272 = vmatpush3.msra.mxu0 %v3646_v41  ;;  %v3758_v41 = vrot.slane %v6867_v33, %v3757_v40 }
 0x89b   : > { %4273 = vmatprep.subr.mxu0 %v3661_v28 }
 0x89c   : > { %4274 = vmatpush3.msra.mxu0 %v3645_v30  ;;  %v3262_v30 = vpop.xlane.xlu0 %3261 }
 0x89d   : > { %4275 = vmatprep.subr.mxu0 %v3660_v50 }
 0x89e   : > { %4276 = vmatpush3.msra.mxu0 %v3644_v4 }
 0x89f   : > { %4277 = vmatprep.subr.mxu0 %v3659_v43 }
 0x8a0   : > { %4278 = vmatpush3.msra.mxu0 %v3643_v62  ;;  %v3268_v43 = vpop.xlane.xlu0 %3267 }
 0x8a1   : > { %4279 = vmatprep.subr.mxu0 %v3658_v44 }
 0x8a2   : > { %4280 = vmatpush3.msra.mxu0 %v3642_v25 }
 0x8a3   : > { %4281 = vmatprep.subr.mxu0 %v3657_v46 }
 0x8a4   : > { %4282 = vmatpush3.msra.mxu0 %v3641_v8 }
 0x8a5   : > { %4283 = vmatprep.subr.mxu0 %v3656_v17 }
 0x8a6   : > { %4284 = vmatpush3.msra.mxu0 %v3640_v45 }
 0x8a7   : > { %4285 = vmatprep.subr.mxu0 %v3655_v15 }
 0x8a8   : > { %4286 = vmatpush3.msra.mxu0 %v3639_v60 }
 0x8a9   : > { %4287 = vmatprep.subr.mxu0 %v3654_v19 }
 0x8aa   : > { %4288 = vmatpush3.msra.mxu0 %v3638_v54 }
 0x8ab   : > { %4289 = vmatprep.subr.mxu0 %v3653_v14 }
 0x8ac   : > { %4290 = vmatpush3.msra.mxu0 %v3637_v49 }
 0x8ad   : > { %4291 = vmatprep.subr.mxu0 %v3652_v35 }
 0x8ae   : > { %4292 = vmatpush3.msra.mxu0 %v3636_v20 }
 0x8af   : > { %4293 = vmatprep.subr.mxu0 %v3651_v12 }
 0x8b0   : > { %4294 = vmatpush3.msra.mxu0 %v3635_v52 }
 0x8b1   : > { %4295 = vmatprep.subr.mxu0 %v3650_v53 }
 0x8b2   : > { %4296 = vmatpush3.msra.mxu0 %v3634_v32 }
 0x8b3   : > { %3906 = vmatmul.mubr.f32.vlgmr.msra.gmra.mxu0 %v3742_v61  ;;  %4335 = vmatprep.subr.mxu0 %v3729_v56 }
 0x8b4   : > { %4336 = vmatpush3.msra.mxu0 %v3713_v2  ;;  %4045 = vmatprep.mubr.f32.mxu0 %v3762_v6  ;;  %v4052_v2 = vld [vmem:[%s7116_s7] sm:$0x1] }
 0x8b5   : > { %4337 = vmatprep.subr.mxu0 %v3728_v16 }
 0x8b6   : > { %4338 = vmatpush3.msra.mxu0 %v3712_v18 }
 0x8b7   : > { %4339 = vmatprep.subr.mxu0 %v3727_v22 }
 0x8b8   : > { %4340 = vmatpush3.msra.mxu0 %v3711_v27 }
 0x8b9   : > { %4341 = vmatprep.subr.mxu0 %v3726_v39 }
 0x8ba   : > { %4342 = vmatpush3.msra.mxu0 %v3710_v48 }
 0x8bb   : > { %4343 = vmatprep.subr.mxu0 %v3725_v59 }
 0x8bc   : > { %4344 = vmatpush3.msra.mxu0 %v3709_v1 }
 0x8bd   : > { %4345 = vmatprep.subr.mxu0 %v3724_v5 }
 0x8be   : > { %4346 = vmatpush3.msra.mxu0 %v3708_v63 }
 0x8bf   : > { %4347 = vmatprep.subr.mxu0 %v3723_v51 }
 0x8c0   : > { %4348 = vmatpush3.msra.mxu0 %v3707_v58 }
 0x8c1   : > { %4349 = vmatprep.subr.mxu0 %v3722_v42 }
 0x8c2   : > { %4350 = vmatpush3.msra.mxu0 %v3706_v13  ;;  %v3259_v28 = vpop.xlane.xlu1 %3258 }
 0x8c3   : > { %4351 = vmatprep.subr.mxu0 %v3721_v36  ;;  %v3269_v11 = vadd.f32 %v3262_v30, %v3259_v28 }
 0x8c4   : > { %4352 = vmatpush3.msra.mxu0 %v3705_v0 }
 0x8c5   : > { %4353 = vmatprep.subr.mxu0 %v3720_v21 }
 0x8c6   : > { %4354 = vmatpush3.msra.mxu0 %v3704_v23  ;;  %v3265_v50 = vpop.xlane.xlu1 %3264 }
 0x8c7   : > { %4355 = vmatprep.subr.mxu0 %v3719_v26  ;;  %v3270_v4 = vadd.f32 %v3269_v11, %v3265_v50 }
 0x8c8   : > { %4356 = vmatpush3.msra.mxu0 %v3703_v31 }
 0x8c9   : > { %4357 = vmatprep.subr.mxu0 %v3718_v34  ;;  %v3271_v62 = vadd.f32 %v3270_v4, %v3268_v43 }
 0x8ca   : > { %4358 = vmatpush3.msra.mxu0 %v3702_v3 }
 0x8cb   : > { %4359 = vmatprep.subr.mxu0 %v3717_v24  ;;  %v3272_v44 = vrot.slane %v3271_v62, 4 }
 0x8cc   : > { %4360 = vmatpush3.msra.mxu0 %v3701_v47 }
 0x8cd   : > { %4361 = vmatprep.subr.mxu0 %v3716_v57  ;;  %v3273_v25 = vadd.f32 %v3272_v44, %v3271_v62 }
 0x8ce   : > { %4362 = vmatpush3.msra.mxu0 %v3700_v55 }
 0x8cf   : > { %4363 = vmatprep.subr.mxu0 %v3715_v10  ;;  %v3274_v46 = vrot.slane %v3273_v25, 2 }
 0x8d0   : > { %4364 = vmatpush3.msra.mxu0 %v3699_v9 }
 0x8d1   : > { %4365 = vmatprep.subr.mxu0 %v3714_v37  ;;  %v3275_v8 = vadd.f32 %v3274_v46, %v3273_v25 }
 0x8d2   : > { %4366 = vmatpush3.msra.mxu0 %v3698_v7 }
 0x8d3   : > { %4046 = vmatmul.mubr.f32.vlgmr.msra.gmra.mxu0 %v3758_v41  ;;  %v3276_v17 = vrot.slane %v3275_v8, 1 }
 0x8d5   : > { %v3277_v15 = vadd.f32 %v3276_v17, %v3275_v8 }
 0x8d7   : > { %v3278_v54 = vmax.f32 %v3277_v15, 1e-24 }
 0x8d9   : > { %4513 = vrsqrt.f32 %v3278_v54 }
 0x8e6   : > { %v4514_v61 = vpop.eup %4513 }
 0x953   : > { %v4262_v45 = vpop.f32.mrf.mxu0  ;;  %v4332_v14 = vpop.f32.mrf.mxu1 }
 0x955   : > { %v4263_v60 = vpop.f32.mrf.mxu0  ;;  %v4333_v20 = vpop.f32.mrf.mxu1 }
 0x956   : > { %v4264_v35 = vadd.f32 %v4263_v60, %v4262_v45  ;;  %v4334_v29 = vadd.f32 %v4333_v20, %v4332_v14 }
 0x973   : > { %v4297_v19 = vpop.f32.mrf.mxu0 }
 0x975   : > { %v4298_v33 = vpop.f32.mrf.mxu0 }
 0x976   : > { %v4299_v49 = vadd.f32 %v4298_v33, %v4297_v19 }
 0x978   : > { %v3908_v12 = vadd.f32 %v4299_v49, %v4264_v35 }
 0x97a   : > { %v3978_v38 = vadd.f32 %v4334_v29, %v3908_v12 }
 0x993   : > { %v4367_v52 = vpop.f32.mrf.mxu0 }
 0x995   : > { %v4368_v53 = vpop.f32.mrf.mxu0 }
 0x996   : > { %v4369_v32 = vadd.f32 %v4368_v53, %v4367_v52 }
 0x998   : > { %v4048_v56 = vadd.f32 %v4369_v32, %v3978_v38 }
 0x99a   : > { %v4051_v6 = vmul.f32 %v4514_v61, %v4048_v56 }
 0x99c   : > { %v4053_v16 = vadd.f32 %v4052_v2, %v4051_v6 }
 0x99e   : > { %4055 = vst.msk [vmem:[%s4699_s23] sm:$0x1] %vm4054_vm6, %v4053_v16 }
 0x99f   : > { %4528 = shalt.err (!%p4525_p4)
}
 0x9a0   : > { %s4529_s19 = scalar_lea.hbm %s4067_s24, 16  ;;  %s4533_s22 = scalar_lea.hbm %s7117_s8, 32 }
 0x9a1   : > { %p4530_p7 = scmp.ne.s32.totalorder %s4067_s24, %s4529_s19  ;;  %p4534_p10 = scmp.lt.s32.totalorder %s4067_s24, %s7117_s8 }
 0x9a2   : > { %p4535_p11 = scmp.lt.s32.totalorder %s4533_s22, %s4529_s19 }
 0x9a3   : > { %p4531_p8 = pnand %p4530_p7, %p4679_p5 }
 0x9a4   : > { %p4536_p12 = por %p4535_p11, %p4534_p10 }
 0x9a5   : > { %p4532_p9 = pneg %p4531_p8 }
 0x9a7   : > { %p4537_p13 = pnand %p4536_p12, %p4532_p9 }
 0x9a9   : > { %4540 = shalt.err (!%p4537_p13)
}
 0x9aa   : > { %4448 = dma.vmem_to_hbm [thread:$0]  (%p4679_p5), %s4070_s21, 16, %s4067_s24, %s4057_s10  }
 0x9ab PF: > { %p4454_p0 = scmp.ge.s32.totalorder %s4575_s30, 2  ;;  %s4081_s18 = sand.u32 1, %s4563_s27  }
 0x9ac   : > { %s4082_s12 = scalar_lea.sflag [#allocation8], %s4081_s18 }
 0x9ad   : > { %p4451_p1 = pnand %p4454_p0, %p4683_p6 }
 0x9af   : > { %p4452_p2 = pneg %p4451_p1 }
 0x9b1   : > { %4558 = dma.done.wait (%p4452_p2), %s4082_s12, 16  }
 0x9b2   : > { %4560 = vsyncadd (%p4452_p2), %s4082_s12, 4294967280  ;;  %p18_p3 = scmp.ge.s32.totalorder %s4666_s11, 4   ;;  %s7138_s27 = smov %s4567_s28 }
 0x9b3   : > { %s7139_s28 = smov %s4571_s29  ;;  %s7140_s29 = smov %s4677_s14 }
 0x9b4   : > { %s7141_s30 = smov %s4666_s11  ;;  %20 = sbr.rel (!%p18_p3) target bundleno = 3 (0x3), region = 93 }
 0x9b9   :  { %4086 = vsyncpa [#allocation8], 1 }
 0x9ba   :  { %4088 = vsyncpa [#allocation8 + $0x1], 1 }

</bundles_post_ra>
